<compile_context>
chip_gen: v7x
topology: tpu7x:2x2x1
jax: 0.10.0
libtpu: 0.0.40
codegen_flags: <defaults>
</compile_context>

<pallas_src>
import functools

import jax
import jax.numpy as jnp
from jax import lax
from jax.experimental import pallas as pl
from jax.experimental.pallas import tpu as pltpu

EPS = 1e-5
LANE = 128
SUB = 8

_TAPS3 = tuple((dh, dw) for dh in range(3) for dw in range(3))   # stride-1 conv
_TAPS2 = tuple((dh, dw) for dh in range(2) for dw in range(2))   # stride-2 (s2d)


def _round_up(x, m):
    return (x + m - 1) // m * m


# ----------------------------- parameter glue -------------------------------

def _fold_bn(gamma, beta, mean, var):
    """Fold eval-mode BN into per-channel scale & bias."""
    scale = gamma / jnp.sqrt(var + EPS)
    bias = beta - mean * scale
    return scale, bias


def _pack_weights(w_oihw, scale, stride, cin_pad, cout_pad):
    """(Cout, Cin, 3, 3) conv weight -> (T, K, Cout_pad) bf16 tap matrices.

    BN scale folded in.  For stride 2 the taps are expressed in space-to-depth
    coordinates: 4 window offsets over a 4*Cin_pad channel dim.
    """
    cout, cin = w_oihw.shape[0], w_oihw.shape[1]
    wf = w_oihw * scale[:, None, None, None]
    w_k = jnp.transpose(wf, (2, 3, 1, 0))                  # (kh, kw, cin, cout)
    if stride == 1:
        wt = jnp.zeros((9, cin_pad, cout_pad), jnp.float32)
        wt = wt.at[:, :cin, :cout].set(w_k.reshape(9, cin, cout))
    else:  # stride == 2
        wt = jnp.zeros((4, 4 * cin_pad, cout_pad), jnp.float32)
        for kh in range(3):
            for kw in range(3):
                t = (kh // 2) * 2 + (kw // 2)              # window offset idx
                ph = (kh % 2) * 2 + (kw % 2)               # phase block idx
                wt = wt.at[t, ph * cin_pad:ph * cin_pad + cin, :cout].set(
                    w_k[kh, kw])
    return wt.astype(jnp.bfloat16)


def _pad_bias(bias, cout_pad):
    return jnp.pad(bias.astype(jnp.float32),
                   (0, cout_pad - bias.shape[0])).reshape(1, cout_pad)


def _pad_channels(x_nhwc, cpad):
    c = x_nhwc.shape[-1]
    if c == cpad:
        return x_nhwc
    return jnp.pad(x_nhwc, ((0, 0), (0, 0), (0, 0), (0, cpad - c)))


def _prepare_flat_input(x_nhwc, stride, Ho, Wo, Wp):
    """Spatially pad (conv halo + width aligned to Wp + one overrun row) and
    flatten to (N, rows*Wp, K).  For stride 2 also space-to-depth so every
    conv tap becomes a contiguous flat slice."""
    N, H, W, C = x_nhwc.shape
    if stride == 1:
        rows = Ho + 3                                      # halo + 1 overrun row
        xp = jnp.pad(x_nhwc, ((0, 0), (1, 2), (1, Wp - Wo - 1), (0, 0)))
        K = C
    elif stride == 2:
        ph, pw = 1 + (H % 2), 1 + (W % 2)                  # pad to even extent
        xp = jnp.pad(x_nhwc, ((0, 0), (1, ph), (1, pw), (0, 0)))
        Hp, Wq = H + 1 + ph, W + 1 + pw
        xs = xp.reshape(N, Hp // 2, 2, Wq // 2, 2, C)
        xs = xs.transpose(0, 1, 3, 2, 4, 5).reshape(N, Hp // 2, Wq // 2, 4 * C)
        rows = Ho + 2                                      # (Ho+1) s2d rows + 1 overrun
        xp = jnp.pad(xs, ((0, 0), (0, 1), (0, Wp - Wo - 1), (0, 0)))
        K = 4 * C
    else:
        raise NotImplementedError("only stride 1 or 2 supported")
    return xp.reshape(N, rows * Wp, K)


def _col_mask(Ho, Wo, Wp):
    """(Ho*Wp, 1) f32 mask: 1 for valid output columns (< Wo), 0 otherwise."""
    col = jnp.arange(Wp, dtype=jnp.int32)
    m = (col < Wo).astype(jnp.float32)
    return jnp.tile(m, Ho).reshape(Ho * Wp, 1)


# ------------------------------ fused kernel ---------------------------------

def _fused_kernel(*refs, taps1, Ho, Wo, Wp, has_ds):
    """Whole residual block for one image.

    x_ref   : (L1, K)  flat padded input (bf16 for downsample, f32 identity)
    mask_ref: (M, 1)   f32 valid-column mask (M = Ho*Wp)
    w*_ref  : (T, K, Cp) bf16 tap weights (BN folded), b*_ref: (1, Cp) f32
    o_ref   : (M, Cp)  f32 output (valid at columns < Wo of each Wp row)
    y1_ref  : ((Ho+4)*Wp, Cp) bf16 VMEM scratch holding zero-halo'd y1
    """
    if has_ds:
        (x_ref, mask_ref, w1_ref, b1_ref, wd_ref, bd_ref,
         w2_ref, b2_ref, o_ref, y1_ref) = refs
    else:
        (x_ref, mask_ref, w1_ref, b1_ref,
         w2_ref, b2_ref, o_ref, y1_ref) = refs
        wd_ref = bd_ref = None

    M = Ho * Wp
    B = Wp + SUB            # 8-aligned base of y1 data inside the halo scratch

    # Zero the scratch so all conv2 halo reads (top/bottom/left/right) see 0.
    y1_ref[...] = jnp.zeros_like(y1_ref)

    # ---- conv1 (+ downsample conv) : shared contiguous input slabs ----------
    acc1 = None
    accd = None
    for t, (dh, dw) in enumerate(taps1):
        slab = x_ref[pl.ds(dh * Wp + dw, M), :].astype(jnp.bfloat16)
        p1 = jnp.dot(slab, w1_ref[t], preferred_element_type=jnp.float32)
        acc1 = p1 if acc1 is None else acc1 + p1
        if has_ds:
            pd = jnp.dot(slab, wd_ref[t], preferred_element_type=jnp.float32)
            accd = pd if accd is None else accd + pd

    # BN bias + ReLU, zero the alignment columns, store bf16 into the scratch.
    y1 = jnp.maximum(acc1 + b1_ref[...], 0.0) * mask_ref[...]
    y1_ref[pl.ds(B, M), :] = y1.astype(jnp.bfloat16)

    # ---- residual -------------------------------------------------------------
    if has_ds:
        acc2 = accd + bd_ref[...]                      # downsample conv + BN, f32
    else:
        # identity residual read in f32 from the same padded input block
        acc2 = x_ref[pl.ds(Wp + 1, M), :].astype(jnp.float32)

    # ---- conv2 from the VMEM scratch (no HBM round trip) ----------------------
    for t, (dh, dw) in enumerate(_TAPS3):
        slab = y1_ref[pl.ds(B + (dh - 1) * Wp + (dw - 1), M), :]
        acc2 = acc2 + jnp.dot(slab, w2_ref[t],
                              preferred_element_type=jnp.float32)

    o_ref[...] = jnp.maximum(acc2 + b2_ref[...], 0.0).astype(o_ref.dtype)


# ----------------------------- ResidualBlock ---------------------------------

def init_residual_block_params(key, in_channels, out_channels, stride):
    ks = jax.random.split(key, 6)

    def conv_w(k, cin, cout):
        return jax.random.normal(k, (cout, cin, 3, 3), jnp.float32) * 0.1

    def bn_params(k, c):
        k1, k2, k3, k4 = jax.random.split(k, 4)
        gamma = 1.0 + 0.1 * jax.random.normal(k1, (c,), jnp.float32)
        beta = 0.1 * jax.random.normal(k2, (c,), jnp.float32)
        mean = 0.1 * jax.random.normal(k3, (c,), jnp.float32)
        var = jnp.abs(jax.random.normal(k4, (c,), jnp.float32)) + 0.5
        return gamma, beta, mean, var

    params = {
        "w1": conv_w(ks[0], in_channels, out_channels),
        "bn1": bn_params(ks[1], out_channels),
        "w2": conv_w(ks[2], out_channels, out_channels),
        "bn2": bn_params(ks[3], out_channels),
    }
    if stride != 1 or in_channels != out_channels:
        params["w_ds"] = conv_w(ks[4], in_channels, out_channels)
        params["bn_ds"] = bn_params(ks[5], out_channels)
    return params


def residual_block_forward(params, x_nchw, *, stride):
    N, cin, H, W = x_nchw.shape
    cout = params["w1"].shape[0]
    cin_p, cout_p = _round_up(cin, LANE), _round_up(cout, LANE)
    Ho = (H - 1) // stride + 1
    Wo = (W - 1) // stride + 1
    Wp = _round_up(Wo + 2, SUB)                 # padded flat row width
    M = Ho * Wp
    has_ds = "w_ds" in params

    # NCHW -> NHWC once, lane-pad channels.
    x_nhwc = jnp.transpose(x_nchw, (0, 2, 3, 1))
    x_cp = _pad_channels(x_nhwc, cin_p)
    # Downsample blocks compute the residual in-kernel -> bf16 input halves
    # DMA; identity blocks keep f32 so the residual add stays in f32.
    x_in = x_cp.astype(jnp.bfloat16) if has_ds else x_cp
    x_flat = _prepare_flat_input(x_in, stride, Ho, Wo, Wp)
    L1, K = x_flat.shape[1], x_flat.shape[2]

    taps1 = _TAPS3 if stride == 1 else _TAPS2
    s1, b1 = _fold_bn(*params["bn1"])
    w1t = _pack_weights(params["w1"], s1, stride, cin_p, cout_p)
    b1p = _pad_bias(b1, cout_p)
    s2, b2 = _fold_bn(*params["bn2"])
    w2t = _pack_weights(params["w2"], s2, 1, cout_p, cout_p)
    b2p = _pad_bias(b2, cout_p)
    mask = _col_mask(Ho, Wo, Wp)

    in_arrays = [x_flat, mask, w1t, b1p]
    in_specs = [
        pl.BlockSpec((None, L1, K), lambda n: (n, 0, 0)),
        pl.BlockSpec((M, 1), lambda n: (0, 0)),
        pl.BlockSpec(w1t.shape, lambda n: (0, 0, 0)),
        pl.BlockSpec(b1p.shape, lambda n: (0, 0)),
    ]
    if has_ds:
        sd, bd = _fold_bn(*params["bn_ds"])
        wdt = _pack_weights(params["w_ds"], sd, stride, cin_p, cout_p)
        bdp = _pad_bias(bd, cout_p)
        in_arrays += [wdt, bdp]
        in_specs += [pl.BlockSpec(wdt.shape, lambda n: (0, 0, 0)),
                     pl.BlockSpec(bdp.shape, lambda n: (0, 0))]
    in_arrays += [w2t, b2p]
    in_specs += [pl.BlockSpec(w2t.shape, lambda n: (0, 0, 0)),
                 pl.BlockSpec(b2p.shape, lambda n: (0, 0))]

    L2 = (Ho + 4) * Wp                          # zero-halo y1 scratch rows

    out_flat = pl.pallas_call(
        functools.partial(_fused_kernel, taps1=taps1, Ho=Ho, Wo=Wo, Wp=Wp,
                          has_ds=has_ds),
        out_shape=jax.ShapeDtypeStruct((N, M, cout_p), jnp.float32),
        grid=(N,),
        in_specs=in_specs,
        out_specs=pl.BlockSpec((None, M, cout_p), lambda n: (n, 0, 0)),
        scratch_shapes=[pltpu.VMEM((L2, cout_p), jnp.bfloat16)],
        compiler_params=pltpu.CompilerParams(
            dimension_semantics=("parallel",)),
    )(*in_arrays)

    # Drop alignment columns / channel padding and return NCHW (module
    # contract).  When chaining blocks, keep the padded-NHWC layout instead.
    out = out_flat.reshape(N, Ho, Wp, cout_p)[:, :, :Wo, :cout]
    return jnp.transpose(out, (0, 3, 1, 2))


# ----------------------------- pure-JAX reference ----------------------------

def _bf16_round(a):
    return a.astype(jnp.bfloat16).astype(jnp.float32)


def _ref_forward(params, x_nchw, stride):
    """Pure-JAX reference mirroring the kernel's bf16-operand / f32-accumulate
    numerics (eval-mode BN folded identically)."""
    def conv_bn(x, w, bn, s):
        scale, bias = _fold_bn(*bn)
        wf = _bf16_round(w * scale[:, None, None, None])
        y = lax.conv_general_dilated(
            _bf16_round(x), wf, (s, s), ((1, 1), (1, 1)),
            dimension_numbers=("NCHW", "OIHW", "NCHW"),
            precision=lax.Precision.HIGHEST)
        return y + bias.reshape(1, -1, 1, 1)

    y = jnp.maximum(conv_bn(x_nchw, params["w1"], params["bn1"], stride), 0.0)
    y = conv_bn(y, params["w2"], params["bn2"], 1)
    if "w_ds" in params:
        r = conv_bn(x_nchw, params["w_ds"], params["bn_ds"], stride)
    else:
        r = x_nchw
    return jnp.maximum(y + r, 0.0)


# ----------------------------- main ------------------------------------------

if __name__ == "__main__":
    key = jax.random.PRNGKey(0)
    kx1, kp1, kx2, kp2 = jax.random.split(key, 4)

    fwd = jax.jit(residual_block_forward, static_argnames=("stride",))

    # 1) down-sampling block: stride 2, channel change (4 -> 8).
    in_c, out_c, stride = 4, 8, 2
    N, H, W = 2, 16, 16
    x = jax.random.normal(kx1, (N, in_c, H, W), jnp.float32)
    params = init_residual_block_params(kp1, in_c, out_c, stride)
    out = jax.block_until_ready(fwd(params, x, stride=stride))
    ref = _ref_forward(params, x, stride)
    assert out.shape == (N, out_c, H // stride, W // stride), out.shape
    err = float(jnp.max(jnp.abs(out - ref)))
    assert err < 2e-3, err

    # 2) identity-residual block: stride 1, same channels (8 -> 8).
    in_c2, out_c2, stride2 = 8, 8, 1
    x2 = jax.random.normal(kx2, (N, in_c2, H, W), jnp.float32)
    params2 = init_residual_block_params(kp2, in_c2, out_c2, stride2)
    out2 = jax.block_until_ready(fwd(params2, x2, stride=stride2))
    ref2 = _ref_forward(params2, x2, stride2)
    assert out2.shape == (N, out_c2, H, W), out2.shape
    err2 = float(jnp.max(jnp.abs(out2 - ref2)))
    assert err2 < 2e-3, err2

    print("KERNEL_OK")
</pallas_src>

<mosaic_0001>
module attributes {stable_mosaic.version = 11 : i64} {
  func.func @_fused_kernel(%arg0: i32, %arg1: memref<1x160x512xbf16, #tpu.memory_space<vmem>>, %arg2: memref<128x1xf32, #tpu.memory_space<vmem>>, %arg3: memref<4x512x128xbf16, #tpu.memory_space<vmem>>, %arg4: memref<1x128xf32, #tpu.memory_space<vmem>>, %arg5: memref<4x512x128xbf16, #tpu.memory_space<vmem>>, %arg6: memref<1x128xf32, #tpu.memory_space<vmem>>, %arg7: memref<9x128x128xbf16, #tpu.memory_space<vmem>>, %arg8: memref<1x128xf32, #tpu.memory_space<vmem>>, %arg9: memref<1x128x128xf32, #tpu.memory_space<vmem>>, %arg10: memref<192x128xbf16, #tpu.memory_space<vmem>>) attributes {dimension_semantics = [#tpu.dimension_semantics<parallel>], iteration_bounds = array<i64: 2>, scalar_prefetch = 0 : i64, scratch_operands = 1 : i64, tpu.core_type = #tpu.core_type<tc>, window_params = [{transform_indices = @transform_0, window_bounds = array<i64: 1, 160, 512>}, {pipeline_mode = #tpu.pipeline_mode<synchronous>, transform_indices = @transform_1, window_bounds = array<i64: 128, 1>}, {pipeline_mode = #tpu.pipeline_mode<synchronous>, transform_indices = @transform_2, window_bounds = array<i64: 4, 512, 128>}, {pipeline_mode = #tpu.pipeline_mode<synchronous>, transform_indices = @transform_3, window_bounds = array<i64: 1, 128>}, {pipeline_mode = #tpu.pipeline_mode<synchronous>, transform_indices = @transform_4, window_bounds = array<i64: 4, 512, 128>}, {pipeline_mode = #tpu.pipeline_mode<synchronous>, transform_indices = @transform_5, window_bounds = array<i64: 1, 128>}, {pipeline_mode = #tpu.pipeline_mode<synchronous>, transform_indices = @transform_6, window_bounds = array<i64: 9, 128, 128>}, {pipeline_mode = #tpu.pipeline_mode<synchronous>, transform_indices = @transform_7, window_bounds = array<i64: 1, 128>}, {transform_indices = @transform_8, window_bounds = array<i64: 1, 128, 128>}]} {
    %cst = arith.constant 0.000000e+00 : bf16
    %0 = vector.broadcast %cst : bf16 to vector<192x128xbf16>
    %c0 = arith.constant 0 : index
    %c0_0 = arith.constant 0 : index
    %1 = vector.load %arg10[%c0, %c0_0] : memref<192x128xbf16, #tpu.memory_space<vmem>>, vector<192x128xbf16>
    tpu.vector_store %arg10[%c0, %c0_0], %0 {strides = array<i32>} : memref<192x128xbf16, #tpu.memory_space<vmem>>, vector<192x128xbf16>,
    %c0_1 = arith.constant 0 : index
    %c0_2 = arith.constant 0 : index
    %c0_3 = arith.constant 0 : index
    %2 = vector.load %arg1[%c0_1, %c0_2, %c0_3] : memref<1x160x512xbf16, #tpu.memory_space<vmem>>, vector<1x128x512xbf16>
    %3 = vector.shape_cast %2 : vector<1x128x512xbf16> to vector<128x512xbf16>
    %c0_4 = arith.constant 0 : index
    %c0_5 = arith.constant 0 : index
    %c0_6 = arith.constant 0 : index
    %4 = vector.load %arg3[%c0_4, %c0_5, %c0_6] : memref<4x512x128xbf16, #tpu.memory_space<vmem>>, vector<1x512x128xbf16>
    %5 = vector.shape_cast %4 : vector<1x512x128xbf16> to vector<512x128xbf16>
    %cst_7 = arith.constant dense<0.000000e+00> : vector<128x128xf32>
    %6 = tpu.matmul %3, %5, %cst_7 {dimension_numbers = #tpu.dot_dimension_numbers<[1], [0], [0], [1], [0, 0, 1, 1], [], []>} : vector<128x512xbf16>, vector<512x128xbf16>, vector<128x128xf32> -> vector<128x128xf32>
    %c0_8 = arith.constant 0 : index
    %c0_9 = arith.constant 0 : index
    %c0_10 = arith.constant 0 : index
    %7 = vector.load %arg5[%c0_8, %c0_9, %c0_10] : memref<4x512x128xbf16, #tpu.memory_space<vmem>>, vector<1x512x128xbf16>
    %8 = vector.shape_cast %7 : vector<1x512x128xbf16> to vector<512x128xbf16>
    %cst_11 = arith.constant dense<0.000000e+00> : vector<128x128xf32>
    %9 = tpu.matmul %3, %8, %cst_11 {dimension_numbers = #tpu.dot_dimension_numbers<[1], [0], [0], [1], [0, 0, 1, 1], [], []>} : vector<128x512xbf16>, vector<512x128xbf16>, vector<128x128xf32> -> vector<128x128xf32>
    %c0_12 = arith.constant 0 : index
    %c1 = arith.constant 1 : index
    %c0_13 = arith.constant 0 : index
    %10 = vector.load %arg1[%c0_12, %c1, %c0_13] : memref<1x160x512xbf16, #tpu.memory_space<vmem>>, vector<1x128x512xbf16>
    %11 = vector.shape_cast %10 : vector<1x128x512xbf16> to vector<128x512xbf16>
    %c1_14 = arith.constant 1 : index
    %c0_15 = arith.constant 0 : index
    %c0_16 = arith.constant 0 : index
    %12 = vector.load %arg3[%c1_14, %c0_15, %c0_16] : memref<4x512x128xbf16, #tpu.memory_space<vmem>>, vector<1x512x128xbf16>
    %13 = vector.shape_cast %12 : vector<1x512x128xbf16> to vector<512x128xbf16>
    %cst_17 = arith.constant dense<0.000000e+00> : vector<128x128xf32>
    %14 = tpu.matmul %11, %13, %cst_17 {dimension_numbers = #tpu.dot_dimension_numbers<[1], [0], [0], [1], [0, 0, 1, 1], [], []>} : vector<128x512xbf16>, vector<512x128xbf16>, vector<128x128xf32> -> vector<128x128xf32>
    %15 = arith.addf %6, %14 : vector<128x128xf32>
    %c1_18 = arith.constant 1 : index
    %c0_19 = arith.constant 0 : index
    %c0_20 = arith.constant 0 : index
    %16 = vector.load %arg5[%c1_18, %c0_19, %c0_20] : memref<4x512x128xbf16, #tpu.memory_space<vmem>>, vector<1x512x128xbf16>
    %17 = vector.shape_cast %16 : vector<1x512x128xbf16> to vector<512x128xbf16>
    %cst_21 = arith.constant dense<0.000000e+00> : vector<128x128xf32>
    %18 = tpu.matmul %11, %17, %cst_21 {dimension_numbers = #tpu.dot_dimension_numbers<[1], [0], [0], [1], [0, 0, 1, 1], [], []>} : vector<128x512xbf16>, vector<512x128xbf16>, vector<128x128xf32> -> vector<128x128xf32>
    %19 = arith.addf %9, %18 : vector<128x128xf32>
    %c0_22 = arith.constant 0 : index
    %c16 = arith.constant 16 : index
    %c0_23 = arith.constant 0 : index
    %20 = vector.load %arg1[%c0_22, %c16, %c0_23] : memref<1x160x512xbf16, #tpu.memory_space<vmem>>, vector<1x128x512xbf16>
    %21 = vector.shape_cast %20 : vector<1x128x512xbf16> to vector<128x512xbf16>
    %c2 = arith.constant 2 : index
    %c0_24 = arith.constant 0 : index
    %c0_25 = arith.constant 0 : index
    %22 = vector.load %arg3[%c2, %c0_24, %c0_25] : memref<4x512x128xbf16, #tpu.memory_space<vmem>>, vector<1x512x128xbf16>
    %23 = vector.shape_cast %22 : vector<1x512x128xbf16> to vector<512x128xbf16>
    %cst_26 = arith.constant dense<0.000000e+00> : vector<128x128xf32>
    %24 = tpu.matmul %21, %23, %cst_26 {dimension_numbers = #tpu.dot_dimension_numbers<[1], [0], [0], [1], [0, 0, 1, 1], [], []>} : vector<128x512xbf16>, vector<512x128xbf16>, vector<128x128xf32> -> vector<128x128xf32>
    %25 = arith.addf %15, %24 : vector<128x128xf32>
    %c2_27 = arith.constant 2 : index
    %c0_28 = arith.constant 0 : index
    %c0_29 = arith.constant 0 : index
    %26 = vector.load %arg5[%c2_27, %c0_28, %c0_29] : memref<4x512x128xbf16, #tpu.memory_space<vmem>>, vector<1x512x128xbf16>
    %27 = vector.shape_cast %26 : vector<1x512x128xbf16> to vector<512x128xbf16>
    %cst_30 = arith.constant dense<0.000000e+00> : vector<128x128xf32>
    %28 = tpu.matmul %21, %27, %cst_30 {dimension_numbers = #tpu.dot_dimension_numbers<[1], [0], [0], [1], [0, 0, 1, 1], [], []>} : vector<128x512xbf16>, vector<512x128xbf16>, vector<128x128xf32> -> vector<128x128xf32>
    %29 = arith.addf %19, %28 : vector<128x128xf32>
    %c0_31 = arith.constant 0 : index
    %c17 = arith.constant 17 : index
    %c0_32 = arith.constant 0 : index
    %30 = vector.load %arg1[%c0_31, %c17, %c0_32] : memref<1x160x512xbf16, #tpu.memory_space<vmem>>, vector<1x128x512xbf16>
    %31 = vector.shape_cast %30 : vector<1x128x512xbf16> to vector<128x512xbf16>
    %c3 = arith.constant 3 : index
    %c0_33 = arith.constant 0 : index
    %c0_34 = arith.constant 0 : index
    %32 = vector.load %arg3[%c3, %c0_33, %c0_34] : memref<4x512x128xbf16, #tpu.memory_space<vmem>>, vector<1x512x128xbf16>
    %33 = vector.shape_cast %32 : vector<1x512x128xbf16> to vector<512x128xbf16>
    %cst_35 = arith.constant dense<0.000000e+00> : vector<128x128xf32>
    %34 = tpu.matmul %31, %33, %cst_35 {dimension_numbers = #tpu.dot_dimension_numbers<[1], [0], [0], [1], [0, 0, 1, 1], [], []>} : vector<128x512xbf16>, vector<512x128xbf16>, vector<128x128xf32> -> vector<128x128xf32>
    %35 = arith.addf %25, %34 : vector<128x128xf32>
    %c3_36 = arith.constant 3 : index
    %c0_37 = arith.constant 0 : index
    %c0_38 = arith.constant 0 : index
    %36 = vector.load %arg5[%c3_36, %c0_37, %c0_38] : memref<4x512x128xbf16, #tpu.memory_space<vmem>>, vector<1x512x128xbf16>
    %37 = vector.shape_cast %36 : vector<1x512x128xbf16> to vector<512x128xbf16>
    %cst_39 = arith.constant dense<0.000000e+00> : vector<128x128xf32>
    %38 = tpu.matmul %31, %37, %cst_39 {dimension_numbers = #tpu.dot_dimension_numbers<[1], [0], [0], [1], [0, 0, 1, 1], [], []>} : vector<128x512xbf16>, vector<512x128xbf16>, vector<128x128xf32> -> vector<128x128xf32>
    %39 = arith.addf %29, %38 : vector<128x128xf32>
    %c0_40 = arith.constant 0 : index
    %c0_41 = arith.constant 0 : index
    %40 = vector.load %arg4[%c0_40, %c0_41] : memref<1x128xf32, #tpu.memory_space<vmem>>, vector<1x128xf32>
    %41 = vector.broadcast %40 : vector<1x128xf32> to vector<128x128xf32>
    %42 = arith.addf %35, %41 : vector<128x128xf32>
    %cst_42 = arith.constant 0.000000e+00 : f32
    %43 = vector.broadcast %cst_42 : f32 to vector<128x128xf32>
    %44 = arith.maximumf %42, %43 : vector<128x128xf32>
    %c0_43 = arith.constant 0 : index
    %c0_44 = arith.constant 0 : index
    %45 = vector.load %arg2[%c0_43, %c0_44] : memref<128x1xf32, #tpu.memory_space<vmem>>, vector<128x1xf32>
    %46 = vector.broadcast %45 : vector<128x1xf32> to vector<128x128xf32>
    %47 = arith.mulf %44, %46 : vector<128x128xf32>
    %48 = arith.truncf %47 : vector<128x128xf32> to vector<128x128xbf16>
    %c24 = arith.constant 24 : index
    %c0_45 = arith.constant 0 : index
    %49 = vector.load %arg10[%c24, %c0_45] : memref<192x128xbf16, #tpu.memory_space<vmem>>, vector<128x128xbf16>
    tpu.vector_store %arg10[%c24, %c0_45], %48 {strides = array<i32>} : memref<192x128xbf16, #tpu.memory_space<vmem>>, vector<128x128xbf16>,
    %c0_46 = arith.constant 0 : index
    %c0_47 = arith.constant 0 : index
    %50 = vector.load %arg6[%c0_46, %c0_47] : memref<1x128xf32, #tpu.memory_space<vmem>>, vector<1x128xf32>
    %51 = vector.broadcast %50 : vector<1x128xf32> to vector<128x128xf32>
    %52 = arith.addf %39, %51 : vector<128x128xf32>
    %c7 = arith.constant 7 : index
    %c0_48 = arith.constant 0 : index
    %53 = vector.load %arg10[%c7, %c0_48] : memref<192x128xbf16, #tpu.memory_space<vmem>>, vector<128x128xbf16>
    %c0_49 = arith.constant 0 : index
    %c0_50 = arith.constant 0 : index
    %c0_51 = arith.constant 0 : index
    %54 = vector.load %arg7[%c0_49, %c0_50, %c0_51] : memref<9x128x128xbf16, #tpu.memory_space<vmem>>, vector<1x128x128xbf16>
    %55 = vector.shape_cast %54 : vector<1x128x128xbf16> to vector<128x128xbf16>
    %cst_52 = arith.constant dense<0.000000e+00> : vector<128x128xf32>
    %56 = tpu.matmul %53, %55, %cst_52 {dimension_numbers = #tpu.dot_dimension_numbers<[1], [0], [0], [1], [0, 0, 1, 1], [], []>} : vector<128x128xbf16>, vector<128x128xbf16>, vector<128x128xf32> -> vector<128x128xf32>
    %57 = arith.addf %52, %56 : vector<128x128xf32>
    %c8 = arith.constant 8 : index
    %c0_53 = arith.constant 0 : index
    %58 = vector.load %arg10[%c8, %c0_53] : memref<192x128xbf16, #tpu.memory_space<vmem>>, vector<128x128xbf16>
    %c1_54 = arith.constant 1 : index
    %c0_55 = arith.constant 0 : index
    %c0_56 = arith.constant 0 : index
    %59 = vector.load %arg7[%c1_54, %c0_55, %c0_56] : memref<9x128x128xbf16, #tpu.memory_space<vmem>>, vector<1x128x128xbf16>
    %60 = vector.shape_cast %59 : vector<1x128x128xbf16> to vector<128x128xbf16>
    %cst_57 = arith.constant dense<0.000000e+00> : vector<128x128xf32>
    %61 = tpu.matmul %58, %60, %cst_57 {dimension_numbers = #tpu.dot_dimension_numbers<[1], [0], [0], [1], [0, 0, 1, 1], [], []>} : vector<128x128xbf16>, vector<128x128xbf16>, vector<128x128xf32> -> vector<128x128xf32>
    %62 = arith.addf %57, %61 : vector<128x128xf32>
    %c9 = arith.constant 9 : index
    %c0_58 = arith.constant 0 : index
    %63 = vector.load %arg10[%c9, %c0_58] : memref<192x128xbf16, #tpu.memory_space<vmem>>, vector<128x128xbf16>
    %c2_59 = arith.constant 2 : index
    %c0_60 = arith.constant 0 : index
    %c0_61 = arith.constant 0 : index
    %64 = vector.load %arg7[%c2_59, %c0_60, %c0_61] : memref<9x128x128xbf16, #tpu.memory_space<vmem>>, vector<1x128x128xbf16>
    %65 = vector.shape_cast %64 : vector<1x128x128xbf16> to vector<128x128xbf16>
    %cst_62 = arith.constant dense<0.000000e+00> : vector<128x128xf32>
    %66 = tpu.matmul %63, %65, %cst_62 {dimension_numbers = #tpu.dot_dimension_numbers<[1], [0], [0], [1], [0, 0, 1, 1], [], []>} : vector<128x128xbf16>, vector<128x128xbf16>, vector<128x128xf32> -> vector<128x128xf32>
    %67 = arith.addf %62, %66 : vector<128x128xf32>
    %c23 = arith.constant 23 : index
    %c0_63 = arith.constant 0 : index
    %68 = vector.load %arg10[%c23, %c0_63] : memref<192x128xbf16, #tpu.memory_space<vmem>>, vector<128x128xbf16>
    %c3_64 = arith.constant 3 : index
    %c0_65 = arith.constant 0 : index
    %c0_66 = arith.constant 0 : index
    %69 = vector.load %arg7[%c3_64, %c0_65, %c0_66] : memref<9x128x128xbf16, #tpu.memory_space<vmem>>, vector<1x128x128xbf16>
    %70 = vector.shape_cast %69 : vector<1x128x128xbf16> to vector<128x128xbf16>
    %cst_67 = arith.constant dense<0.000000e+00> : vector<128x128xf32>
    %71 = tpu.matmul %68, %70, %cst_67 {dimension_numbers = #tpu.dot_dimension_numbers<[1], [0], [0], [1], [0, 0, 1, 1], [], []>} : vector<128x128xbf16>, vector<128x128xbf16>, vector<128x128xf32> -> vector<128x128xf32>
    %72 = arith.addf %67, %71 : vector<128x128xf32>
    %c24_68 = arith.constant 24 : index
    %c0_69 = arith.constant 0 : index
    %73 = vector.load %arg10[%c24_68, %c0_69] : memref<192x128xbf16, #tpu.memory_space<vmem>>, vector<128x128xbf16>
    %c4 = arith.constant 4 : index
    %c0_70 = arith.constant 0 : index
    %c0_71 = arith.constant 0 : index
    %74 = vector.load %arg7[%c4, %c0_70, %c0_71] : memref<9x128x128xbf16, #tpu.memory_space<vmem>>, vector<1x128x128xbf16>
    %75 = vector.shape_cast %74 : vector<1x128x128xbf16> to vector<128x128xbf16>
    %cst_72 = arith.constant dense<0.000000e+00> : vector<128x128xf32>
    %76 = tpu.matmul %73, %75, %cst_72 {dimension_numbers = #tpu.dot_dimension_numbers<[1], [0], [0], [1], [0, 0, 1, 1], [], []>} : vector<128x128xbf16>, vector<128x128xbf16>, vector<128x128xf32> -> vector<128x128xf32>
    %77 = arith.addf %72, %76 : vector<128x128xf32>
    %c25 = arith.constant 25 : index
    %c0_73 = arith.constant 0 : index
    %78 = vector.load %arg10[%c25, %c0_73] : memref<192x128xbf16, #tpu.memory_space<vmem>>, vector<128x128xbf16>
    %c5 = arith.constant 5 : index
    %c0_74 = arith.constant 0 : index
    %c0_75 = arith.constant 0 : index
    %79 = vector.load %arg7[%c5, %c0_74, %c0_75] : memref<9x128x128xbf16, #tpu.memory_space<vmem>>, vector<1x128x128xbf16>
    %80 = vector.shape_cast %79 : vector<1x128x128xbf16> to vector<128x128xbf16>
    %cst_76 = arith.constant dense<0.000000e+00> : vector<128x128xf32>
    %81 = tpu.matmul %78, %80, %cst_76 {dimension_numbers = #tpu.dot_dimension_numbers<[1], [0], [0], [1], [0, 0, 1, 1], [], []>} : vector<128x128xbf16>, vector<128x128xbf16>, vector<128x128xf32> -> vector<128x128xf32>
    %82 = arith.addf %77, %81 : vector<128x128xf32>
    %c39 = arith.constant 39 : index
    %c0_77 = arith.constant 0 : index
    %83 = vector.load %arg10[%c39, %c0_77] : memref<192x128xbf16, #tpu.memory_space<vmem>>, vector<128x128xbf16>
    %c6 = arith.constant 6 : index
    %c0_78 = arith.constant 0 : index
    %c0_79 = arith.constant 0 : index
    %84 = vector.load %arg7[%c6, %c0_78, %c0_79] : memref<9x128x128xbf16, #tpu.memory_space<vmem>>, vector<1x128x128xbf16>
    %85 = vector.shape_cast %84 : vector<1x128x128xbf16> to vector<128x128xbf16>
    %cst_80 = arith.constant dense<0.000000e+00> : vector<128x128xf32>
    %86 = tpu.matmul %83, %85, %cst_80 {dimension_numbers = #tpu.dot_dimension_numbers<[1], [0], [0], [1], [0, 0, 1, 1], [], []>} : vector<128x128xbf16>, vector<128x128xbf16>, vector<128x128xf32> -> vector<128x128xf32>
    %87 = arith.addf %82, %86 : vector<128x128xf32>
    %c40 = arith.constant 40 : index
    %c0_81 = arith.constant 0 : index
    %88 = vector.load %arg10[%c40, %c0_81] : memref<192x128xbf16, #tpu.memory_space<vmem>>, vector<128x128xbf16>
    %c7_82 = arith.constant 7 : index
    %c0_83 = arith.constant 0 : index
    %c0_84 = arith.constant 0 : index
    %89 = vector.load %arg7[%c7_82, %c0_83, %c0_84] : memref<9x128x128xbf16, #tpu.memory_space<vmem>>, vector<1x128x128xbf16>
    %90 = vector.shape_cast %89 : vector<1x128x128xbf16> to vector<128x128xbf16>
    %cst_85 = arith.constant dense<0.000000e+00> : vector<128x128xf32>
    %91 = tpu.matmul %88, %90, %cst_85 {dimension_numbers = #tpu.dot_dimension_numbers<[1], [0], [0], [1], [0, 0, 1, 1], [], []>} : vector<128x128xbf16>, vector<128x128xbf16>, vector<128x128xf32> -> vector<128x128xf32>
    %92 = arith.addf %87, %91 : vector<128x128xf32>
    %c41 = arith.constant 41 : index
    %c0_86 = arith.constant 0 : index
    %93 = vector.load %arg10[%c41, %c0_86] : memref<192x128xbf16, #tpu.memory_space<vmem>>, vector<128x128xbf16>
    %c8_87 = arith.constant 8 : index
    %c0_88 = arith.constant 0 : index
    %c0_89 = arith.constant 0 : index
    %94 = vector.load %arg7[%c8_87, %c0_88, %c0_89] : memref<9x128x128xbf16, #tpu.memory_space<vmem>>, vector<1x128x128xbf16>
    %95 = vector.shape_cast %94 : vector<1x128x128xbf16> to vector<128x128xbf16>
    %cst_90 = arith.constant dense<0.000000e+00> : vector<128x128xf32>
    %96 = tpu.matmul %93, %95, %cst_90 {dimension_numbers = #tpu.dot_dimension_numbers<[1], [0], [0], [1], [0, 0, 1, 1], [], []>} : vector<128x128xbf16>, vector<128x128xbf16>, vector<128x128xf32> -> vector<128x128xf32>
    %97 = arith.addf %92, %96 : vector<128x128xf32>
    %c0_91 = arith.constant 0 : index
    %c0_92 = arith.constant 0 : index
    %98 = vector.load %arg8[%c0_91, %c0_92] : memref<1x128xf32, #tpu.memory_space<vmem>>, vector<1x128xf32>
    %99 = vector.broadcast %98 : vector<1x128xf32> to vector<128x128xf32>
    %100 = arith.addf %97, %99 : vector<128x128xf32>
    %cst_93 = arith.constant 0.000000e+00 : f32
    %101 = vector.broadcast %cst_93 : f32 to vector<128x128xf32>
    %102 = arith.maximumf %100, %101 : vector<128x128xf32>
    %c0_94 = arith.constant 0 : index
    %c0_95 = arith.constant 0 : index
    %c0_96 = arith.constant 0 : index
    %103 = vector.load %arg9[%c0_94, %c0_95, %c0_96] : memref<1x128x128xf32, #tpu.memory_space<vmem>>, vector<1x128x128xf32>
    %104 = vector.shape_cast %103 : vector<1x128x128xf32> to vector<128x128xf32>
    %105 = vector.shape_cast %102 : vector<128x128xf32> to vector<1x128x128xf32>
    tpu.vector_store %arg9[%c0_94, %c0_95, %c0_96], %105 {strides = array<i32>} : memref<1x128x128xf32, #tpu.memory_space<vmem>>, vector<1x128x128xf32>,
    return
  }
  func.func @transform_0(%arg0: i32) -> (i32, i32, i32) {
    %c0_i32 = arith.constant 0 : i32
    %c0_i32_0 = arith.constant 0 : i32
    %c0_i32_1 = arith.constant 0 : i32
    return %arg0, %c0_i32, %c0_i32_0 : i32, i32, i32
  }
  func.func @transform_1(%arg0: i32) -> (i32, i32) {
    %c0_i32 = arith.constant 0 : i32
    %c0_i32_0 = arith.constant 0 : i32
    %c0_i32_1 = arith.constant 0 : i32
    return %c0_i32, %c0_i32_0 : i32, i32
  }
  func.func @transform_2(%arg0: i32) -> (i32, i32, i32) {
    %c0_i32 = arith.constant 0 : i32
    %c0_i32_0 = arith.constant 0 : i32
    %c0_i32_1 = arith.constant 0 : i32
    %c0_i32_2 = arith.constant 0 : i32
    return %c0_i32, %c0_i32_0, %c0_i32_1 : i32, i32, i32
  }
  func.func @transform_3(%arg0: i32) -> (i32, i32) {
    %c0_i32 = arith.constant 0 : i32
    %c0_i32_0 = arith.constant 0 : i32
    %c0_i32_1 = arith.constant 0 : i32
    return %c0_i32, %c0_i32_0 : i32, i32
  }
  func.func @transform_4(%arg0: i32) -> (i32, i32, i32) {
    %c0_i32 = arith.constant 0 : i32
    %c0_i32_0 = arith.constant 0 : i32
    %c0_i32_1 = arith.constant 0 : i32
    %c0_i32_2 = arith.constant 0 : i32
    return %c0_i32, %c0_i32_0, %c0_i32_1 : i32, i32, i32
  }
  func.func @transform_5(%arg0: i32) -> (i32, i32) {
    %c0_i32 = arith.constant 0 : i32
    %c0_i32_0 = arith.constant 0 : i32
    %c0_i32_1 = arith.constant 0 : i32
    return %c0_i32, %c0_i32_0 : i32, i32
  }
  func.func @transform_6(%arg0: i32) -> (i32, i32, i32) {
    %c0_i32 = arith.constant 0 : i32
    %c0_i32_0 = arith.constant 0 : i32
    %c0_i32_1 = arith.constant 0 : i32
    %c0_i32_2 = arith.constant 0 : i32
    return %c0_i32, %c0_i32_0, %c0_i32_1 : i32, i32, i32
  }
  func.func @transform_7(%arg0: i32) -> (i32, i32) {
    %c0_i32 = arith.constant 0 : i32
    %c0_i32_0 = arith.constant 0 : i32
    %c0_i32_1 = arith.constant 0 : i32
    return %c0_i32, %c0_i32_0 : i32, i32
  }
  func.func @transform_8(%arg0: i32) -> (i32, i32, i32) {
    %c0_i32 = arith.constant 0 : i32
    %c0_i32_0 = arith.constant 0 : i32
    %c0_i32_1 = arith.constant 0 : i32
    return %arg0, %c0_i32, %c0_i32_0 : i32, i32, i32
  }
}

</mosaic_0001>

<bundles_post_ra>
// kernel: tile.8
= control target key start
LH: loop header
LB: loop body
LE: loop exit
PB: predicated region body
PF: predicated region fallthrough
CT: control target
= control target key end

     0   :  { %s22_s0 = inlined_call_operand.vmem [shape: f32[16], index: 0, kind: input, shape index: {}]   ;;  %s23_s1 = inlined_call_operand.vmem [shape: f32[8,16], index: 1, kind: output, shape index: {}]  }
   0x1   :  { %v4_v0 = vld [vmem:[%s22_s0] ss:$0 sm:$0xff] }
   0x2   :  { %5 = vst [vmem:[%s23_s1] sm:$0xff] %v4_v0 }

// kernel: tile.0
= control target key start
LH: loop header
LB: loop body
LE: loop exit
PB: predicated region body
PF: predicated region fallthrough
CT: control target
= control target key end

     0   :  { %vm3_vm0 = vcmask 7168   ;;  %s264_s8 = smov 125   ;;  %s265_s17 = smov 126   ;;  %s547_s0 = inlined_call_operand.vmem [shape: f32[8,16], index: 0, kind: input, shape index: {}]   ;;  %s548_s1 = inlined_call_operand.vmem [shape: f32[128,1], index: 1, kind: output, shape index: {}]  }
   0x1   :  { %v8_v0 = vld [vmem:[%s547_s0] sm:$0xff]   ;;  %s263_s0 = smov 127   ;;  %s266_s18 = smov 124  }
   0x2   :  { %9 = vrot.lane.b32.xlu0 %v8_v0, %s263_s0  ;;  %33 = vrot.lane.b32.xlu1 %v8_v0, %s264_s8  ;;  %4 = vst.msk [vmem:[%s548_s1] ss:$16 sm:$0x3] %vm3_vm0, %v8_v0   ;;  %5 = vst.msk [vmem:[%s548_s1] ss:$16 sm:$0xc] %vm3_vm0, %v8_v0  }
   0x3   :  { %6 = vst.msk [vmem:[%s548_s1] ss:$16 sm:$0x30] %vm3_vm0, %v8_v0   ;;  %7 = vst.msk [vmem:[%s548_s1] ss:$16 sm:$0xc0] %vm3_vm0, %v8_v0  }
   0x4   :  { %s267_s19 = smov 123   ;;  %s268_s20 = smov 122  }
   0x5   :  { %s269_s21 = smov 121   ;;  %s270_s22 = smov 120  }
   0x6   :  { %21 = vrot.lane.b32.xlu0 %v8_v0, %s265_s17  ;;  %45 = vrot.lane.b32.xlu1 %v8_v0, %s266_s18  ;;  %s271_s23 = smov 119   ;;  %s272_s24 = smov 118  }
   0x7   :  { %s273_s25 = smov 117   ;;  %s274_s26 = smov 116  }
   0x8   :  { %s275_s27 = smov 115   ;;  %s276_s28 = smov 114  }
   0x9   :  { %s277_s29 = smov 113  }
   0xa   :  { %57 = vrot.lane.b32.xlu0 %v8_v0, %s267_s19  ;;  %69 = vrot.lane.b32.xlu1 %v8_v0, %s268_s20 }
   0xe   :  { %81 = vrot.lane.b32.xlu0 %v8_v0, %s269_s21  ;;  %93 = vrot.lane.b32.xlu1 %v8_v0, %s270_s22 }
  0x12   :  { %105 = vrot.lane.b32.xlu0 %v8_v0, %s271_s23  ;;  %117 = vrot.lane.b32.xlu1 %v8_v0, %s272_s24 }
  0x16   :  { %129 = vrot.lane.b32.xlu0 %v8_v0, %s273_s25  ;;  %141 = vrot.lane.b32.xlu1 %v8_v0, %s274_s26 }
  0x1a   :  { %153 = vrot.lane.b32.xlu0 %v8_v0, %s275_s27  ;;  %165 = vrot.lane.b32.xlu1 %v8_v0, %s276_s28 }
  0x1e   :  { %177 = vrot.lane.b32.xlu0 %v8_v0, %s277_s29 }
  0x74   :  { %v10_v1 = vpop.permute.xlu0 %9   ;;  %v34_v2 = vpop.permute.xlu1 %33  }
  0x75   :  { %188 = vst.msk [vmem:[%s548_s1 + $0x1] ss:$16 sm:$0x3] %vm3_vm0, %v10_v1   ;;  %189 = vst.msk [vmem:[%s548_s1 + $0x1] ss:$16 sm:$0xc] %vm3_vm0, %v10_v1  }
  0x76   :  { %190 = vst.msk [vmem:[%s548_s1 + $0x1] ss:$16 sm:$0x30] %vm3_vm0, %v10_v1   ;;  %191 = vst.msk [vmem:[%s548_s1 + $0x1] ss:$16 sm:$0xc0] %vm3_vm0, %v10_v1  }
  0x77   :  { %196 = vst.msk [vmem:[%s548_s1 + $0x3] ss:$16 sm:$0x3] %vm3_vm0, %v34_v2   ;;  %197 = vst.msk [vmem:[%s548_s1 + $0x3] ss:$16 sm:$0xc] %vm3_vm0, %v34_v2  }
  0x78   :  { %198 = vst.msk [vmem:[%s548_s1 + $0x3] ss:$16 sm:$0x30] %vm3_vm0, %v34_v2   ;;  %199 = vst.msk [vmem:[%s548_s1 + $0x3] ss:$16 sm:$0xc0] %vm3_vm0, %v34_v2   ;;  %v22_v3 = vpop.permute.xlu0 %21   ;;  %v46_v4 = vpop.permute.xlu1 %45  }
  0x79   :  { %192 = vst.msk [vmem:[%s548_s1 + $0x2] ss:$16 sm:$0x3] %vm3_vm0, %v22_v3   ;;  %193 = vst.msk [vmem:[%s548_s1 + $0x2] ss:$16 sm:$0xc] %vm3_vm0, %v22_v3  }
  0x7a   :  { %194 = vst.msk [vmem:[%s548_s1 + $0x2] ss:$16 sm:$0x30] %vm3_vm0, %v22_v3   ;;  %195 = vst.msk [vmem:[%s548_s1 + $0x2] ss:$16 sm:$0xc0] %vm3_vm0, %v22_v3  }
  0x7b   :  { %200 = vst.msk [vmem:[%s548_s1 + $0x4] ss:$16 sm:$0x3] %vm3_vm0, %v46_v4   ;;  %201 = vst.msk [vmem:[%s548_s1 + $0x4] ss:$16 sm:$0xc] %vm3_vm0, %v46_v4  }
  0x7c   :  { %202 = vst.msk [vmem:[%s548_s1 + $0x4] ss:$16 sm:$0x30] %vm3_vm0, %v46_v4   ;;  %203 = vst.msk [vmem:[%s548_s1 + $0x4] ss:$16 sm:$0xc0] %vm3_vm0, %v46_v4   ;;  %v58_v5 = vpop.permute.xlu0 %57   ;;  %v70_v6 = vpop.permute.xlu1 %69  }
  0x7d   :  { %204 = vst.msk [vmem:[%s548_s1 + $0x5] ss:$16 sm:$0x3] %vm3_vm0, %v58_v5   ;;  %205 = vst.msk [vmem:[%s548_s1 + $0x5] ss:$16 sm:$0xc] %vm3_vm0, %v58_v5  }
  0x7e   :  { %206 = vst.msk [vmem:[%s548_s1 + $0x5] ss:$16 sm:$0x30] %vm3_vm0, %v58_v5   ;;  %207 = vst.msk [vmem:[%s548_s1 + $0x5] ss:$16 sm:$0xc0] %vm3_vm0, %v58_v5  }
  0x7f   :  { %208 = vst.msk [vmem:[%s548_s1 + $0x6] ss:$16 sm:$0x3] %vm3_vm0, %v70_v6   ;;  %209 = vst.msk [vmem:[%s548_s1 + $0x6] ss:$16 sm:$0xc] %vm3_vm0, %v70_v6  }
  0x80   :  { %210 = vst.msk [vmem:[%s548_s1 + $0x6] ss:$16 sm:$0x30] %vm3_vm0, %v70_v6   ;;  %211 = vst.msk [vmem:[%s548_s1 + $0x6] ss:$16 sm:$0xc0] %vm3_vm0, %v70_v6   ;;  %v82_v7 = vpop.permute.xlu0 %81   ;;  %v94_v8 = vpop.permute.xlu1 %93  }
  0x81   :  { %212 = vst.msk [vmem:[%s548_s1 + $0x7] ss:$16 sm:$0x3] %vm3_vm0, %v82_v7   ;;  %213 = vst.msk [vmem:[%s548_s1 + $0x7] ss:$16 sm:$0xc] %vm3_vm0, %v82_v7  }
  0x82   :  { %214 = vst.msk [vmem:[%s548_s1 + $0x7] ss:$16 sm:$0x30] %vm3_vm0, %v82_v7   ;;  %215 = vst.msk [vmem:[%s548_s1 + $0x7] ss:$16 sm:$0xc0] %vm3_vm0, %v82_v7  }
  0x83   :  { %216 = vst.msk [vmem:[%s548_s1 + $0x8] ss:$16 sm:$0x3] %vm3_vm0, %v94_v8   ;;  %217 = vst.msk [vmem:[%s548_s1 + $0x8] ss:$16 sm:$0xc] %vm3_vm0, %v94_v8  }
  0x84   :  { %218 = vst.msk [vmem:[%s548_s1 + $0x8] ss:$16 sm:$0x30] %vm3_vm0, %v94_v8   ;;  %219 = vst.msk [vmem:[%s548_s1 + $0x8] ss:$16 sm:$0xc0] %vm3_vm0, %v94_v8   ;;  %v106_v9 = vpop.permute.xlu0 %105   ;;  %v118_v10 = vpop.permute.xlu1 %117  }
  0x85   :  { %220 = vst.msk [vmem:[%s548_s1 + $0x9] ss:$16 sm:$0x3] %vm3_vm0, %v106_v9   ;;  %221 = vst.msk [vmem:[%s548_s1 + $0x9] ss:$16 sm:$0xc] %vm3_vm0, %v106_v9  }
  0x86   :  { %222 = vst.msk [vmem:[%s548_s1 + $0x9] ss:$16 sm:$0x30] %vm3_vm0, %v106_v9   ;;  %223 = vst.msk [vmem:[%s548_s1 + $0x9] ss:$16 sm:$0xc0] %vm3_vm0, %v106_v9  }
  0x87   :  { %224 = vst.msk [vmem:[%s548_s1 + $0xa] ss:$16 sm:$0x3] %vm3_vm0, %v118_v10   ;;  %225 = vst.msk [vmem:[%s548_s1 + $0xa] ss:$16 sm:$0xc] %vm3_vm0, %v118_v10  }
  0x88   :  { %226 = vst.msk [vmem:[%s548_s1 + $0xa] ss:$16 sm:$0x30] %vm3_vm0, %v118_v10   ;;  %227 = vst.msk [vmem:[%s548_s1 + $0xa] ss:$16 sm:$0xc0] %vm3_vm0, %v118_v10   ;;  %v130_v11 = vpop.permute.xlu0 %129   ;;  %v142_v12 = vpop.permute.xlu1 %141  }
  0x89   :  { %228 = vst.msk [vmem:[%s548_s1 + $0xb] ss:$16 sm:$0x3] %vm3_vm0, %v130_v11   ;;  %229 = vst.msk [vmem:[%s548_s1 + $0xb] ss:$16 sm:$0xc] %vm3_vm0, %v130_v11  }
  0x8a   :  { %230 = vst.msk [vmem:[%s548_s1 + $0xb] ss:$16 sm:$0x30] %vm3_vm0, %v130_v11   ;;  %231 = vst.msk [vmem:[%s548_s1 + $0xb] ss:$16 sm:$0xc0] %vm3_vm0, %v130_v11  }
  0x8b   :  { %232 = vst.msk [vmem:[%s548_s1 + $0xc] ss:$16 sm:$0x3] %vm3_vm0, %v142_v12   ;;  %233 = vst.msk [vmem:[%s548_s1 + $0xc] ss:$16 sm:$0xc] %vm3_vm0, %v142_v12  }
  0x8c   :  { %234 = vst.msk [vmem:[%s548_s1 + $0xc] ss:$16 sm:$0x30] %vm3_vm0, %v142_v12   ;;  %235 = vst.msk [vmem:[%s548_s1 + $0xc] ss:$16 sm:$0xc0] %vm3_vm0, %v142_v12   ;;  %v154_v13 = vpop.permute.xlu0 %153   ;;  %v166_v14 = vpop.permute.xlu1 %165  }
  0x8d   :  { %236 = vst.msk [vmem:[%s548_s1 + $0xd] ss:$16 sm:$0x3] %vm3_vm0, %v154_v13   ;;  %237 = vst.msk [vmem:[%s548_s1 + $0xd] ss:$16 sm:$0xc] %vm3_vm0, %v154_v13  }
  0x8e   :  { %238 = vst.msk [vmem:[%s548_s1 + $0xd] ss:$16 sm:$0x30] %vm3_vm0, %v154_v13   ;;  %239 = vst.msk [vmem:[%s548_s1 + $0xd] ss:$16 sm:$0xc0] %vm3_vm0, %v154_v13  }
  0x8f   :  { %240 = vst.msk [vmem:[%s548_s1 + $0xe] ss:$16 sm:$0x3] %vm3_vm0, %v166_v14   ;;  %241 = vst.msk [vmem:[%s548_s1 + $0xe] ss:$16 sm:$0xc] %vm3_vm0, %v166_v14  }
  0x90   :  { %242 = vst.msk [vmem:[%s548_s1 + $0xe] ss:$16 sm:$0x30] %vm3_vm0, %v166_v14   ;;  %243 = vst.msk [vmem:[%s548_s1 + $0xe] ss:$16 sm:$0xc0] %vm3_vm0, %v166_v14   ;;  %v178_v15 = vpop.permute.xlu0 %177  }
  0x91   :  { %244 = vst.msk [vmem:[%s548_s1 + $0xf] ss:$16 sm:$0x3] %vm3_vm0, %v178_v15   ;;  %245 = vst.msk [vmem:[%s548_s1 + $0xf] ss:$16 sm:$0xc] %vm3_vm0, %v178_v15  }
  0x92   :  { %246 = vst.msk [vmem:[%s548_s1 + $0xf] ss:$16 sm:$0x30] %vm3_vm0, %v178_v15   ;;  %247 = vst.msk [vmem:[%s548_s1 + $0xf] ss:$16 sm:$0xc0] %vm3_vm0, %v178_v15  }

// kernel: residual_block_forward.1
= control target key start
LH: loop header
LB: loop body
LE: loop exit
PB: predicated region body
PF: predicated region fallthrough
CT: control target
= control target key end

     0   :  { %s10837_s27 = smov 0   ;;  %s13891_s0 = inlined_call_operand.vmem [shape: bf16[2,160,512], index: 0, kind: input, shape index: {}]   ;;  %s13892_s1 = inlined_call_operand.vmem [shape: f32[128,1], index: 1, kind: input, shape index: {}]   ;;  %s13893_s2 = inlined_call_operand.vmem [shape: bf16[4,512,128], index: 2, kind: input, shape index: {}]   ;;  %s13894_s3 = inlined_call_operand.vmem [shape: f32[1,128], index: 3, kind: input, shape index: {}]   ;;  %s13895_s4 = inlined_call_operand.vmem [shape: bf16[4,512,128], index: 4, kind: input, shape index: {}]   ;;  %s13896_s5 = inlined_call_operand.vmem [shape: f32[1,128], index: 5, kind: input, shape index: {}]   ;;  %s13897_s6 = inlined_call_operand.vmem [shape: bf16[9,128,128], index: 6, kind: input, shape index: {}]   ;;  %s13898_s7 = inlined_call_operand.vmem [shape: f32[1,128], index: 7, kind: input, shape index: {}]   ;;  %s13899_s8 = inlined_call_operand.vmem [shape: f32[2,128,128], index: 8, kind: output, shape index: {}]  }
   0x1 LB: > { %s7661_s28 = sadd.s32 4294967295, %s10789_s27   ;;  %p7665_p0 = scmp.ge.s32.totalorder %s10789_s27, 1  ;;  %s10789_s27 = sphi %s10837_s27, %s18_s27  }
   0x2   : > { %p262_p1 = scmp.lt.s32.totalorder %s10789_s27, 3 }
   0x4   : > { %p263_p2 = pnand %p7665_p0, %p262_p1 }
   0x6   : > { %266 = sbr.rel (%p263_p2) target bundleno = 1324 (0x52c), region = 52 }
   0xd   : > { %v10247_v0 = vld [vmem:[%s13893_s2 + $0x140] sm:$0xff]   ;;  %v10249_v2 = vld [vmem:[%s13893_s2 + $0x148] sm:$0xff]   ;;  %p296_p3 = scmp.lt.s32.totalorder %s7661_s28, 1  ;;  %v10251_v4 = vld [vmem:[%s13893_s2 + $0x150] sm:$0xff]   ;;  %vm684_vm0 = vsmask.f32 7424 }
   0xe   : > { %v10248_v1 = vld [vmem:[%s13893_s2 + $0x100] sm:$0xff]   ;;  %8619 = vmatprep.subr.bf16.mxu1 %v10247_v0  ;;  %v10250_v3 = vld [vmem:[%s13893_s2 + $0x108] sm:$0xff]   ;;  %v10252_v5 = vld [vmem:[%s13893_s2 + $0x110] sm:$0xff]   ;;  %vm5333_vm1 = vcmask 1043456   ;;  %vm5415_vm2 = vsmask.f32 4352 }
   0xf   : > { %8620 = vmatpush3.bf16.msra.mxu1 %v10248_v1  ;;  %s14120_s28 = smov (!%p296_p3, %s7661_s28), 1  ;;  %v10253_v6 = vld [vmem:[%s13893_s2 + $0x158] sm:$0xff]   ;;  %v10255_v8 = vld [vmem:[%s13893_s2 + $0x160] sm:$0xff]   ;;  %v10257_v10 = vld [vmem:[%s13893_s2 + $0x168] sm:$0xff]   ;;  %vm5896_vm3 = vsmask.f32 3328 }
  0x10   : > { %8621 = vmatprep.subr.bf16.mxu1 %v10249_v2  ;;  %s10235_s21 = smul.u32 320, %s14120_s28  ;;  %v10254_v7 = vld [vmem:[%s13893_s2 + $0x118] sm:$0xff]   ;;  %v10256_v9 = vld [vmem:[%s13893_s2 + $0x120] sm:$0xff]   ;;  %v10258_v15 = vld [vmem:[%s13893_s2 + $0x128] sm:$0xff]   ;;  %s8618_s29 = sshll.u32 %s14120_s28, 7 }
  0x11   : > { %v10259_v19 = vld [vmem:[%s13893_s2 + $0x170] sm:$0xff]   ;;  %v10261_v24 = vld [vmem:[%s13893_s2 + $0x178] sm:$0xff]   ;;  %v10269_v34 = vld [vmem:[%s13893_s2 + $0x1c0] sm:$0xff]   ;;  %s13827_s11 = scalar_lea.vmem %s13899_s8, %s8618_s29 }
  0x12   : > { %s10881_s10 = scalar_lea.vmem %s13891_s0, %s10235_s21  ;;  %v10260_v21 = vld [vmem:[%s13893_s2 + $0x130] sm:$0xff]   ;;  %v10262_v33 = vld [vmem:[%s13893_s2 + $0x138] sm:$0xff]   ;;  %v10270_v41 = vld [vmem:[%s13893_s2 + $0x180] sm:$0xff]  }
  0x13   : > { %8622 = vmatpush3.bf16.msra.mxu1 %v10250_v3  ;;  %v10263_v11 = vld [vmem:[%s10881_s10 + $0x4] ss:$16 sps:$4 sm:$0xff]   ;;  %v10267_v13 = vld [vmem:[%s10881_s10] ss:$16 sps:$4 sm:$0xff]   ;;  %v10274_v46 = vld [vmem:[%s13893_s2 + $0x1c8] sm:$0xff]  }
  0x14   : > { %8623 = vmatprep.subr.bf16.mxu1 %v10251_v4  ;;  %v10265_v12 = vld [vmem:[%s10881_s10 + $0x24] ss:$16 sps:$4 sm:$0xff]   ;;  %v10268_v14 = vld [vmem:[%s10881_s10 + $0x20] ss:$16 sps:$4 sm:$0xff]   ;;  %v698_v16 = vshrl.u32 %v10263_v11, 16  ;;  %v700_v17 = vshll.u32 %v10263_v11, 16 }
  0x15   : > { %v705_v18 = vshll.u32 %v10265_v12, 16  ;;  %v688_v20 = vshll.u32 %v10267_v13, 16  ;;  %v686_v25 = vshrl.u32 %v10267_v13, 16  ;;  %v10271_v26 = vld [vmem:[%s10881_s10 + $0x44] ss:$16 sps:$4 sm:$0xff]   ;;  %v693_v29 = vshll.u32 %v10268_v14, 16 }
  0x16   : > { %v702_v22 = vrot.slane %v700_v17, 1  ;;  %v741_v30 = vshrl.u32 %v10265_v12, 16  ;;  %v745_v31 = vshll.u32 %v10271_v26, 16  ;;  %v10273_v35 = vld [vmem:[%s10881_s10 + $0x40] ss:$16 sps:$4 sm:$0xff]   ;;  %v733_v43 = vshrl.u32 %v10268_v14, 16 }
  0x17   : > { %8624 = vmatpush3.bf16.msra.mxu1 %v10252_v5  ;;  %v707_v23 = vrot.slane %v705_v18, 1  ;;  %v690_v28 = vrot.slane %v688_v20, 1  ;;  %v695_v37 = vrot.slane %v693_v29, 1  ;;  %v10276_v40 = vld [vmem:[%s10881_s10 + $0x64] ss:$16 sps:$4 sm:$0xff]   ;;  %v737_v44 = vshll.u32 %v10273_v35, 16 }
  0x18   : > { %8625 = vmatprep.subr.bf16.mxu1 %v10253_v6  ;;  %v703_v27 = vor.u32 %v702_v22, %v698_v16  ;;  %v747_v38 = vrot.slane %v745_v31, 1  ;;  %v773_v47 = vshrl.u32 %v10271_v26, 16  ;;  %v777_v48 = vshll.u32 %v10276_v40, 16  ;;  %v10275_v49 = vld [vmem:[%s13893_s2 + $0x188] sm:$0xff]   ;;  %v10278_v50 = vld [vmem:[%s10881_s10 + $0x60] ss:$16 sps:$4 sm:$0xff]  }
  0x19   : > { %v691_v36 = vor.u32 %v690_v28, %v686_v25  ;;  %v743_v39 = vor.u32 %v741_v30, %v707_v23  ;;  %v735_v51 = vor.u32 %v733_v43, %v695_v37  ;;  %v739_v52 = vrot.slane %v737_v44, 1  ;;  %v10279_v53 = vld [vmem:[%s13893_s2 + $0x1d0] sm:$0xff]   ;;  %v10284_v61 = vld [vmem:[%s13893_s2 + $0x1d8] sm:$0xff]   ;;  %v10294_v16 = vld [vmem:[%s13893_s2 + $0x1e8] sm:$0xff]  }
  0x1a   : > { %v708_v32 = vsel %vm684_vm0, %v703_v27, %v707_v23  ;;  %v775_v54 = vor.u32 %v773_v47, %v747_v38  ;;  %v779_v55 = vrot.slane %v777_v48, 1  ;;  %v10281_v56 = vld [vmem:[%s10881_s10 + $0x84] ss:$16 sps:$4 sm:$0xff]   ;;  %v765_v58 = vshrl.u32 %v10273_v35, 16  ;;  %v10283_v1 = vld [vmem:[%s10881_s10 + $0x80] ss:$16 sps:$4 sm:$0xff]  }
  0x1b   : > { %8626 = vmatpush3.bf16.msra.mxu1 %v10254_v7  ;;  %1213 = vmatprep.mubr.bf16.mxu1 %v708_v32  ;;  %v10916_v42 = vsel %vm684_vm0, %v691_v36, %v695_v37  ;;  %v10919_v45 = vsel %vm684_vm0, %v743_v39, %v747_v38  ;;  %v10935_v57 = vsel %vm684_vm0, %v735_v51, %v739_v52  ;;  %v769_v59 = vshll.u32 %v10278_v50, 16  ;;  %v10280_v60 = vld [vmem:[%s13893_s2 + $0x190] sm:$0xff]   ;;  %v10285_v4 = vld [vmem:[%s13893_s2 + $0x198] sm:$0xff]  }
  0x1c   : > { %8627 = vmatprep.subr.bf16.mxu1 %v10255_v8  ;;  %2082 = vmatprep.mubr.bf16.mxu0 %v708_v32  ;;  %v10944_v62 = vsel %vm684_vm0, %v775_v54, %v779_v55  ;;  %v805_v63 = vshrl.u32 %v10276_v40, 16  ;;  %v809_v0 = vshll.u32 %v10281_v56, 16  ;;  %v767_v2 = vor.u32 %v765_v58, %v739_v52  ;;  %v10286_v7 = vld [vmem:[%s10881_s10 + $0xa4] ss:$16 sps:$4 sm:$0xff]   ;;  %v10288_v17 = vld [vmem:[%s10881_s10 + $0xa0] ss:$16 sps:$4 sm:$0xff]  }
  0x1d   : > { %v771_v3 = vrot.slane %v769_v59, 1  ;;  %v10289_v8 = vld [vmem:[%s13893_s2 + $0x1e0] sm:$0xff]   ;;  %v797_v11 = vshrl.u32 %v10278_v50, 16  ;;  %v801_v12 = vshll.u32 %v10283_v1, 16  ;;  %v837_v14 = vshrl.u32 %v10281_v56, 16  ;;  %v10299_v22 = vld [vmem:[%s13893_s2 + $0x1f0] sm:$0xff]  }
  0x1e   : > { %v807_v5 = vor.u32 %v805_v63, %v779_v55  ;;  %v811_v6 = vrot.slane %v809_v0, 1  ;;  %v10291_v18 = vld [vmem:[%s10881_s10 + $0xc4] ss:$16 sps:$4 sm:$0xff]   ;;  %v829_v25 = vshrl.u32 %v10283_v1, 16  ;;  %v833_v27 = vshll.u32 %v10288_v17, 16  ;;  %v10303_v32 = vld [vmem:[%s13893_s2 + $0x1f8] sm:$0xff]  }
  0x1f   : > { %8628 = vmatpush3.bf16.msra.mxu1 %v10256_v9  ;;  %v10290_v9 = vld [vmem:[%s13893_s2 + $0x1a0] sm:$0xff]   ;;  %v803_v20 = vrot.slane %v801_v12, 1  ;;  %v10300_v28 = vld [vmem:[%s13893_s2 + $0x1b0] sm:$0xff]   ;;  %v869_v30 = vshrl.u32 %v10286_v7, 16  ;;  %v873_v31 = vshll.u32 %v10291_v18, 16  ;;  %v10304_v37 = vld [vmem:[%s13893_s2 + $0x1b8] sm:$0xff]  }
  0x20   : > { %8629 = vmatprep.subr.bf16.mxu1 %v10257_v10  ;;  %v10960_v10 = vsel %vm684_vm0, %v767_v2, %v771_v3  ;;  %v10963_v13 = vsel %vm684_vm0, %v807_v5, %v811_v6  ;;  %v839_v23 = vor.u32 %v837_v14, %v811_v6  ;;  %v835_v36 = vrot.slane %v833_v27, 1  ;;  %v10311_v40 = vld [vmem:[%s13893_s2 + $0x40] sm:$0xff]   ;;  %v10307_v58 = vld [vmem:[%s10881_s10 + $0xc] ss:$16 sps:$4 sm:$0xff]  }
  0x21   : > { %v831_v35 = vor.u32 %v829_v25, %v803_v20  ;;  %v875_v39 = vrot.slane %v873_v31, 1  ;;  %v861_v43 = vshrl.u32 %v10288_v17, 16  ;;  %v901_v47 = vshrl.u32 %v10291_v18, 16  ;;  %v10298_v50 = vld [vmem:[%s10881_s10 + $0xe0] ss:$16 sps:$4 sm:$0xff]  }
  0x22   : > { %v925_v12 = vshrl.u32 %v10298_v50, 16 }
  0x23   : > { %8630 = vmatpush3.bf16.msra.mxu1 %v10258_v15  ;;  %v841_v15 = vshll.u32 %v10286_v7, 16  ;;  %v863_v51 = vor.u32 %v861_v43, %v835_v36  ;;  %v11022_v7 = vld [vmem:[%s10881_s10 + $0x28] ss:$16 sps:$4 sm:$0xff]   ;;  %v10357_v43 = vld [vmem:[%s13895_s4 + $0x140] sm:$0xff]  }
  0x24   : > { %8631 = vmatprep.subr.bf16.mxu1 %v10259_v19  ;;  %v799_v19 = vor.u32 %v797_v11, %v771_v3  ;;  %v10305_v3 = vld [vmem:[%s10881_s10 + $0x8] ss:$16 sps:$4 sm:$0xff]   ;;  %8875 = vmatprep.subr.bf16.mxu0 %v10357_v43 }
  0x25   : > { %v712_v17 = vshll.u32 %v10305_v3, 16 }
  0x26   : > { %v10979_v26 = vsel %vm684_vm0, %v799_v19, %v803_v20  ;;  %v717_v20 = vshll.u32 %v11022_v7, 16 }
  0x27   : > { %8632 = vmatpush3.bf16.msra.mxu1 %v10260_v21  ;;  %v10295_v21 = vld [vmem:[%s13893_s2 + $0x1a8] sm:$0xff]   ;;  %v714_v25 = vrot.slane %v712_v17, 1 }
  0x28   : > { %8633 = vmatprep.subr.bf16.mxu1 %v10261_v24  ;;  %v843_v24 = vrot.slane %v841_v15, 1  ;;  %v722_v15 = vshrl.u32 %v10307_v58, 16 }
  0x2a   : > { %v10985_v29 = vsel %vm684_vm0, %v839_v23, %v843_v24  ;;  %v871_v38 = vor.u32 %v869_v30, %v843_v24  ;;  %v11033_v23 = vld [vmem:[%s10881_s10 + $0x48] ss:$16 sps:$4 sm:$0xff]   ;;  %v710_v24 = vshrl.u32 %v10305_v3, 16  ;;  %v719_v30 = vrot.slane %v717_v20, 1  ;;  %v10322_v20 = vld [vmem:[%s13893_s2 + $0x10] sm:$0xff]  }
  0x2b   : > { %8634 = vmatpush3.bf16.msra.mxu1 %v10262_v33  ;;  %v10293_v33 = vld [vmem:[%s10881_s10 + $0xc0] ss:$16 sps:$4 sm:$0xff]  }
  0x2c   : > { %8683 = vmatprep.subr.bf16.mxu1 %v10269_v34  ;;  %v10296_v34 = vld [vmem:[%s10881_s10 + $0xe4] ss:$16 sps:$4 sm:$0xff]   ;;  %v865_v44 = vshll.u32 %v10293_v33, 16 }
  0x2d   : > { %v905_v48 = vshll.u32 %v10296_v34, 16  ;;  %v933_v0 = vshrl.u32 %v10296_v34, 16 }
  0x2e   : > { %1214 = vmatmul.mubr.bf16.vlgmr.msra.gmra.mrb[0].mxu1 %v10916_v42  ;;  %v867_v52 = vrot.slane %v865_v44, 1 }
  0x2f   : > { %8684 = vmatpush3.bf16.msra.mxu1 %v10270_v41  ;;  %1221 = vmatprep.mubr.bf16.mxu1 %v10919_v45  ;;  %v11001_v41 = vsel %vm684_vm0, %v831_v35, %v835_v36  ;;  %v907_v54 = vrot.slane %v905_v48, 1  ;;  %v753_v35 = vshll.u32 %v11033_v23, 16  ;;  %v11040_v36 = vld [vmem:[%s10881_s10 + $0x6c] ss:$16 sps:$4 sm:$0xff]   ;;  %v781_v48 = vshrl.u32 %v11033_v23, 16  ;;  %v10375_v23 = vld [vmem:[%s13895_s4 + $0x170] sm:$0xff]  }
  0x30   : > { %8685 = vmatprep.subr.bf16.mxu1 %v10274_v46  ;;  %v11004_v46 = vsel %vm684_vm0, %v871_v38, %v875_v39  ;;  %v11012_v59 = vsel %vm684_vm0, %v863_v51, %v867_v52  ;;  %v11046_v38 = vld [vmem:[%s10881_s10 + $0x68] ss:$16 sps:$4 sm:$0xff]  }
  0x31   : > { %v755_v51 = vrot.slane %v753_v35, 1 }
  0x33   : > { %8686 = vmatpush3.bf16.msra.mxu1 %v10275_v49  ;;  %v479_v49 = vld [vmem:[%s10881_s10 + $0x100] sm:$0x11] }
  0x34   : > { %8687 = vmatprep.subr.bf16.mxu1 %v10279_v53  ;;  %v903_v53 = vor.u32 %v901_v47, %v875_v39  ;;  %v7766_v55 = vcombine.high %v479_v49, %v479_v49  ;;  %v7765_v56 = vcombine.low %v479_v49, %v479_v49  ;;  %v10358_v47 = vld [vmem:[%s13895_s4 + $0x100] sm:$0xff]   ;;  %v10359_v49 = vld [vmem:[%s13895_s4 + $0x148] sm:$0xff]  }
  0x35   : > { %8876 = vmatpush3.bf16.msra.mxu0 %v10358_v47  ;;  %v783_v47 = vor.u32 %v781_v48, %v755_v51  ;;  %v11167_v48 = vld [vmem:[%s10881_s10 + $0xc8] ss:$16 sps:$4 sm:$0xff]  }
  0x36   : > { %1222 = vmatmul.mubr.bf16.gmra.mrb[4].mxu1 %v10935_v57  ;;  %v11015_v63 = vsel %vm684_vm0, %v903_v53, %v907_v54  ;;  %v937_v1 = vshll.u32 %v7766_v55, 16  ;;  %v929_v2 = vshll.u32 %v7765_v56, 16  ;;  %v785_v55 = vshll.u32 %v11046_v38, 16  ;;  %8877 = vmatprep.subr.bf16.mxu0 %v10359_v49  ;;  %v10312_v56 = vld [vmem:[%s13893_s2] sm:$0xff]   ;;  %v11154_v49 = vld [vmem:[%s10881_s10 + $0xcc] ss:$16 sps:$4 sm:$0xff]  }
  0x37   : > { %1229 = vmatprep.mubr.bf16.mxu1 %v10944_v62  ;;  %8688 = vmatpush3.bf16.msra.mxu1 %v10280_v60  ;;  %v893_v60 = vshrl.u32 %v10293_v33, 16  ;;  %v749_v33 = vshrl.u32 %v11022_v7, 16 }
  0x38   : > { %8689 = vmatprep.subr.bf16.mxu1 %v10284_v61  ;;  %v897_v61 = vshll.u32 %v10298_v50, 16  ;;  %v939_v11 = vrot.slane %v937_v1, 1  ;;  %v931_v14 = vrot.slane %v929_v2, 1  ;;  %v715_v50 = vor.u32 %v714_v25, %v710_v24  ;;  %v11085_v2 = vld [vmem:[%s10881_s10 + $0x88] ss:$16 sps:$4 sm:$0xff]   ;;  %v10369_v24 = vld [vmem:[%s13895_s4 + $0x160] sm:$0xff]  }
  0x39   : > { %v895_v5 = vor.u32 %v893_v60, %v867_v52  ;;  %v10360_v52 = vld [vmem:[%s13895_s4 + $0x108] sm:$0xff]   ;;  %v817_v17 = vshll.u32 %v11085_v2, 16  ;;  %v10326_v25 = vld [vmem:[%s13893_s2 + $0x58] sm:$0xff]  }
  0x3a   : > { %v899_v6 = vrot.slane %v897_v61, 1  ;;  %v10316_v60 = vld [vmem:[%s13893_s2 + $0x48] sm:$0xff]   ;;  %v821_v61 = vshrl.u32 %v11040_v36, 16  ;;  %v11082_v1 = vsel %vm684_vm0, %v715_v50, %v719_v30  ;;  %8878 = vmatpush3.bf16.msra.mxu0 %v10360_v52 }
  0x3b   : > { %8690 = vmatpush3.bf16.msra.mxu1 %v10285_v4  ;;  %v10310_v4 = vld [vmem:[%s10881_s10 + $0x2c] ss:$16 sps:$4 sm:$0xff]   ;;  %v819_v35 = vrot.slane %v817_v17, 1 }
  0x3c   : > { %8691 = vmatprep.subr.bf16.mxu1 %v10289_v8  ;;  %v724_v8 = vshll.u32 %v10307_v58, 16  ;;  %v11025_v18 = vsel %vm684_vm0, %v895_v5, %v899_v6  ;;  %v927_v27 = vor.u32 %v925_v12, %v899_v6  ;;  %v11072_v58 = vld [vmem:[%s10881_s10 + $0x8c] ss:$16 sps:$4 sm:$0xff]   ;;  %v10364_v5 = vld [vmem:[%s13895_s4 + $0x110] sm:$0xff]  }
  0x3d   : > { %v10317_v6 = vld [vmem:[%s13893_s2 + $0x8] sm:$0xff]   ;;  %v825_v12 = vshll.u32 %v11072_v58, 16 }
  0x3e   : > { %1230 = vmatmul.mubr.bf16.gmra.mrb[8].mxu1 %v10960_v10  ;;  %v726_v19 = vrot.slane %v724_v8, 1  ;;  %v10365_v8 = vld [vmem:[%s13895_s4 + $0x158] sm:$0xff]  }
  0x3f   : > { %1237 = vmatprep.mubr.bf16.mxu1 %v10963_v13  ;;  %8692 = vmatpush3.bf16.msra.mxu1 %v10290_v9  ;;  %v935_v9 = vor.u32 %v933_v0, %v907_v54  ;;  %v793_v54 = vshll.u32 %v11040_v36, 16  ;;  %v10363_v0 = vld [vmem:[%s13895_s4 + $0x150] sm:$0xff]   ;;  %v10327_v36 = vld [vmem:[%s13893_s2 + $0x18] sm:$0xff]  }
  0x40   : > { %8693 = vmatprep.subr.bf16.mxu1 %v10294_v16  ;;  %v729_v16 = vshll.u32 %v10310_v4, 16  ;;  %v727_v31 = vor.u32 %v726_v19, %v722_v15  ;;  %8879 = vmatprep.subr.bf16.mxu0 %v10363_v0  ;;  %v11109_v15 = vld [vmem:[%s10881_s10 + $0xac] ss:$16 sps:$4 sm:$0xff]   ;;  %v10376_v0 = vld [vmem:[%s13895_s4 + $0x130] sm:$0xff]  }
  0x41   : > { %v795_v7 = vrot.slane %v793_v54, 1  ;;  %8880 = vmatpush3.bf16.msra.mxu0 %v10364_v5  ;;  %v10366_v19 = vld [vmem:[%s13895_s4 + $0x118] sm:$0xff]   ;;  %v10332_v54 = vld [vmem:[%s13893_s2 + $0x20] sm:$0xff]   ;;  %v889_v5 = vshll.u32 %v11154_v49, 16 }
  0x42   : > { %8881 = vmatprep.subr.bf16.mxu0 %v10365_v8  ;;  %v881_v8 = vshll.u32 %v11167_v48, 16  ;;  %v10338_v17 = vld [vmem:[%s10881_s10 + $0xec] ss:$16 sps:$4 sm:$0xff]  }
  0x43   : > { %8694 = vmatpush3.bf16.msra.mxu1 %v10295_v21  ;;  %v11029_v21 = vsel %vm684_vm0, %v935_v9, %v939_v11  ;;  %v11101_v9 = vrot.slane %v785_v55, 1  ;;  %v10321_v11 = vld [vmem:[%s13893_s2 + $0x50] sm:$0xff]   ;;  %v823_v50 = vor.u32 %v821_v61, %v795_v7  ;;  %v885_v55 = vshrl.u32 %v11109_v15, 16 }
  0x44   : > { %8695 = vmatprep.subr.bf16.mxu1 %v10299_v22  ;;  %v10313_v22 = vld [vmem:[%s10881_s10 + $0x4c] ss:$16 sps:$4 sm:$0xff]  }
  0x45   : > { %v761_v34 = vshll.u32 %v10313_v22, 16  ;;  %8882 = vmatpush3.bf16.msra.mxu0 %v10366_v19  ;;  %v10342_v19 = vld [vmem:[%s13893_s2 + $0x30] sm:$0xff]  }
  0x46   : > { %1238 = vmatmul.mubr.bf16.gmra.mrb[12].mxu1 %v10979_v26  ;;  %8883 = vmatprep.subr.bf16.mxu0 %v10369_v24  ;;  %v10346_v24 = vld [vmem:[%s13893_s2 + $0x38] sm:$0xff]  }
  0x47   : > { %1245 = vmatprep.mubr.bf16.mxu1 %v10985_v29  ;;  %8696 = vmatpush3.bf16.msra.mxu1 %v10300_v28  ;;  %v731_v28 = vrot.slane %v729_v16, 1  ;;  %v763_v44 = vrot.slane %v761_v34, 1  ;;  %v10370_v34 = vld [vmem:[%s13895_s4 + $0x120] sm:$0xff]  }
  0x48   : > { %8697 = vmatprep.subr.bf16.mxu1 %v10303_v32  ;;  %v757_v32 = vshrl.u32 %v10310_v4, 16  ;;  %v813_v4 = vshrl.u32 %v11046_v38, 16  ;;  %v10345_v38 = vld [vmem:[%s13893_s2 + $0x78] sm:$0xff]  }
  0x49   : > { %v11049_v39 = vsel %vm684_vm0, %v727_v31, %v731_v28  ;;  %v845_v31 = vshrl.u32 %v11085_v2, 16  ;;  %8884 = vmatpush3.bf16.msra.mxu0 %v10370_v34  ;;  %v480_v34 = vld [vmem:[%s10881_s10 + $0x108] sm:$0x11]  ;;  %v883_v2 = vrot.slane %v881_v8, 1 }
  0x4a   : > { %v759_v53 = vor.u32 %v757_v32, %v731_v28 }
  0x4b   : > { %8698 = vmatpush3.bf16.msra.mxu1 %v10304_v37  ;;  %v11043_v37 = vsel %vm684_vm0, %v927_v27, %v931_v14  ;;  %v751_v14 = vor.u32 %v749_v33, %v719_v30  ;;  %v11126_v27 = vld [vmem:[%s10881_s10 + $0xa8] ss:$16 sps:$4 sm:$0xff]   ;;  %v827_v30 = vrot.slane %v825_v12, 1  ;;  %v857_v33 = vshll.u32 %v11109_v15, 16 }
  0x4c   : > { %8747 = vmatprep.subr.bf16.mxu1 %v10311_v40  ;;  %v789_v40 = vshrl.u32 %v10313_v22, 16  ;;  %v11088_v3 = vsel %vm684_vm0, %v759_v53, %v763_v44  ;;  %v853_v22 = vshrl.u32 %v11072_v58, 16  ;;  %v849_v43 = vshll.u32 %v11126_v27, 16  ;;  %v10372_v53 = vld [vmem:[%s13895_s4 + $0x128] sm:$0xff]   ;;  %v10378_v15 = vld [vmem:[%s13895_s4 + $0x138] sm:$0xff]  }
  0x4d   : > { %v11129_v28 = vsel %vm684_vm0, %v751_v14, %v755_v51  ;;  %v859_v52 = vrot.slane %v857_v33, 1  ;;  %v11171_v51 = vsel %vm684_vm0, %v783_v47, %v11101_v9  ;;  %v10336_v58 = vld [vmem:[%s13893_s2 + $0x68] sm:$0xff]   ;;  %v877_v61 = vshrl.u32 %v11126_v27, 16  ;;  %v10390_v47 = vld [vmem:[%s13895_s4] sm:$0xff]  }
  0x4e   : > { %1246 = vmatmul.mubr.bf16.gmra.mrb[16].mxu1 %v11001_v41  ;;  %v791_v16 = vor.u32 %v789_v40, %v763_v44  ;;  %v10371_v40 = vld [vmem:[%s13895_s4 + $0x168] sm:$0xff]   ;;  %v10331_v44 = vld [vmem:[%s13893_s2 + $0x60] sm:$0xff]   ;;  %v815_v12 = vor.u32 %v813_v4, %v11101_v9  ;;  %v917_v14 = vshrl.u32 %v11154_v49, 16  ;;  %v847_v27 = vor.u32 %v845_v31, %v819_v35 }
  0x4f   : > { %1253 = vmatprep.mubr.bf16.mxu1 %v11004_v46  ;;  %8885 = vmatprep.subr.bf16.mxu0 %v10371_v40  ;;  %v10340_v33 = vld [vmem:[%s10881_s10 + $0xe8] ss:$16 sps:$4 sm:$0xff]   ;;  %v909_v31 = vshrl.u32 %v11167_v48, 16 }
  0x50   : > { %v11133_v32 = vsel %vm684_vm0, %v791_v16, %v795_v7  ;;  %8886 = vmatpush3.bf16.msra.mxu0 %v10372_v53  ;;  %v10377_v7 = vld [vmem:[%s13895_s4 + $0x178] sm:$0xff]   ;;  %v855_v16 = vor.u32 %v853_v22, %v827_v30  ;;  %v11211_v4 = vsel %vm684_vm0, %v815_v12, %v819_v35  ;;  %v921_v22 = vshll.u32 %v10338_v17, 16 }
  0x51   : > { %8887 = vmatprep.subr.bf16.mxu0 %v10375_v23  ;;  %v913_v35 = vshll.u32 %v10340_v33, 16  ;;  %v911_v48 = vor.u32 %v909_v31, %v883_v2  ;;  %v10354_v31 = vld [vmem:[%s13893_s2 + $0x98] sm:$0xff]  }
  0x52   : > { %v11214_v9 = vsel %vm684_vm0, %v855_v16, %v859_v52  ;;  %v10403_v16 = vld [vmem:[%s13895_s4 + $0x68] sm:$0xff]  }
  0x54   : > { %8888 = vmatpush3.bf16.msra.mxu0 %v10376_v0 }
  0x55   : > { %8889 = vmatprep.subr.bf16.mxu0 %v10377_v7 }
  0x56   : > { %1254 = vmatmul.mubr.bf16.gmra.mrb[20].mxu1 %v11012_v59 }
  0x57   : > { %1261 = vmatprep.mubr.bf16.mxu1 %v11015_v63 }
  0x58   : > { %8890 = vmatpush3.bf16.msra.mxu0 %v10378_v15  ;;  %v10402_v15 = vld [vmem:[%s13895_s4 + $0x20] sm:$0xff]  }
  0x5b   : > { %2083 = vmatmul.mubr.bf16.vlgmr.msra.gmra.mrb[0].mxu0 %v10916_v42  ;;  %v10389_v42 = vld [vmem:[%s13895_s4 + $0x40] sm:$0xff]  }
  0x5c   : > { %2090 = vmatprep.mubr.bf16.mxu0 %v10919_v45  ;;  %9003 = vmatprep.subr.bf16.mxu0 %v10389_v42  ;;  %v10361_v42 = vld [vmem:[%s13893_s2 + $0xe8] sm:$0xff]  }
  0x5d   : > { %9004 = vmatpush3.bf16.msra.mxu0 %v10390_v47  ;;  %v10373_v47 = vld [vmem:[%s13893_s2 + $0xf8] sm:$0xff]  }
  0x5e   : > { %1262 = vmatmul.mubr.bf16.gmra.mrb[24].mxu1 %v11025_v18 }
  0x5f   : > { %1269 = vmatprep.mubr.bf16.mxu1 %v11029_v21 }
  0x63   : > { %2091 = vmatmul.mubr.bf16.gmra.mrb[4].mxu0 %v10935_v57  ;;  %v915_v57 = vrot.slane %v913_v35, 1  ;;  %v10731_v35 = vld [vmem:[%s10881_s10 + $0x44] ss:$16 sps:$4 sm:$0xff]  }
  0x64   : > { %2098 = vmatprep.mubr.bf16.mxu0 %v10944_v62  ;;  %v10395_v62 = vld [vmem:[%s13895_s4 + $0x50] sm:$0xff]  }
  0x65   : > { %v11273_v7 = vsel %vm684_vm0, %v911_v48, %v915_v57  ;;  %v10740_v48 = vld [vmem:[%s10881_s10 + $0xc0] ss:$16 sps:$4 sm:$0xff]  }
  0x66   : > { %1270 = vmatmul.mubr.bf16.gmra.mrb[28].mxu1 %v11043_v37 }
  0x67   : > { %1310 = vmatprep.mubr.bf16.mxu1 %v11049_v39 }
  0x6b   : > { %2099 = vmatmul.mubr.bf16.gmra.mrb[8].mxu0 %v10960_v10  ;;  %v10401_v10 = vld [vmem:[%s13895_s4 + $0x60] sm:$0xff]  }
  0x6c   : > { %2106 = vmatprep.mubr.bf16.mxu0 %v10963_v13 }
  0x6e   : > { %1311 = vmatmul.mubr.bf16.vlgmr.msra.gmra.mrb[32].mxu1 %v11082_v1 }
  0x6f   : > { %8748 = vmatpush3.bf16.msra.mxu1 %v10312_v56  ;;  %1318 = vmatprep.mubr.bf16.mxu1 %v11088_v3  ;;  %v851_v56 = vrot.slane %v849_v43, 1  ;;  %v923_v43 = vrot.slane %v921_v22, 1  ;;  %v10349_v22 = vld [vmem:[%s13893_s2 + $0xc8] sm:$0xff]  }
  0x70   : > { %8749 = vmatprep.subr.bf16.mxu1 %v10316_v60  ;;  %v11177_v60 = vsel %vm684_vm0, %v823_v50, %v827_v30  ;;  %v887_v30 = vor.u32 %v885_v55, %v859_v52  ;;  %v949_v50 = vshrl.u32 %v10338_v17, 16  ;;  %v10391_v52 = vld [vmem:[%s13895_s4 + $0x48] sm:$0xff]  }
  0x71   : > { %v879_v45 = vor.u32 %v877_v61, %v851_v56  ;;  %v10392_v55 = vld [vmem:[%s13895_s4 + $0x8] sm:$0xff]   ;;  %9005 = vmatprep.subr.bf16.mxu0 %v10391_v52  ;;  %v10396_v61 = vld [vmem:[%s13895_s4 + $0x10] sm:$0xff]   ;;  %v10379_v52 = vld [vmem:[%s13895_s4 + $0x1c0] sm:$0xff]  }
  0x72   : > { %9006 = vmatpush3.bf16.msra.mxu0 %v10392_v55  ;;  %v951_v0 = vor.u32 %v949_v50, %v923_v43  ;;  %v10735_v50 = vld [vmem:[%s10881_s10 + $0x84] ss:$16 sps:$4 sm:$0xff]  }
  0x73   : > { %8750 = vmatpush3.bf16.msra.mxu1 %v10317_v6  ;;  %v10337_v6 = vld [vmem:[%s13893_s2 + $0x28] sm:$0xff]   ;;  %v11251_v53 = vsel %vm684_vm0, %v879_v45, %v883_v2  ;;  %9007 = vmatprep.subr.bf16.mxu0 %v10395_v62  ;;  %v10730_v2 = vld [vmem:[%s10881_s10 + $0x20] ss:$16 sps:$4 sm:$0xff]   ;;  %v10737_v55 = vld [vmem:[%s10881_s10 + $0xa4] ss:$16 sps:$4 sm:$0xff]  }
  0x74   : > { %8751 = vmatprep.subr.bf16.mxu1 %v10321_v11  ;;  %v10341_v11 = vld [vmem:[%s13893_s2 + $0x70] sm:$0xff]   ;;  %2107 = vmatmul.mubr.bf16.gmra.mrb[12].mxu0 %v10979_v26 }
  0x75   : > { %2114 = vmatprep.mubr.bf16.mxu0 %v10985_v29  ;;  %v10407_v26 = vld [vmem:[%s13895_s4 + $0x70] sm:$0xff]  }
  0x76   : > { %1319 = vmatmul.mubr.bf16.gmra.mrb[36].mxu1 %v11129_v28  ;;  %9008 = vmatpush3.bf16.msra.mxu0 %v10396_v61  ;;  %v10727_v29 = vld [vmem:[%s10881_s10 + $0x4] ss:$16 sps:$4 sm:$0xff]   ;;  %v10732_v45 = vld [vmem:[%s10881_s10 + $0x40] ss:$16 sps:$4 sm:$0xff]   ;;  %v10743_v61 = vld [vmem:[%s10881_s10 + $0xc] ss:$16 sps:$4 sm:$0xff]  }
  0x77   : > { %1326 = vmatprep.mubr.bf16.mxu1 %v11133_v32  ;;  %8752 = vmatpush3.bf16.msra.mxu1 %v10322_v20  ;;  %v891_v20 = vrot.slane %v889_v5, 1  ;;  %v941_v5 = vshrl.u32 %v10340_v33, 16  ;;  %v10352_v33 = vld [vmem:[%s13893_s2 + $0x90] sm:$0xff]  }
  0x78   : > { %8753 = vmatprep.subr.bf16.mxu1 %v10326_v25  ;;  %v10347_v25 = vld [vmem:[%s13893_s2 + $0xc0] sm:$0xff]  }
  0x79   : > { %v11234_v40 = vsel %vm684_vm0, %v887_v30, %v891_v20  ;;  %v919_v49 = vor.u32 %v917_v14, %v891_v20  ;;  %v943_v13 = vor.u32 %v941_v5, %v915_v57  ;;  %v10348_v20 = vld [vmem:[%s13893_s2 + $0x80] sm:$0xff]   ;;  %v10381_v5 = vld [vmem:[%s13895_s4 + $0x1c8] sm:$0xff]  }
  0x7a   : > { %v10729_v30 = vld [vmem:[%s10881_s10 + $0x24] ss:$16 sps:$4 sm:$0xff]   ;;  %v10738_v57 = vld [vmem:[%s10881_s10 + $0xa0] ss:$16 sps:$4 sm:$0xff]  }
  0x7b   : > { %8754 = vmatpush3.bf16.msra.mxu1 %v10327_v36  ;;  %v11231_v36 = vsel %vm684_vm0, %v847_v27, %v851_v56  ;;  %v11257_v23 = vsel %vm684_vm0, %v919_v49, %v923_v43  ;;  %v10351_v27 = vld [vmem:[%s13893_s2 + $0xd0] sm:$0xff]  }
  0x7c   : > { %8755 = vmatprep.subr.bf16.mxu1 %v10331_v44  ;;  %v7768_v44 = vcombine.high %v480_v34, %v480_v34  ;;  %2115 = vmatmul.mubr.bf16.gmra.mrb[16].mxu0 %v11001_v41  ;;  %v10410_v41 = vld [vmem:[%s13895_s4 + $0x38] sm:$0xff]   ;;  %v10367_v43 = vld [vmem:[%s13893_s2 + $0xf0] sm:$0xff]  }
  0x7d   : > { %2122 = vmatprep.mubr.bf16.mxu0 %v11004_v46  ;;  %v10350_v46 = vld [vmem:[%s13893_s2 + $0x88] sm:$0xff]   ;;  %v10734_v49 = vld [vmem:[%s10881_s10 + $0x60] ss:$16 sps:$4 sm:$0xff]   ;;  %v10739_v62 = vld [vmem:[%s10881_s10 + $0xc4] ss:$16 sps:$4 sm:$0xff]  }
  0x7e   : > { %1327 = vmatmul.mubr.bf16.gmra.mrb[40].mxu1 %v11171_v51 }
  0x7f   : > { %1334 = vmatprep.mubr.bf16.mxu1 %v11177_v60  ;;  %8756 = vmatpush3.bf16.msra.mxu1 %v10332_v54  ;;  %v953_v54 = vshll.u32 %v7768_v44, 16  ;;  %v10733_v44 = vld [vmem:[%s10881_s10 + $0x64] ss:$16 sps:$4 sm:$0xff]  }
  0x80   : > { %8757 = vmatprep.subr.bf16.mxu1 %v10336_v58  ;;  %v7767_v58 = vcombine.low %v480_v34, %v480_v34  ;;  %v10353_v34 = vld [vmem:[%s13893_s2 + $0xd8] sm:$0xff]  }
  0x81   : > { %v955_v56 = vrot.slane %v953_v54, 1  ;;  %v10736_v54 = vld [vmem:[%s10881_s10 + $0x80] ss:$16 sps:$4 sm:$0xff]  }
  0x82   : > { %v945_v8 = vshll.u32 %v7767_v58, 16  ;;  %v10742_v58 = vld [vmem:[%s10881_s10 + $0xe0] ss:$16 sps:$4 sm:$0xff]  }
  0x83   : > { %8758 = vmatpush3.bf16.msra.mxu1 %v10337_v6  ;;  %v10397_v6 = vld [vmem:[%s13895_s4 + $0x58] sm:$0xff]   ;;  %v11279_v12 = vsel %vm684_vm0, %v951_v0, %v955_v56  ;;  %v10741_v56 = vld [vmem:[%s10881_s10 + $0xe4] ss:$16 sps:$4 sm:$0xff]  }
  0x84   : > { %8759 = vmatprep.subr.bf16.mxu1 %v10341_v11  ;;  %v10398_v11 = vld [vmem:[%s13895_s4 + $0x18] sm:$0xff]   ;;  %9009 = vmatprep.subr.bf16.mxu0 %v10397_v6  ;;  %v947_v14 = vrot.slane %v945_v8, 1  ;;  %v10380_v0 = vld [vmem:[%s13895_s4 + $0x180] sm:$0xff]   ;;  %v10382_v8 = vld [vmem:[%s13895_s4 + $0x188] sm:$0xff]  }
  0x85   : > { %9010 = vmatpush3.bf16.msra.mxu0 %v10398_v11  ;;  %v10744_v6 = vld [vmem:[%s10881_s10 + $0x8] ss:$16 sps:$4 sm:$0xff]   ;;  %v10427_v11 = vld [vmem:[%s13893_s2 + $0x240] sm:$0xff]  }
  0x86   : > { %1335 = vmatmul.mubr.bf16.gmra.mrb[44].mxu1 %v11211_v4  ;;  %9011 = vmatprep.subr.bf16.mxu0 %v10401_v10  ;;  %v11295_v17 = vsel %vm684_vm0, %v943_v13, %v947_v14  ;;  %v10429_v10 = vld [vmem:[%s13893_s2 + $0x200] sm:$0xff]   ;;  %v10745_v13 = vld [vmem:[%s10881_s10 + $0x2c] ss:$16 sps:$4 sm:$0xff]   ;;  %v10383_v14 = vld [vmem:[%s13895_s4 + $0x1d0] sm:$0xff]  }
  0x87   : > { %1342 = vmatprep.mubr.bf16.mxu1 %v11214_v9  ;;  %8760 = vmatpush3.bf16.msra.mxu1 %v10342_v19  ;;  %v10404_v19 = vld [vmem:[%s13895_s4 + $0x28] sm:$0xff]  }
  0x88   : > { %8761 = vmatprep.subr.bf16.mxu1 %v10345_v38  ;;  %v10408_v38 = vld [vmem:[%s13895_s4 + $0x30] sm:$0xff]   ;;  %2123 = vmatmul.mubr.bf16.gmra.mrb[20].mxu0 %v11012_v59  ;;  %v10355_v59 = vld [vmem:[%s13893_s2 + $0xe0] sm:$0xff]  }
  0x89   : > { %9012 = vmatpush3.bf16.msra.mxu0 %v10402_v15  ;;  %2130 = vmatprep.mubr.bf16.mxu0 %v11015_v63  ;;  %v10356_v63 = vld [vmem:[%s13893_s2 + $0xa0] sm:$0xff]   ;;  %v10384_v15 = vld [vmem:[%s13895_s4 + $0x190] sm:$0xff]  }
  0x8a   : > { %9013 = vmatprep.subr.bf16.mxu0 %v10403_v16  ;;  %v10385_v16 = vld [vmem:[%s13895_s4 + $0x1d8] sm:$0xff]  }
  0x8b   : > { %8762 = vmatpush3.bf16.msra.mxu1 %v10346_v24  ;;  %v10409_v24 = vld [vmem:[%s13895_s4 + $0x78] sm:$0xff]  }
  0x8c   : > { %8811 = vmatprep.subr.bf16.mxu1 %v10347_v25  ;;  %v10728_v25 = vld [vmem:[%s10881_s10] ss:$16 sps:$4 sm:$0xff]  }
  0x8d   : > { %9014 = vmatpush3.bf16.msra.mxu0 %v10404_v19  ;;  %v10746_v19 = vld [vmem:[%s10881_s10 + $0x28] ss:$16 sps:$4 sm:$0xff]  }
  0x8e   : > { %1343 = vmatmul.mubr.bf16.gmra.mrb[48].mxu1 %v11231_v36  ;;  %9015 = vmatprep.subr.bf16.mxu0 %v10407_v26  ;;  %v10386_v26 = vld [vmem:[%s13895_s4 + $0x198] sm:$0xff]  }
  0x8f   : > { %1350 = vmatprep.mubr.bf16.mxu1 %v11234_v40 }
  0x90   : > { %2131 = vmatmul.mubr.bf16.gmra.mrb[24].mxu0 %v11025_v18  ;;  %v10362_v18 = vld [vmem:[%s13893_s2 + $0xa8] sm:$0xff]  }
  0x91   : > { %9016 = vmatpush3.bf16.msra.mxu0 %v10408_v38  ;;  %2138 = vmatprep.mubr.bf16.mxu0 %v11029_v21  ;;  %v10368_v21 = vld [vmem:[%s13893_s2 + $0xb0] sm:$0xff]   ;;  %v10433_v38 = vld [vmem:[%s13893_s2 + $0x208] sm:$0xff]  }
  0x92   : > { %9017 = vmatprep.subr.bf16.mxu0 %v10409_v24  ;;  %v10388_v24 = vld [vmem:[%s13895_s4 + $0x1a0] sm:$0xff]  }
  0x95   : > { %9018 = vmatpush3.bf16.msra.mxu0 %v10410_v41  ;;  %v10393_v41 = vld [vmem:[%s13895_s4 + $0x1e8] sm:$0xff]  }
  0x96   : > { %1351 = vmatmul.mubr.bf16.gmra.mrb[52].mxu1 %v11251_v53  ;;  %9131 = vmatprep.subr.bf16.mxu0 %v10427_v11 }
  0x97   : > { %1358 = vmatprep.mubr.bf16.mxu1 %v11257_v23 }
  0x98   : > { %2139 = vmatmul.mubr.bf16.gmra.mrb[28].mxu0 %v11043_v37  ;;  %v10374_v37 = vld [vmem:[%s13893_s2 + $0xb8] sm:$0xff]  }
  0x99   : > { %2468 = vmatprep.mubr.bf16.mxu0 %v10727_v29 }
  0x9e   : > { %1359 = vmatmul.mubr.bf16.gmra.mrb[56].mxu1 %v11273_v7 }
  0x9f   : > { %1366 = vmatprep.mubr.bf16.mxu1 %v11279_v12 }
  0xa0   : > { %2469 = vmatmul.mubr.bf16.vlgmr.msra.gmra.mrb[32].mxu0 %v10728_v25 }
  0xa1   : > { %2476 = vmatprep.mubr.bf16.mxu0 %v10729_v30  ;;  %9132 = vmatpush3.bf16.msra.mxu0 %v10429_v10 }
  0xa6   : > { %1367 = vmatmul.mubr.bf16.gmra.mrb[60].mxu1 %v11295_v17 }
  0xa7   : > { %1631 = vmatprep.mubr.bf16.mxu1 %v10727_v29  ;;  %v10431_v29 = vld [vmem:[%s13893_s2 + $0x248] sm:$0xff]  }
  0xa8   : > { %2477 = vmatmul.mubr.bf16.gmra.mrb[36].mxu0 %v10730_v2  ;;  %9133 = vmatprep.subr.bf16.mxu0 %v10431_v29 }
  0xa9   : > { %2484 = vmatprep.mubr.bf16.mxu0 %v10731_v35  ;;  %9134 = vmatpush3.bf16.msra.mxu0 %v10433_v38 }
  0xae   : > { %1632 = vmatmul.mubr.bf16.vlgmr.msra.gmra.mrb[64].mxu1 %v10728_v25  ;;  %v10748_v25 = vld [vmem:[%s10881_s10 + $0x48] ss:$16 sps:$4 sm:$0xff]  }
  0xaf   : > { %8812 = vmatpush3.bf16.msra.mxu1 %v10348_v20  ;;  %1639 = vmatprep.mubr.bf16.mxu1 %v10729_v30  ;;  %v10747_v20 = vld [vmem:[%s10881_s10 + $0x4c] ss:$16 sps:$4 sm:$0xff]   ;;  %v10437_v30 = vld [vmem:[%s13893_s2 + $0x210] sm:$0xff]  }
  0xb0   : > { %8813 = vmatprep.subr.bf16.mxu1 %v10349_v22  ;;  %2485 = vmatmul.mubr.bf16.gmra.mrb[40].mxu0 %v10732_v45  ;;  %v10387_v22 = vld [vmem:[%s13895_s4 + $0x1e0] sm:$0xff]  }
  0xb1   : > { %2492 = vmatprep.mubr.bf16.mxu0 %v10733_v44 }
  0xb3   : > { %8814 = vmatpush3.bf16.msra.mxu1 %v10350_v46  ;;  %v10394_v46 = vld [vmem:[%s13895_s4 + $0x1a8] sm:$0xff]  }
  0xb4   : > { %8815 = vmatprep.subr.bf16.mxu1 %v10351_v27  ;;  %v10435_v27 = vld [vmem:[%s13893_s2 + $0x250] sm:$0xff]  }
  0xb5   : > { %9135 = vmatprep.subr.bf16.mxu0 %v10435_v27 }
  0xb6   : > { %1640 = vmatmul.mubr.bf16.gmra.mrb[68].mxu1 %v10730_v2  ;;  %9136 = vmatpush3.bf16.msra.mxu0 %v10437_v30 }
  0xb7   : > { %1647 = vmatprep.mubr.bf16.mxu1 %v10731_v35  ;;  %8816 = vmatpush3.bf16.msra.mxu1 %v10352_v33  ;;  %v10749_v33 = vld [vmem:[%s10881_s10 + $0x6c] ss:$16 sps:$4 sm:$0xff]  }
  0xb8   : > { %8817 = vmatprep.subr.bf16.mxu1 %v10353_v34  ;;  %2493 = vmatmul.mubr.bf16.gmra.mrb[44].mxu0 %v10734_v49  ;;  %v10399_v34 = vld [vmem:[%s13895_s4 + $0x1f0] sm:$0xff]   ;;  %v10405_v35 = vld [vmem:[%s13895_s4 + $0x1f8] sm:$0xff]  }
  0xb9   : > { %2500 = vmatprep.mubr.bf16.mxu0 %v10735_v50 }
  0xbb   : > { %8818 = vmatpush3.bf16.msra.mxu1 %v10354_v31  ;;  %v10400_v31 = vld [vmem:[%s13895_s4 + $0x1b0] sm:$0xff]  }
  0xbc   : > { %8819 = vmatprep.subr.bf16.mxu1 %v10355_v59 }
  0xbe   : > { %1648 = vmatmul.mubr.bf16.gmra.mrb[72].mxu1 %v10732_v45 }
  0xbf   : > { %1655 = vmatprep.mubr.bf16.mxu1 %v10733_v44  ;;  %8820 = vmatpush3.bf16.msra.mxu1 %v10356_v63  ;;  %v10406_v44 = vld [vmem:[%s13895_s4 + $0x1b8] sm:$0xff]  }
  0xc0   : > { %8821 = vmatprep.subr.bf16.mxu1 %v10361_v42  ;;  %2501 = vmatmul.mubr.bf16.gmra.mrb[48].mxu0 %v10736_v54 }
  0xc1   : > { %2508 = vmatprep.mubr.bf16.mxu0 %v10737_v55 }
  0xc3   : > { %8822 = vmatpush3.bf16.msra.mxu1 %v10362_v18 }
  0xc4   : > { %8823 = vmatprep.subr.bf16.mxu1 %v10367_v43  ;;  %v10750_v43 = vld [vmem:[%s10881_s10 + $0x68] ss:$16 sps:$4 sm:$0xff]  }
  0xc6   : > { %1656 = vmatmul.mubr.bf16.gmra.mrb[76].mxu1 %v10734_v49  ;;  %v10751_v49 = vld [vmem:[%s10881_s10 + $0x8c] ss:$16 sps:$4 sm:$0xff]  }
  0xc7   : > { %1663 = vmatprep.mubr.bf16.mxu1 %v10735_v50  ;;  %8824 = vmatpush3.bf16.msra.mxu1 %v10368_v21  ;;  %v10439_v21 = vld [vmem:[%s13893_s2 + $0x258] sm:$0xff]   ;;  %v10411_v50 = vld [vmem:[%s13895_s4 + $0xc0] sm:$0xff]  }
  0xc8   : > { %8825 = vmatprep.subr.bf16.mxu1 %v10373_v47  ;;  %2509 = vmatmul.mubr.bf16.gmra.mrb[52].mxu0 %v10738_v57  ;;  %v10441_v47 = vld [vmem:[%s13893_s2 + $0x218] sm:$0xff]  }
  0xc9   : > { %2516 = vmatprep.mubr.bf16.mxu0 %v10739_v62  ;;  %9137 = vmatprep.subr.bf16.mxu0 %v10439_v21 }
  0xca   : > { %9138 = vmatpush3.bf16.msra.mxu0 %v10441_v47 }
  0xcb   : > { %8826 = vmatpush3.bf16.msra.mxu1 %v10374_v37 }
  0xcc   : > { %8939 = vmatprep.subr.bf16.mxu1 %v10379_v52 }
  0xce   : > { %1664 = vmatmul.mubr.bf16.gmra.mrb[80].mxu1 %v10736_v54 }
  0xcf   : > { %1671 = vmatprep.mubr.bf16.mxu1 %v10737_v55 }
  0xd0   : > { %2517 = vmatmul.mubr.bf16.gmra.mrb[56].mxu0 %v10740_v48 }
  0xd1   : > { %2524 = vmatprep.mubr.bf16.mxu0 %v10741_v56 }
  0xd6   : > { %1672 = vmatmul.mubr.bf16.gmra.mrb[84].mxu1 %v10738_v57 }
  0xd7   : > { %1679 = vmatprep.mubr.bf16.mxu1 %v10739_v62 }
  0xd8   : > { %2525 = vmatmul.mubr.bf16.gmra.mrb[60].mxu0 %v10742_v58 }
  0xde   : > { %1680 = vmatmul.mubr.bf16.gmra.mrb[88].mxu1 %v10740_v48  ;;  %v10752_v48 = vld [vmem:[%s10881_s10 + $0x88] ss:$16 sps:$4 sm:$0xff]  }
  0xdf   : > { %1687 = vmatprep.mubr.bf16.mxu1 %v10741_v56  ;;  %v10443_v56 = vld [vmem:[%s13893_s2 + $0x260] sm:$0xff]  }
  0xe0   : > { %9139 = vmatprep.subr.bf16.mxu0 %v10443_v56  ;;  %v11550_v56 = vld [vmem:[%s10881_s10 + $0x44] ss:$16 sps:$4 sm:$0xff]  }
  0xe6   : > { %1688 = vmatmul.mubr.bf16.gmra.mrb[92].mxu1 %v10742_v58  ;;  %v10445_v58 = vld [vmem:[%s13893_s2 + $0x220] sm:$0xff]  }
  0xe7   : > { %1728 = vmatprep.mubr.bf16.mxu1 %v10743_v61  ;;  %v10753_v61 = vld [vmem:[%s10881_s10 + $0xac] ss:$16 sps:$4 sm:$0xff]   ;;  %9140 = vmatpush3.bf16.msra.mxu0 %v10445_v58  ;;  %v11553_v58 = vld [vmem:[%s10881_s10 + $0x40] ss:$16 sps:$4 sm:$0xff]  }
  0xee   : > { %1729 = vmatmul.mubr.bf16.vlgmr.msra.gmra.mrb[96].mxu1 %v10744_v6 }
  0xef   : > { %8940 = vmatpush3.bf16.msra.mxu1 %v10380_v0  ;;  %1736 = vmatprep.mubr.bf16.mxu1 %v10745_v13  ;;  %v10754_v13 = vld [vmem:[%s10881_s10 + $0xa8] ss:$16 sps:$4 sm:$0xff]  }
  0xf0   : > { %8941 = vmatprep.subr.bf16.mxu1 %v10381_v5 }
  0xf3   : > { %8942 = vmatpush3.bf16.msra.mxu1 %v10382_v8 }
  0xf4   : > { %8943 = vmatprep.subr.bf16.mxu1 %v10383_v14  ;;  %v10755_v14 = vld [vmem:[%s10881_s10 + $0xcc] ss:$16 sps:$4 sm:$0xff]  }
  0xf6   : > { %1737 = vmatmul.mubr.bf16.gmra.mrb[100].mxu1 %v10746_v19 }
  0xf7   : > { %1744 = vmatprep.mubr.bf16.mxu1 %v10747_v20  ;;  %8944 = vmatpush3.bf16.msra.mxu1 %v10384_v15  ;;  %v10447_v15 = vld [vmem:[%s13893_s2 + $0x268] sm:$0xff]  }
  0xf8   : > { %8945 = vmatprep.subr.bf16.mxu1 %v10385_v16  ;;  %v10449_v16 = vld [vmem:[%s13893_s2 + $0x228] sm:$0xff]   ;;  %9141 = vmatprep.subr.bf16.mxu0 %v10447_v15  ;;  %v10418_v15 = vld [vmem:[%s13895_s4 + $0x98] sm:$0xff]  }
  0xf9   : > { %9142 = vmatpush3.bf16.msra.mxu0 %v10449_v16  ;;  %v10475_v16 = vld [vmem:[%s13895_s4 + $0x248] sm:$0xff]  }
  0xfb   : > { %8946 = vmatpush3.bf16.msra.mxu1 %v10386_v26 }
  0xfc   : > { %8947 = vmatprep.subr.bf16.mxu1 %v10387_v22 }
  0xfe   : > { %1745 = vmatmul.mubr.bf16.gmra.mrb[104].mxu1 %v10748_v25  ;;  %v10451_v25 = vld [vmem:[%s13893_s2 + $0x270] sm:$0xff]  }
  0xff   : > { %1752 = vmatprep.mubr.bf16.mxu1 %v10749_v33  ;;  %8948 = vmatpush3.bf16.msra.mxu1 %v10388_v24  ;;  %v10756_v24 = vld [vmem:[%s10881_s10 + $0xc8] ss:$16 sps:$4 sm:$0xff]  }
 0x100   : > { %8949 = vmatprep.subr.bf16.mxu1 %v10393_v41  ;;  %v10757_v41 = vld [vmem:[%s10881_s10 + $0xec] ss:$16 sps:$4 sm:$0xff]   ;;  %9143 = vmatprep.subr.bf16.mxu0 %v10451_v25  ;;  %v10420_v25 = vld [vmem:[%s13895_s4 + $0xa0] sm:$0xff]  }
 0x101   : > { %v8635_v2 = vpop.f32.mrb[0].mxu1 }
 0x102   : > { %v8636_v59 = vpop.f32.mrb[1].mxu1 }
 0x103   : > { %v11451_v63 = vadd.f32 %v8636_v59, %v8635_v2  ;;  %v8638_v42 = vpop.f32.mrb[2].mxu1  ;;  %8950 = vmatpush3.bf16.msra.mxu1 %v10394_v46  ;;  %v10453_v46 = vld [vmem:[%s13893_s2 + $0x230] sm:$0xff]   ;;  %v10455_v59 = vld [vmem:[%s13893_s2 + $0x278] sm:$0xff]  }
 0x104   : > { %v8639_v45 = vpop.f32.mrb[3].mxu1  ;;  %8951 = vmatprep.subr.bf16.mxu1 %v10399_v34  ;;  %9144 = vmatpush3.bf16.msra.mxu0 %v10453_v46 }
 0x105   : > { %v11453_v18 = vadd.f32 %v8639_v45, %v8638_v42  ;;  %v10457_v42 = vld [vmem:[%s13893_s2 + $0x238] sm:$0xff]   ;;  %9145 = vmatprep.subr.bf16.mxu0 %v10455_v59  ;;  %v11518_v45 = vld [vmem:[%s10881_s10 + $0x24] ss:$16 sps:$4 sm:$0xff]  }
 0x106   : > { %1753 = vmatmul.mubr.bf16.gmra.mrb[108].mxu1 %v10750_v43  ;;  %3111 = vmatprep.mubr.bf16.mxu0 %v11518_v45  ;;  %v10487_v59 = vld [vmem:[%s13895_s4 + $0x210] sm:$0xff]  }
 0x107   : > { %1760 = vmatprep.mubr.bf16.mxu1 %v10751_v49  ;;  %8952 = vmatpush3.bf16.msra.mxu1 %v10400_v31 }
 0x108   : > { %8953 = vmatprep.subr.bf16.mxu1 %v10405_v35  ;;  %v10758_v35 = vld [vmem:[%s10881_s10 + $0xe8] ss:$16 sps:$4 sm:$0xff]   ;;  %9146 = vmatpush3.bf16.msra.mxu0 %v10457_v42  ;;  %v11617_v42 = vld [vmem:[%s10881_s10 + $0x80] ss:$16 sps:$4 sm:$0xff]  }
 0x109   : > { %v8641_v37 = vpop.f32.mrb[4].mxu1 }
 0x10a   : > { %v8642_v52 = vpop.f32.mrb[5].mxu1 }
 0x10b   : > { %v11469_v54 = vadd.f32 %v8642_v52, %v8641_v37  ;;  %v8644_v55 = vpop.f32.mrb[6].mxu1  ;;  %8954 = vmatpush3.bf16.msra.mxu1 %v10406_v44  ;;  %v11521_v44 = vld [vmem:[%s10881_s10 + $0x20] ss:$16 sps:$4 sm:$0xff]   ;;  %v10413_v37 = vld [vmem:[%s13895_s4 + $0xc8] sm:$0xff]  }
 0x10c   : > { %v8645_v57 = vpop.f32.mrb[7].mxu1  ;;  %9067 = vmatprep.subr.bf16.mxu1 %v10411_v50  ;;  %v10412_v50 = vld [vmem:[%s13895_s4 + $0x80] sm:$0xff]   ;;  %3112 = vmatmul.mubr.bf16.vlgmr.msra.gmra.mrb[64].mxu0 %v11521_v44 }
 0x10d   : > { %v11471_v62 = vadd.f32 %v8645_v57, %v8644_v55  ;;  %v10414_v55 = vld [vmem:[%s13895_s4 + $0x88] sm:$0xff]   ;;  %v10465_v57 = vld [vmem:[%s13895_s4 + $0x240] sm:$0xff]   ;;  %3119 = vmatprep.mubr.bf16.mxu0 %v11550_v56 }
 0x10e   : > { %1761 = vmatmul.mubr.bf16.gmra.mrb[112].mxu1 %v10752_v48  ;;  %v10467_v48 = vld [vmem:[%s13895_s4 + $0x200] sm:$0xff]   ;;  %9259 = vmatprep.subr.bf16.mxu0 %v10465_v57 }
 0x10f   : > { %1768 = vmatprep.mubr.bf16.mxu1 %v10753_v61  ;;  %9260 = vmatpush3.bf16.msra.mxu0 %v10467_v48 }
 0x110   : > { %9261 = vmatprep.subr.bf16.mxu0 %v10475_v16 }
 0x111   : > { %v8647_v0 = vpop.f32.mrb[8].mxu1 }
 0x112   : > { %v8648_v5 = vpop.f32.mrb[9].mxu1 }
 0x113   : > { %v11481_v6 = vadd.f32 %v8648_v5, %v8647_v0  ;;  %v8650_v8 = vpop.f32.mrb[10].mxu1 }
 0x114   : > { %v8651_v11 = vpop.f32.mrb[11].mxu1  ;;  %3120 = vmatmul.mubr.bf16.gmra.mrb[68].mxu0 %v11553_v58 }
 0x115   : > { %v11483_v10 = vadd.f32 %v8651_v11, %v8650_v8  ;;  %v10416_v8 = vld [vmem:[%s13895_s4 + $0x90] sm:$0xff]  }
 0x116   : > { %1769 = vmatmul.mubr.bf16.gmra.mrb[116].mxu1 %v10754_v13  ;;  %v10417_v13 = vld [vmem:[%s13895_s4 + $0xd8] sm:$0xff]  }
 0x117   : > { %1776 = vmatprep.mubr.bf16.mxu1 %v10755_v14 }
 0x119   : > { %v8653_v19 = vpop.f32.mrb[12].mxu1 }
 0x11a   : > { %v8654_v26 = vpop.f32.mrb[13].mxu1 }
 0x11b   : > { %v11493_v29 = vadd.f32 %v8654_v26, %v8653_v19  ;;  %v8656_v38 = vpop.f32.mrb[14].mxu1  ;;  %v10477_v19 = vld [vmem:[%s13895_s4 + $0x208] sm:$0xff]   ;;  %v11582_v26 = vld [vmem:[%s10881_s10 + $0x64] ss:$16 sps:$4 sm:$0xff]  }
 0x11c   : > { %v8657_v20 = vpop.f32.mrb[15].mxu1  ;;  %9262 = vmatpush3.bf16.msra.mxu0 %v10477_v19  ;;  %3127 = vmatprep.mubr.bf16.mxu0 %v11582_v26 }
 0x11d   : > { %v11495_v22 = vadd.f32 %v8657_v20, %v8656_v38  ;;  %v11585_v38 = vld [vmem:[%s10881_s10 + $0x60] ss:$16 sps:$4 sm:$0xff]  }
 0x11e   : > { %1777 = vmatmul.mubr.bf16.gmra.mrb[120].mxu1 %v10756_v24  ;;  %3128 = vmatmul.mubr.bf16.gmra.mrb[72].mxu0 %v11585_v38 }
 0x11f   : > { %1784 = vmatprep.mubr.bf16.mxu1 %v10757_v41 }
 0x121   : > { %v8659_v27 = vpop.f32.mrb[16].mxu1 }
 0x122   : > { %v8660_v30 = vpop.f32.mrb[17].mxu1 }
 0x123   : > { %v11505_v33 = vadd.f32 %v8660_v30, %v8659_v27  ;;  %v8662_v34 = vpop.f32.mrb[18].mxu1  ;;  %v10421_v27 = vld [vmem:[%s13895_s4 + $0xe8] sm:$0xff]  }
 0x124   : > { %v8663_v2 = vpop.f32.mrb[19].mxu1 }
 0x125   : > { %v11507_v31 = vadd.f32 %v8663_v2, %v8662_v34  ;;  %v10422_v34 = vld [vmem:[%s13895_s4 + $0xa8] sm:$0xff]   ;;  %v10485_v2 = vld [vmem:[%s13895_s4 + $0x250] sm:$0xff]  }
 0x126   : > { %1785 = vmatmul.mubr.bf16.gmra.mrb[124].mxu1 %v10758_v35  ;;  %v11614_v35 = vld [vmem:[%s10881_s10 + $0x84] ss:$16 sps:$4 sm:$0xff]   ;;  %9263 = vmatprep.subr.bf16.mxu0 %v10485_v2  ;;  %v10515_v2 = vld [vmem:[%s13895_s4 + $0x268] sm:$0xff]  }
 0x127   : > { %2179 = vmatprep.mubr.bf16.mxu1 %v11049_v39  ;;  %9264 = vmatpush3.bf16.msra.mxu0 %v10487_v59  ;;  %v10517_v59 = vld [vmem:[%s13895_s4 + $0x228] sm:$0xff]  }
 0x128   : > { %3135 = vmatprep.mubr.bf16.mxu0 %v11614_v35 }
 0x129   : > { %v8665_v43 = vpop.f32.mrb[20].mxu1  ;;  %3136 = vmatmul.mubr.bf16.gmra.mrb[76].mxu0 %v11617_v42 }
 0x12a   : > { %v8666_v21 = vpop.f32.mrb[21].mxu1 }
 0x12b   : > { %v11524_v47 = vadd.f32 %v8666_v21, %v8665_v43  ;;  %v8668_v49 = vpop.f32.mrb[22].mxu1 }
 0x12c   : > { %v8669_v39 = vpop.f32.mrb[23].mxu1 }
 0x12d   : > { %v11533_v52 = vadd.f32 %v8669_v39, %v8668_v49 }
 0x12e   : > { %2180 = vmatmul.mubr.bf16.vlgmr.msra.gmra.mrb[128].mxu1 %v11082_v1  ;;  %v10415_v1 = vld [vmem:[%s13895_s4 + $0xd0] sm:$0xff]  }
 0x12f   : > { %9068 = vmatpush3.bf16.msra.mxu1 %v10412_v50  ;;  %2187 = vmatprep.mubr.bf16.mxu1 %v11088_v3  ;;  %v10424_v50 = vld [vmem:[%s13895_s4 + $0xb0] sm:$0xff]  }
 0x130   : > { %9069 = vmatprep.subr.bf16.mxu1 %v10413_v37  ;;  %v10425_v37 = vld [vmem:[%s13895_s4 + $0xf8] sm:$0xff]  }
 0x131   : > { %v8671_v3 = vpop.f32.mrb[24].mxu1 }
 0x132   : > { %v8672_v61 = vpop.f32.mrb[25].mxu1 }
 0x133   : > { %v11556_v0 = vadd.f32 %v8672_v61, %v8671_v3  ;;  %v8674_v5 = vpop.f32.mrb[26].mxu1  ;;  %9070 = vmatpush3.bf16.msra.mxu1 %v10414_v55  ;;  %v10495_v3 = vld [vmem:[%s13895_s4 + $0x258] sm:$0xff]   ;;  %v11651_v61 = vld [vmem:[%s10881_s10 + $0xa0] ss:$16 sps:$4 sm:$0xff]  }
 0x134   : > { %v8675_v11 = vpop.f32.mrb[27].mxu1  ;;  %9071 = vmatprep.subr.bf16.mxu1 %v10415_v1  ;;  %v10426_v1 = vld [vmem:[%s13895_s4 + $0xb8] sm:$0xff]   ;;  %9265 = vmatprep.subr.bf16.mxu0 %v10495_v3  ;;  %v8891_v3 = vpop.f32.mrb[0].mxu0 }
 0x135   : > { %v11565_v14 = vadd.f32 %v8675_v11, %v8674_v5 }
 0x136   : > { %2188 = vmatmul.mubr.bf16.gmra.mrb[132].mxu1 %v11129_v28  ;;  %v10419_v28 = vld [vmem:[%s13895_s4 + $0xe0] sm:$0xff]  }
 0x137   : > { %2195 = vmatprep.mubr.bf16.mxu1 %v11133_v32  ;;  %9072 = vmatpush3.bf16.msra.mxu1 %v10416_v8 }
 0x138   : > { %9073 = vmatprep.subr.bf16.mxu1 %v10417_v13 }
 0x139   : > { %v8677_v32 = vpop.f32.mrb[28].mxu1 }
 0x13a   : > { %v8678_v20 = vpop.f32.mrb[29].mxu1 }
 0x13b   : > { %v11588_v24 = vadd.f32 %v8678_v20, %v8677_v32  ;;  %v8680_v41 = vpop.f32.mrb[30].mxu1  ;;  %9074 = vmatpush3.bf16.msra.mxu1 %v10418_v15  ;;  %v10507_v32 = vld [vmem:[%s13895_s4 + $0x220] sm:$0xff]  }
 0x13c   : > { %v8681_v46 = vpop.f32.mrb[31].mxu1  ;;  %9075 = vmatprep.subr.bf16.mxu1 %v10419_v28  ;;  %v10505_v28 = vld [vmem:[%s13895_s4 + $0x260] sm:$0xff]  }
 0x13d   : > { %v11597_v30 = vadd.f32 %v8681_v46, %v8680_v41  ;;  %v11670_v20 = vld [vmem:[%s10881_s10 + $0xc4] ss:$16 sps:$4 sm:$0xff]   ;;  %v11673_v41 = vld [vmem:[%s10881_s10 + $0xc0] ss:$16 sps:$4 sm:$0xff]  }
 0x13e   : > { %2196 = vmatmul.mubr.bf16.gmra.mrb[136].mxu1 %v11171_v51  ;;  %v10423_v51 = vld [vmem:[%s13895_s4 + $0xf0] sm:$0xff]  }
 0x13f   : > { %2203 = vmatprep.mubr.bf16.mxu1 %v11177_v60  ;;  %9076 = vmatpush3.bf16.msra.mxu1 %v10420_v25 }
 0x140   : > { %9077 = vmatprep.subr.bf16.mxu1 %v10421_v27 }
 0x141   : > { %v8699_v60 = vpop.f32.mrb[32].mxu1 }
 0x142   : > { %v8700_v43 = vpop.f32.mrb[33].mxu1 }
 0x143   : > { %v8701_v21 = vadd.f32 %v8700_v43, %v8699_v60  ;;  %v8702_v49 = vpop.f32.mrb[34].mxu1  ;;  %9078 = vmatpush3.bf16.msra.mxu1 %v10422_v34 }
 0x144   : > { %v8703_v39 = vpop.f32.mrb[35].mxu1  ;;  %9079 = vmatprep.subr.bf16.mxu1 %v10423_v51  ;;  %v11692_v51 = vld [vmem:[%s10881_s10 + $0xe4] ss:$16 sps:$4 sm:$0xff]  }
 0x145   : > { %v11628_v55 = vadd.f32 %v8701_v21, %v11451_v63  ;;  %v8704_v57 = vadd.f32 %v8703_v39, %v8702_v49  ;;  %v10497_v63 = vld [vmem:[%s13895_s4 + $0x218] sm:$0xff]   ;;  %v10525_v39 = vld [vmem:[%s13895_s4 + $0x270] sm:$0xff]  }
 0x146   : > { %2204 = vmatmul.mubr.bf16.gmra.mrb[140].mxu1 %v11211_v4  ;;  %v10428_v4 = vld [vmem:[%s13893_s2 + $0x2c0] sm:$0xff]   ;;  %9266 = vmatpush3.bf16.msra.mxu0 %v10497_v63 }
 0x147   : > { %v11632_v48 = vadd.f32 %v8704_v57, %v11453_v18  ;;  %2211 = vmatprep.mubr.bf16.mxu1 %v11214_v9  ;;  %9080 = vmatpush3.bf16.msra.mxu1 %v10424_v50  ;;  %v11648_v18 = vld [vmem:[%s10881_s10 + $0xa4] ss:$16 sps:$4 sm:$0xff]  }
 0x148   : > { %9081 = vmatprep.subr.bf16.mxu1 %v10425_v37  ;;  %3143 = vmatprep.mubr.bf16.mxu0 %v11648_v18  ;;  %v10527_v37 = vld [vmem:[%s13895_s4 + $0x230] sm:$0xff]  }
 0x149   : > { %v8705_v9 = vpop.f32.mrb[36].mxu1  ;;  %3144 = vmatmul.mubr.bf16.gmra.mrb[80].mxu0 %v11651_v61  ;;  %9267 = vmatprep.subr.bf16.mxu0 %v10505_v28  ;;  %v11714_v57 = vld [vmem:[%s10881_s10 + $0x104] ss:$16 sps:$4 sm:$0xff]   ;;  %v10759_v28 = vld [vmem:[%s10881_s10 + $0xc] ss:$16 sps:$4 sm:$0xff]  }
 0x14a   : > { %v8706_v5 = vpop.f32.mrb[37].mxu1  ;;  %9268 = vmatpush3.bf16.msra.mxu0 %v10507_v32  ;;  %3151 = vmatprep.mubr.bf16.mxu0 %v11670_v20 }
 0x14b   : > { %v8707_v8 = vadd.f32 %v8706_v5, %v8705_v9  ;;  %v8708_v11 = vpop.f32.mrb[38].mxu1  ;;  %9082 = vmatpush3.bf16.msra.mxu1 %v10426_v1  ;;  %9269 = vmatprep.subr.bf16.mxu0 %v10515_v2 }
 0x14c   : > { %v8709_v13 = vpop.f32.mrb[39].mxu1  ;;  %9195 = vmatprep.subr.bf16.mxu1 %v10428_v4  ;;  %v8892_v4 = vpop.f32.mrb[1].mxu0 }
 0x14d   : > { %v11656_v15 = vadd.f32 %v8707_v8, %v11469_v54  ;;  %v8710_v16 = vadd.f32 %v8709_v13, %v8708_v11  ;;  %v8894_v8 = vpop.f32.mrb[2].mxu0  ;;  %v10535_v11 = vld [vmem:[%s13895_s4 + $0x278] sm:$0xff]   ;;  %v11736_v32 = vadd.f32 %v8892_v4, %v8891_v3  ;;  %v10539_v3 = vld [vmem:[%s13893_s2 + $0x340] sm:$0xff]   ;;  %v10436_v4 = vld [vmem:[%s13893_s2 + $0x2d0] sm:$0xff]  }
 0x14e   : > { %2212 = vmatmul.mubr.bf16.gmra.mrb[144].mxu1 %v11231_v36  ;;  %9270 = vmatpush3.bf16.msra.mxu0 %v10517_v59  ;;  %v8895_v13 = vpop.f32.mrb[3].mxu0 }
 0x14f   : > { %v11660_v19 = vadd.f32 %v8710_v16, %v11471_v62  ;;  %2219 = vmatprep.mubr.bf16.mxu1 %v11234_v40  ;;  %9271 = vmatprep.subr.bf16.mxu0 %v10525_v39  ;;  %v10537_v16 = vld [vmem:[%s13895_s4 + $0x238] sm:$0xff]  }
 0x151   : > { %v8711_v54 = vpop.f32.mrb[40].mxu1  ;;  %3152 = vmatmul.mubr.bf16.gmra.mrb[84].mxu0 %v11673_v41 }
 0x152   : > { %v8712_v36 = vpop.f32.mrb[41].mxu1  ;;  %3159 = vmatprep.mubr.bf16.mxu0 %v11692_v51  ;;  %9272 = vmatpush3.bf16.msra.mxu0 %v10527_v37 }
 0x153   : > { %v8713_v40 = vadd.f32 %v8712_v36, %v8711_v54  ;;  %v8714_v62 = vpop.f32.mrb[42].mxu1  ;;  %9273 = vmatprep.subr.bf16.mxu0 %v10535_v11  ;;  %v8897_v54 = vpop.f32.mrb[4].mxu0  ;;  %v10440_v11 = vld [vmem:[%s13893_s2 + $0x2d8] sm:$0xff]  }
 0x154   : > { %v8715_v25 = vpop.f32.mrb[43].mxu1  ;;  %v8898_v36 = vpop.f32.mrb[5].mxu0 }
 0x155   : > { %v8716_v46 = vadd.f32 %v8715_v25, %v8714_v62  ;;  %v11678_v27 = vadd.f32 %v8713_v40, %v11481_v6  ;;  %v11695_v6 = vld [vmem:[%s10881_s10 + $0xe0] ss:$16 sps:$4 sm:$0xff]   ;;  %v11743_v62 = vadd.f32 %v8898_v36, %v8897_v54  ;;  %v8900_v25 = vpop.f32.mrb[6].mxu0 }
 0x156   : > { %2220 = vmatmul.mubr.bf16.gmra.mrb[148].mxu1 %v11251_v53  ;;  %9274 = vmatpush3.bf16.msra.mxu0 %v10537_v16  ;;  %v8901_v2 = vpop.f32.mrb[7].mxu0 }
 0x157   : > { %2227 = vmatprep.mubr.bf16.mxu1 %v11257_v23  ;;  %v11683_v34 = vadd.f32 %v8716_v46, %v11483_v10  ;;  %v11753_v39 = vadd.f32 %v8901_v2, %v8900_v25  ;;  %9387 = vmatprep.subr.bf16.mxu0 %v10539_v3 }
 0x159   : > { %v8717_v60 = vpop.f32.mrb[44].mxu1  ;;  %3160 = vmatmul.mubr.bf16.gmra.mrb[88].mxu0 %v11695_v6 }
 0x15a   : > { %v8718_v53 = vpop.f32.mrb[45].mxu1  ;;  %3167 = vmatprep.mubr.bf16.mxu0 %v11714_v57 }
 0x15b   : > { %v8719_v23 = vadd.f32 %v8718_v53, %v8717_v60  ;;  %v8720_v10 = vpop.f32.mrb[46].mxu1  ;;  %v8903_v53 = vpop.f32.mrb[8].mxu0 }
 0x15c   : > { %v8721_v43 = vpop.f32.mrb[47].mxu1 }
 0x15d   : > { %v8722_v21 = vadd.f32 %v8721_v43, %v8720_v10  ;;  %v11700_v49 = vadd.f32 %v8719_v23, %v11493_v29  ;;  %v11717_v29 = vld [vmem:[%s10881_s10 + $0x100] ss:$16 sps:$4 sm:$0xff]   ;;  %v8904_v10 = vpop.f32.mrb[9].mxu0 }
 0x15e   : > { %2228 = vmatmul.mubr.bf16.gmra.mrb[152].mxu1 %v11273_v7  ;;  %v8906_v37 = vpop.f32.mrb[10].mxu0 }
 0x15f   : > { %2235 = vmatprep.mubr.bf16.mxu1 %v11279_v12  ;;  %v11705_v50 = vadd.f32 %v8722_v21, %v11495_v22 }
 0x161   : > { %v8723_v1 = vpop.f32.mrb[48].mxu1  ;;  %3168 = vmatmul.mubr.bf16.gmra.mrb[92].mxu0 %v11717_v29 }
 0x162   : > { %v8724_v7 = vpop.f32.mrb[49].mxu1  ;;  %3578 = vmatprep.mubr.bf16.mxu0 %v11518_v45 }
 0x163   : > { %v8725_v12 = vadd.f32 %v8724_v7, %v8723_v1  ;;  %v8726_v22 = vpop.f32.mrb[50].mxu1  ;;  %v10760_v1 = vld [vmem:[%s10881_s10 + $0x8] ss:$16 sps:$4 sm:$0xff]   ;;  %v8907_v7 = vpop.f32.mrb[11].mxu0 }
 0x164   : > { %v8727_v63 = vpop.f32.mrb[51].mxu1 }
 0x165   : > { %v8728_v9 = vadd.f32 %v8727_v63, %v8726_v22  ;;  %v11723_v5 = vadd.f32 %v8725_v12, %v11505_v33  ;;  %v11738_v33 = vadd.f32 %v8895_v13, %v8894_v8  ;;  %v10761_v12 = vld [vmem:[%s10881_s10 + $0x2c] ss:$16 sps:$4 sm:$0xff]   ;;  %v10541_v63 = vld [vmem:[%s13893_s2 + $0x300] sm:$0xff]  }
 0x166   : > { %2236 = vmatmul.mubr.bf16.gmra.mrb[156].mxu1 %v11295_v17  ;;  %v10430_v17 = vld [vmem:[%s13893_s2 + $0x280] sm:$0xff]  }
 0x167   : > { %2565 = vmatprep.mubr.bf16.mxu1 %v10759_v28  ;;  %v11734_v45 = vadd.f32 %v8728_v9, %v11507_v31  ;;  %v10432_v31 = vld [vmem:[%s13893_s2 + $0x2c8] sm:$0xff]   ;;  %v8909_v28 = vpop.f32.mrb[12].mxu0 }
 0x168   : > { %v8910_v36 = vpop.f32.mrb[13].mxu0 }
 0x169   : > { %v8729_v40 = vpop.f32.mrb[52].mxu1  ;;  %3579 = vmatmul.mubr.bf16.vlgmr.msra.gmra.mrb[96].mxu0 %v11521_v44  ;;  %v10434_v44 = vld [vmem:[%s13893_s2 + $0x288] sm:$0xff]   ;;  %v11787_v25 = vadd.f32 %v8910_v36, %v8909_v28  ;;  %v10549_v28 = vld [vmem:[%s13893_s2 + $0x310] sm:$0xff]  }
 0x16a   : > { %v8730_v46 = vpop.f32.mrb[53].mxu1  ;;  %3586 = vmatprep.mubr.bf16.mxu0 %v11550_v56  ;;  %v11763_v56 = vadd.f32 %v8904_v10, %v8903_v53  ;;  %9388 = vmatpush3.bf16.msra.mxu0 %v10541_v63  ;;  %v10545_v53 = vld [vmem:[%s13893_s2 + $0x308] sm:$0xff]  }
 0x16b   : > { %v8731_v59 = vadd.f32 %v8730_v46, %v8729_v40  ;;  %v8732_v60 = vpop.f32.mrb[54].mxu1  ;;  %13918 = vst [vmem:[#allocation5_spill] sm:$0xff] %v11787_v25  ;;  %v8912_v46 = vpop.f32.mrb[14].mxu0 }
 0x16c   : > { %v8733_v23 = vpop.f32.mrb[55].mxu1  ;;  %13916 = vst [vmem:[#allocation3_spill] sm:$0xff] %v11763_v56  ;;  %v8913_v2 = vpop.f32.mrb[15].mxu0 }
 0x16d   : > { %v8734_v43 = vadd.f32 %v8733_v23, %v8732_v60  ;;  %v11751_v21 = vadd.f32 %v8731_v59, %v11524_v47  ;;  %v11765_v47 = vadd.f32 %v8907_v7, %v8906_v37  ;;  %v10763_v59 = vld [vmem:[%s10881_s10 + $0x4c] ss:$16 sps:$4 sm:$0xff]   ;;  %v10444_v23 = vld [vmem:[%s13893_s2 + $0x2e0] sm:$0xff]   ;;  %v8915_v7 = vpop.f32.mrb[16].mxu0 }
 0x16e   : > { %2566 = vmatmul.mubr.bf16.vlgmr.msra.gmra.mrb[160].mxu1 %v10760_v1  ;;  %v10446_v1 = vld [vmem:[%s13893_s2 + $0x2a0] sm:$0xff]   ;;  %v8916_v3 = vpop.f32.mrb[17].mxu0 }
 0x16f   : > { %9196 = vmatpush3.bf16.msra.mxu1 %v10430_v17  ;;  %2573 = vmatprep.mubr.bf16.mxu1 %v10761_v12  ;;  %v11761_v22 = vadd.f32 %v8734_v43, %v11533_v52  ;;  %13917 = vst [vmem:[#allocation4_spill] sm:$0xff] %v11765_v47  ;;  %v10438_v52 = vld [vmem:[%s13893_s2 + $0x290] sm:$0xff]  }
 0x170   : > { %9197 = vmatprep.subr.bf16.mxu1 %v10432_v31  ;;  %v10762_v31 = vld [vmem:[%s10881_s10 + $0x28] ss:$16 sps:$4 sm:$0xff]  }
 0x171   : > { %v8735_v9 = vpop.f32.mrb[56].mxu1  ;;  %3587 = vmatmul.mubr.bf16.gmra.mrb[100].mxu0 %v11553_v58  ;;  %v10442_v58 = vld [vmem:[%s13893_s2 + $0x298] sm:$0xff]  }
 0x172   : > { %v8736_v8 = vpop.f32.mrb[57].mxu1  ;;  %3594 = vmatprep.mubr.bf16.mxu0 %v11582_v26  ;;  %v11797_v26 = vadd.f32 %v8913_v2, %v8912_v46 }
 0x173   : > { %v8737_v13 = vadd.f32 %v8736_v8, %v8735_v9  ;;  %v8738_v16 = vpop.f32.mrb[58].mxu1  ;;  %9198 = vmatpush3.bf16.msra.mxu1 %v10434_v44  ;;  %v10448_v44 = vld [vmem:[%s13893_s2 + $0x2e8] sm:$0xff]   ;;  %v11819_v9 = vadd.f32 %v8916_v3, %v8915_v7  ;;  %v10553_v3 = vld [vmem:[%s13893_s2 + $0x318] sm:$0xff]  }
 0x174   : > { %v8739_v54 = vpop.f32.mrb[59].mxu1  ;;  %9199 = vmatprep.subr.bf16.mxu1 %v10436_v4  ;;  %13919 = vst [vmem:[#allocation6_spill] sm:$0xff] %v11797_v26  ;;  %v10764_v8 = vld [vmem:[%s10881_s10 + $0x48] ss:$16 sps:$4 sm:$0xff]  }
 0x175   : > { %v8740_v40 = vadd.f32 %v8739_v54, %v8738_v16  ;;  %v11785_v17 = vadd.f32 %v8737_v13, %v11556_v0  ;;  %v10543_v0 = vld [vmem:[%s13893_s2 + $0x348] sm:$0xff]   ;;  %13920 = vst [vmem:[#allocation7_spill] sm:$0xff] %v11819_v9  ;;  %v10452_v54 = vld [vmem:[%s13893_s2 + $0x2f0] sm:$0xff]  }
 0x176   : > { %2574 = vmatmul.mubr.bf16.gmra.mrb[164].mxu1 %v10762_v31  ;;  %9389 = vmatprep.subr.bf16.mxu0 %v10543_v0  ;;  %v10450_v13 = vld [vmem:[%s13893_s2 + $0x2a8] sm:$0xff]   ;;  %v10454_v31 = vld [vmem:[%s13893_s2 + $0x2b0] sm:$0xff]  }
 0x177   : > { %2581 = vmatprep.mubr.bf16.mxu1 %v10763_v59  ;;  %9200 = vmatpush3.bf16.msra.mxu1 %v10438_v52  ;;  %v11795_v60 = vadd.f32 %v8740_v40, %v11565_v14  ;;  %v8918_v52 = vpop.f32.mrb[18].mxu0 }
 0x178   : > { %9201 = vmatprep.subr.bf16.mxu1 %v10440_v11  ;;  %9390 = vmatpush3.bf16.msra.mxu0 %v10545_v53  ;;  %v8919_v11 = vpop.f32.mrb[19].mxu0 }
 0x179   : > { %v8741_v10 = vpop.f32.mrb[60].mxu1  ;;  %3595 = vmatmul.mubr.bf16.gmra.mrb[104].mxu0 %v11585_v38  ;;  %v10765_v38 = vld [vmem:[%s10881_s10 + $0x6c] ss:$16 sps:$4 sm:$0xff]   ;;  %v8921_v2 = vpop.f32.mrb[20].mxu0 }
 0x17a   : > { %v8742_v43 = vpop.f32.mrb[61].mxu1  ;;  %3602 = vmatprep.mubr.bf16.mxu0 %v11614_v35  ;;  %v11829_v35 = vadd.f32 %v8919_v11, %v8918_v52  ;;  %v8922_v0 = vpop.f32.mrb[21].mxu0 }
 0x17b   : > { %v8743_v14 = vadd.f32 %v8742_v43, %v8741_v10  ;;  %v8744_v37 = vpop.f32.mrb[62].mxu1  ;;  %9202 = vmatpush3.bf16.msra.mxu1 %v10442_v58  ;;  %v10456_v58 = vld [vmem:[%s13893_s2 + $0x2f8] sm:$0xff]   ;;  %v11851_v10 = vadd.f32 %v8922_v0, %v8921_v2  ;;  %v8924_v43 = vpop.f32.mrb[22].mxu0 }
 0x17c   : > { %v8745_v12 = vpop.f32.mrb[63].mxu1  ;;  %9203 = vmatprep.subr.bf16.mxu1 %v10444_v23  ;;  %13921 = vst [vmem:[#allocation8_spill] sm:$0xff] %v11829_v35 }
 0x17d   : > { %v8746_v63 = vadd.f32 %v8745_v12, %v8744_v37  ;;  %v11817_v4 = vadd.f32 %v8743_v14, %v11588_v24  ;;  %v10547_v24 = vld [vmem:[%s13893_s2 + $0x350] sm:$0xff]   ;;  %13922 = vst [vmem:[#allocation9_spill] sm:$0xff] %v11851_v10  ;;  %v10766_v14 = vld [vmem:[%s10881_s10 + $0x68] ss:$16 sps:$4 sm:$0xff]   ;;  %v8925_v37 = vpop.f32.mrb[23].mxu0 }
 0x17e   : > { %2582 = vmatmul.mubr.bf16.gmra.mrb[168].mxu1 %v10764_v8  ;;  %9391 = vmatprep.subr.bf16.mxu0 %v10547_v24  ;;  %v8927_v8 = vpop.f32.mrb[24].mxu0  ;;  %v12057_v10 = vld [vmem:[%s10881_s10 + $0x8c] ss:$16 sps:$4 sm:$0xff]  }
 0x17f   : > { %2589 = vmatprep.mubr.bf16.mxu1 %v10765_v38  ;;  %9204 = vmatpush3.bf16.msra.mxu1 %v10446_v1  ;;  %v11827_v16 = vadd.f32 %v8746_v63, %v11597_v30  ;;  %v10458_v1 = vld [vmem:[%s13893_s2 + $0x2b8] sm:$0xff]   ;;  %v8928_v38 = vpop.f32.mrb[25].mxu0 }
 0x180   : > { %9205 = vmatprep.subr.bf16.mxu1 %v10448_v44  ;;  %9392 = vmatpush3.bf16.msra.mxu0 %v10549_v28  ;;  %v10551_v44 = vld [vmem:[%s13893_s2 + $0x358] sm:$0xff]   ;;  %v11875_v28 = vadd.f32 %v8928_v38, %v8927_v8 }
 0x181   : > { %v8763_v36 = vpop.f32.mrb[64].mxu1  ;;  %3603 = vmatmul.mubr.bf16.gmra.mrb[108].mxu0 %v11617_v42  ;;  %v10767_v42 = vld [vmem:[%s10881_s10 + $0x8c] ss:$16 sps:$4 sm:$0xff]   ;;  %9393 = vmatprep.subr.bf16.mxu0 %v10551_v44 }
 0x182   : > { %v8764_v40 = vpop.f32.mrb[65].mxu1  ;;  %3610 = vmatprep.mubr.bf16.mxu0 %v11648_v18  ;;  %v11861_v18 = vadd.f32 %v8925_v37, %v8924_v43  ;;  %13924 = vst [vmem:[#allocation11_spill] sm:$0xff] %v11875_v28  ;;  %v10771_v44 = vld [vmem:[%s10881_s10 + $0xcc] ss:$16 sps:$4 sm:$0xff]  }
 0x183   : > { %v8765_v30 = vadd.f32 %v8764_v40, %v8763_v36  ;;  %v8766_v46 = vpop.f32.mrb[66].mxu1  ;;  %9206 = vmatpush3.bf16.msra.mxu1 %v10450_v13  ;;  %v10768_v36 = vld [vmem:[%s10881_s10 + $0x88] ss:$16 sps:$4 sm:$0xff]  }
 0x184   : > { %v8767_v59 = vpop.f32.mrb[67].mxu1  ;;  %9207 = vmatprep.subr.bf16.mxu1 %v10452_v54  ;;  %13923 = vst [vmem:[#allocation10_spill] sm:$0xff] %v11861_v18  ;;  %9394 = vmatpush3.bf16.msra.mxu0 %v10553_v3  ;;  %v8930_v54 = vpop.f32.mrb[26].mxu0 }
 0x185   : > { %v8768_v53 = vadd.f32 %v8767_v59, %v8766_v46  ;;  %v11849_v23 = vadd.f32 %v8765_v30, %v11628_v55  ;;  %v10466_v55 = vld [vmem:[%s13895_s4 + $0x2c0] sm:$0xff]   ;;  %v8931_v40 = vpop.f32.mrb[27].mxu0  ;;  %v10769_v30 = vld [vmem:[%s10881_s10 + $0xac] ss:$16 sps:$4 sm:$0xff]  }
 0x186   : > { %2590 = vmatmul.mubr.bf16.gmra.mrb[172].mxu1 %v10766_v14  ;;  %v8933_v0 = vpop.f32.mrb[28].mxu0 }
 0x187   : > { %2597 = vmatprep.mubr.bf16.mxu1 %v10767_v42  ;;  %9208 = vmatpush3.bf16.msra.mxu1 %v10454_v31  ;;  %v11859_v7 = vadd.f32 %v8768_v53, %v11632_v48  ;;  %v11884_v31 = vadd.f32 %v8931_v40, %v8930_v54  ;;  %v8934_v53 = vpop.f32.mrb[29].mxu0  ;;  %v10772_v40 = vld [vmem:[%s10881_s10 + $0xc8] ss:$16 sps:$4 sm:$0xff]  }
 0x188   : > { %9209 = vmatprep.subr.bf16.mxu1 %v10456_v58  ;;  %v11895_v37 = vadd.f32 %v8934_v53, %v8933_v0  ;;  %v8936_v42 = vpop.f32.mrb[30].mxu0 }
 0x189   : > { %v8769_v12 = vpop.f32.mrb[68].mxu1  ;;  %3611 = vmatmul.mubr.bf16.gmra.mrb[112].mxu0 %v11651_v61  ;;  %13925 = vst [vmem:[#allocation12_spill] sm:$0xff] %v11884_v31  ;;  %v10557_v61 = vld [vmem:[%s13893_s2 + $0x320] sm:$0xff]  }
 0x18a   : > { %v8770_v63 = vpop.f32.mrb[69].mxu1  ;;  %3618 = vmatprep.mubr.bf16.mxu0 %v11670_v20  ;;  %13926 = vst [vmem:[#allocation13_spill] sm:$0xff] %v11895_v37 }
 0x18b   : > { %v8771_v48 = vadd.f32 %v8770_v63, %v8769_v12  ;;  %v8772_v52 = vpop.f32.mrb[70].mxu1  ;;  %9210 = vmatpush3.bf16.msra.mxu1 %v10458_v1  ;;  %v10770_v1 = vld [vmem:[%s10881_s10 + $0xa8] ss:$16 sps:$4 sm:$0xff]  }
 0x18c   : > { %v8773_v11 = vpop.f32.mrb[71].mxu1  ;;  %9323 = vmatprep.subr.bf16.mxu1 %v10466_v55  ;;  %v8937_v55 = vpop.f32.mrb[31].mxu0  ;;  %v10559_v63 = vld [vmem:[%s13893_s2 + $0x368] sm:$0xff]  }
 0x18d   : > { %v8774_v13 = vadd.f32 %v8773_v11, %v8772_v52  ;;  %v11873_v24 = vadd.f32 %v8771_v48, %v11656_v15  ;;  %v10555_v15 = vld [vmem:[%s13893_s2 + $0x360] sm:$0xff]   ;;  %v11904_v3 = vadd.f32 %v8937_v55, %v8936_v42 }
 0x18e   : > { %2598 = vmatmul.mubr.bf16.gmra.mrb[176].mxu1 %v10768_v36  ;;  %9395 = vmatprep.subr.bf16.mxu0 %v10555_v15  ;;  %v11941_v55 = vld [vmem:[%s10881_s10 + $0x40] ss:$16 sps:$4 sm:$0xff]  }
 0x18f   : > { %2605 = vmatprep.mubr.bf16.mxu1 %v10769_v30  ;;  %v11882_v46 = vadd.f32 %v8774_v13, %v11660_v19  ;;  %9396 = vmatpush3.bf16.msra.mxu0 %v10557_v61  ;;  %13927 = vst [vmem:[#allocation14_spill] sm:$0xff] %v11904_v3 }
 0x190   : > { %9397 = vmatprep.subr.bf16.mxu0 %v10559_v63 }
 0x191   : > { %v8775_v2 = vpop.f32.mrb[72].mxu1  ;;  %3619 = vmatmul.mubr.bf16.gmra.mrb[116].mxu0 %v11673_v41  ;;  %v10561_v41 = vld [vmem:[%s13893_s2 + $0x328] sm:$0xff]  }
 0x192   : > { %v8776_v59 = vpop.f32.mrb[73].mxu1  ;;  %3626 = vmatprep.mubr.bf16.mxu0 %v11692_v51 }
 0x193   : > { %v8777_v58 = vadd.f32 %v8776_v59, %v8775_v2  ;;  %v8778_v20 = vpop.f32.mrb[74].mxu1  ;;  %9398 = vmatpush3.bf16.msra.mxu0 %v10561_v41  ;;  %v10565_v59 = vld [vmem:[%s13893_s2 + $0x330] sm:$0xff]  }
 0x194   : > { %v8779_v19 = vpop.f32.mrb[75].mxu1 }
 0x195   : > { %v11893_v43 = vadd.f32 %v8777_v58, %v11678_v27  ;;  %v8780_v14 = vadd.f32 %v8779_v19, %v8778_v20  ;;  %v10573_v20 = vld [vmem:[%s10881_s10 + $0x24] ss:$16 sps:$4 sm:$0xff]   ;;  %v11935_v19 = vld [vmem:[%s10881_s10 + $0x2c] ss:$16 sps:$4 sm:$0xff]  }
 0x196   : > { %2606 = vmatmul.mubr.bf16.gmra.mrb[180].mxu1 %v10770_v1 }
 0x197   : > { %v11901_v12 = vadd.f32 %v8780_v14, %v11683_v34  ;;  %2613 = vmatprep.mubr.bf16.mxu1 %v10771_v44  ;;  %v9019_v34 = vpop.f32.mrb[32].mxu0  ;;  %v11938_v14 = vld [vmem:[%s10881_s10 + $0x44] ss:$16 sps:$4 sm:$0xff]   ;;  %v4008_v44 = vshll.u32 %v10573_v20, 16 }
 0x198   : > { %v9020_v11 = vpop.f32.mrb[33].mxu0 }
 0x199   : > { %v8781_v27 = vpop.f32.mrb[76].mxu1  ;;  %v11915_v54 = vadd.f32 %v9020_v11, %v9019_v34  ;;  %v9022_v36 = vpop.f32.mrb[34].mxu0  ;;  %3627 = vmatmul.mubr.bf16.gmra.mrb[120].mxu0 %v11695_v6  ;;  %v10563_v6 = vld [vmem:[%s13893_s2 + $0x370] sm:$0xff]   ;;  %v4006_v34 = vshrl.u32 %v10573_v20, 16 }
 0x19a   : > { %v8782_v48 = vpop.f32.mrb[77].mxu1  ;;  %v9023_v30 = vpop.f32.mrb[35].mxu0  ;;  %3634 = vmatprep.mubr.bf16.mxu0 %v11714_v57  ;;  %v10571_v57 = vld [vmem:[%s10881_s10 + $0x20] ss:$16 sps:$4 sm:$0xff]   ;;  %9399 = vmatprep.subr.bf16.mxu0 %v10563_v6 }
 0x19b   : > { %v8783_v52 = vadd.f32 %v8782_v48, %v8781_v27  ;;  %v8784_v51 = vpop.f32.mrb[78].mxu1  ;;  %v11924_v15 = vadd.f32 %v9023_v30, %v9022_v36  ;;  %v9025_v53 = vpop.f32.mrb[36].mxu0  ;;  %9400 = vmatpush3.bf16.msra.mxu0 %v10565_v59  ;;  %v3996_v27 = vshll.u32 %v10571_v57, 16  ;;  %v4013_v36 = vshll.u32 %v11938_v14, 16 }
 0x19c   : > { %v8785_v8 = vpop.f32.mrb[79].mxu1  ;;  %v9026_v1 = vpop.f32.mrb[37].mxu0 }
 0x19d   : > { %v11913_v38 = vadd.f32 %v8783_v52, %v11700_v49  ;;  %v8786_v13 = vadd.f32 %v8785_v8, %v8784_v51  ;;  %v10773_v49 = vld [vmem:[%s10881_s10 + $0xec] ss:$16 sps:$4 sm:$0xff]   ;;  %v11946_v48 = vadd.f32 %v9026_v1, %v9025_v53  ;;  %v9028_v52 = vpop.f32.mrb[38].mxu0  ;;  %v10774_v8 = vld [vmem:[%s10881_s10 + $0xe8] ss:$16 sps:$4 sm:$0xff]   ;;  %v3998_v30 = vrot.slane %v3996_v27, 1 }
 0x19e   : > { %2614 = vmatmul.mubr.bf16.gmra.mrb[184].mxu1 %v10772_v40  ;;  %v10567_v51 = vld [vmem:[%s13893_s2 + $0x378] sm:$0xff]   ;;  %v9029_v11 = vpop.f32.mrb[39].mxu0  ;;  %v3994_v40 = vshrl.u32 %v10571_v57, 16  ;;  %v4015_v59 = vrot.slane %v4013_v36, 1 }
 0x19f   : > { %v11921_v2 = vadd.f32 %v8786_v13, %v11705_v50  ;;  %2621 = vmatprep.mubr.bf16.mxu1 %v10773_v49  ;;  %v10569_v13 = vld [vmem:[%s13893_s2 + $0x338] sm:$0xff]   ;;  %v11961_v49 = vadd.f32 %v9029_v11, %v9028_v52  ;;  %9401 = vmatprep.subr.bf16.mxu0 %v10567_v51  ;;  %v9031_v27 = vpop.f32.mrb[40].mxu0  ;;  %v11981_v52 = vld [vmem:[%s10881_s10 + $0x64] ss:$16 sps:$4 sm:$0xff]   ;;  %v10585_v11 = vld [vmem:[%s10881_s10 + $0x60] ss:$16 sps:$4 sm:$0xff]  }
 0x1a0   : > { %9402 = vmatpush3.bf16.msra.mxu0 %v10569_v13  ;;  %v4073_v28 = vshrl.u32 %v10585_v11, 16 }
 0x1a1   : > { %v8787_v61 = vpop.f32.mrb[80].mxu1  ;;  %3635 = vmatmul.mubr.bf16.gmra.mrb[124].mxu0 %v11717_v29  ;;  %13928 = vst [vmem:[#allocation15_spill] sm:$0xff] %v11961_v49 }
 0x1a2   : > { %v8788_v58 = vpop.f32.mrb[81].mxu1 }
 0x1a3   : > { %v8789_v0 = vadd.f32 %v8788_v58, %v8787_v61  ;;  %v8790_v50 = vpop.f32.mrb[82].mxu1  ;;  %v4001_v61 = vshll.u32 %v11941_v55, 16  ;;  %v3999_v58 = vor.u32 %v3998_v30, %v3994_v40 }
 0x1a4   : > { %v8791_v42 = vpop.f32.mrb[83].mxu1 }
 0x1a5   : > { %v11944_v63 = vadd.f32 %v8789_v0, %v11723_v5  ;;  %v8792_v41 = vadd.f32 %v8791_v42, %v8790_v50  ;;  %v4010_v5 = vrot.slane %v4008_v44, 1  ;;  %v4003_v57 = vrot.slane %v4001_v61, 1  ;;  %v11965_v50 = vld [vmem:[%s10881_s10 + $0x28] ss:$16 sps:$4 sm:$0xff]   ;;  %v11974_v44 = vld [vmem:[%s10881_s10 + $0x4c] ss:$16 sps:$4 sm:$0xff]  }
 0x1a6   : > { %2622 = vmatmul.mubr.bf16.gmra.mrb[188].mxu1 %v10774_v8  ;;  %v9032_v8 = vpop.f32.mrb[41].mxu0  ;;  %v4049_v61 = vshrl.u32 %v11938_v14, 16  ;;  %v10486_v14 = vld [vmem:[%s13895_s4 + $0x2d0] sm:$0xff]  }
 0x1a7   : > { %v11958_v29 = vadd.f32 %v8792_v41, %v11734_v45  ;;  %3208 = vmatprep.mubr.bf16.mxu1 %v11935_v19  ;;  %v4011_v6 = vor.u32 %v4010_v5, %v4006_v34  ;;  %v10468_v45 = vld [vmem:[%s13895_s4 + $0x280] sm:$0xff]   ;;  %v11978_v41 = vsel %vm684_vm0, %v3999_v58, %v4003_v57  ;;  %v10476_v34 = vld [vmem:[%s13895_s4 + $0x2c8] sm:$0xff]   ;;  %v11990_v36 = vadd.f32 %v9032_v8, %v9031_v27  ;;  %v9034_v40 = vpop.f32.mrb[42].mxu0 }
 0x1a8   : > { %v9035_v30 = vpop.f32.mrb[43].mxu0  ;;  %v4041_v58 = vshrl.u32 %v11941_v55, 16  ;;  %v4051_v55 = vor.u32 %v4049_v61, %v4015_v59  ;;  %v12010_v8 = vld [vmem:[%s10881_s10 + $0x48] ss:$16 sps:$4 sm:$0xff]  }
 0x1a9   : > { %v8793_v20 = vpop.f32.mrb[84].mxu1  ;;  %v11971_v53 = vsel %vm684_vm0, %v4011_v6, %v4015_v59  ;;  %13929 = vst [vmem:[#allocation16_spill] sm:$0xff] %v11990_v36  ;;  %v4053_v6 = vshll.u32 %v11981_v52, 16  ;;  %v10488_v59 = vld [vmem:[%s13895_s4 + $0x290] sm:$0xff]   ;;  %v9037_v61 = vpop.f32.mrb[44].mxu0 }
 0x1aa   : > { %v8794_v0 = vpop.f32.mrb[85].mxu1  ;;  %4521 = vmatprep.mubr.bf16.mxu0 %v11971_v53 }
 0x1ab   : > { %v8795_v42 = vadd.f32 %v8794_v0, %v8793_v20  ;;  %v8796_v1 = vpop.f32.mrb[86].mxu1  ;;  %4522 = vmatmul.mubr.bf16.vlgmr.msra.gmra.mrb[128].mxu0 %v11978_v41  ;;  %v10478_v20 = vld [vmem:[%s13895_s4 + $0x288] sm:$0xff]   ;;  %v12004_v0 = vadd.f32 %v9035_v30, %v9034_v40 }
 0x1ac   : > { %v8797_v51 = vpop.f32.mrb[87].mxu1 }
 0x1ad   : > { %v11988_v13 = vadd.f32 %v8795_v42, %v11751_v21  ;;  %v8798_v5 = vadd.f32 %v8797_v51, %v8796_v1  ;;  %13930 = vst [vmem:[#allocation17_spill] sm:$0xff] %v12004_v0  ;;  %v4045_v42 = vshll.u32 %v10585_v11, 16  ;;  %v4055_v1 = vrot.slane %v4053_v6, 1  ;;  %v12026_v6 = vld [vmem:[%s10881_s10 + $0x84] ss:$16 sps:$4 sm:$0xff]  }
 0x1ae   : > { %3209 = vmatmul.mubr.bf16.vlgmr.msra.gmra.mrb[192].mxu1 %v11965_v50  ;;  %v4085_v31 = vshll.u32 %v12026_v6, 16 }
 0x1af   : > { %v11998_v21 = vadd.f32 %v8798_v5, %v11761_v22  ;;  %9324 = vmatpush3.bf16.msra.mxu1 %v10468_v45  ;;  %3216 = vmatprep.mubr.bf16.mxu1 %v11974_v44  ;;  %v4043_v22 = vor.u32 %v4041_v58, %v4003_v57  ;;  %v4047_v45 = vrot.slane %v4045_v42, 1  ;;  %v12013_v5 = vld [vmem:[%s10881_s10 + $0x6c] ss:$16 sps:$4 sm:$0xff]   ;;  %v12016_v40 = vsel %vm684_vm0, %v4051_v55, %v4055_v1  ;;  %v9038_v55 = vpop.f32.mrb[45].mxu0 }
 0x1b0   : > { %9325 = vmatprep.subr.bf16.mxu1 %v10476_v34  ;;  %4529 = vmatprep.mubr.bf16.mxu0 %v12016_v40  ;;  %v10496_v42 = vld [vmem:[%s13895_s4 + $0x2d8] sm:$0xff]   ;;  %v12035_v3 = vadd.f32 %v9038_v55, %v9037_v61  ;;  %v9040_v37 = vpop.f32.mrb[46].mxu0  ;;  %v4087_v61 = vrot.slane %v4085_v31, 1 }
 0x1b1   : > { %v8799_v27 = vpop.f32.mrb[88].mxu1  ;;  %v12023_v57 = vsel %vm684_vm0, %v4043_v22, %v4047_v45  ;;  %v9041_v22 = vpop.f32.mrb[47].mxu0 }
 0x1b2   : > { %v8800_v51 = vpop.f32.mrb[89].mxu1  ;;  %13931 = vst [vmem:[#allocation18_spill] sm:$0xff] %v12035_v3  ;;  %v9043_v31 = vpop.f32.mrb[48].mxu0 }
 0x1b3   : > { %v8801_v34 = vadd.f32 %v8800_v51, %v8799_v27  ;;  %v8802_v30 = vpop.f32.mrb[90].mxu1  ;;  %9326 = vmatpush3.bf16.msra.mxu1 %v10478_v20  ;;  %v10591_v20 = vld [vmem:[%s10881_s10 + $0x80] ss:$16 sps:$4 sm:$0xff]   ;;  %4530 = vmatmul.mubr.bf16.gmra.mrb[132].mxu0 %v12023_v57 }
 0x1b4   : > { %v8803_v58 = vpop.f32.mrb[91].mxu1  ;;  %9327 = vmatprep.subr.bf16.mxu1 %v10486_v14  ;;  %v4081_v14 = vshrl.u32 %v11981_v52, 16  ;;  %v10506_v52 = vld [vmem:[%s13895_s4 + $0x2e0] sm:$0xff]   ;;  %v4105_v3 = vshrl.u32 %v10591_v20, 16 }
 0x1b5   : > { %v12033_v27 = vadd.f32 %v8801_v34, %v11785_v17  ;;  %v8804_v51 = vadd.f32 %v8803_v58, %v8802_v30  ;;  %v10498_v17 = vld [vmem:[%s13895_s4 + $0x298] sm:$0xff]   ;;  %v12048_v34 = vadd.f32 %v9041_v22, %v9040_v37  ;;  %v4077_v30 = vshll.u32 %v10591_v20, 16 }
 0x1b6   : > { %3217 = vmatmul.mubr.bf16.gmra.mrb[196].mxu1 %v12010_v8  ;;  %v4083_v11 = vor.u32 %v4081_v14, %v4055_v1  ;;  %v10508_v1 = vld [vmem:[%s13895_s4 + $0x2a0] sm:$0xff]  }
 0x1b7   : > { %v12042_v18 = vadd.f32 %v8804_v51, %v11795_v60  ;;  %3224 = vmatprep.mubr.bf16.mxu1 %v12013_v5  ;;  %9328 = vmatpush3.bf16.msra.mxu1 %v10488_v59  ;;  %13932 = vst [vmem:[#allocation19_spill] sm:$0xff] %v12048_v34  ;;  %v4075_v60 = vor.u32 %v4073_v28, %v4047_v45  ;;  %v4079_v55 = vrot.slane %v4077_v30, 1  ;;  %v12054_v59 = vld [vmem:[%s10881_s10 + $0x68] ss:$16 sps:$4 sm:$0xff]   ;;  %v12070_v45 = vld [vmem:[%s10881_s10 + $0xa4] ss:$16 sps:$4 sm:$0xff]  }
 0x1b8   : > { %9329 = vmatprep.subr.bf16.mxu1 %v10496_v42  ;;  %v12060_v37 = vsel %vm684_vm0, %v4083_v11, %v4087_v61  ;;  %v10516_v30 = vld [vmem:[%s13895_s4 + $0x2e8] sm:$0xff]   ;;  %v9044_v11 = vpop.f32.mrb[49].mxu0  ;;  %v4117_v34 = vshll.u32 %v12070_v45, 16 }
 0x1b9   : > { %v8805_v58 = vpop.f32.mrb[92].mxu1  ;;  %4537 = vmatprep.mubr.bf16.mxu0 %v12060_v37  ;;  %v12067_v28 = vsel %vm684_vm0, %v4075_v60, %v4079_v55  ;;  %v12079_v35 = vadd.f32 %v9044_v11, %v9043_v31  ;;  %v9046_v9 = vpop.f32.mrb[50].mxu0 }
 0x1ba   : > { %v8806_v51 = vpop.f32.mrb[93].mxu1  ;;  %v9047_v60 = vpop.f32.mrb[51].mxu0  ;;  %v4119_v31 = vrot.slane %v4117_v34, 1 }
 0x1bb   : > { %v8807_v42 = vadd.f32 %v8806_v51, %v8805_v58  ;;  %v8808_v22 = vpop.f32.mrb[94].mxu1  ;;  %9330 = vmatpush3.bf16.msra.mxu1 %v10498_v17  ;;  %v10597_v17 = vld [vmem:[%s10881_s10 + $0xa0] ss:$16 sps:$4 sm:$0xff]   ;;  %13933 = vst [vmem:[#allocation20_spill] sm:$0xff] %v12079_v35  ;;  %4538 = vmatmul.mubr.bf16.gmra.mrb[136].mxu0 %v12067_v28  ;;  %v12101_v35 = vld [vmem:[%s10881_s10 + $0xac] ss:$16 sps:$4 sm:$0xff]  }
 0x1bc   : > { %v8809_v14 = vpop.f32.mrb[95].mxu1  ;;  %9331 = vmatprep.subr.bf16.mxu1 %v10506_v52  ;;  %v4113_v52 = vshrl.u32 %v12026_v6, 16  ;;  %v10526_v6 = vld [vmem:[%s13895_s4 + $0x2f0] sm:$0xff]   ;;  %v9049_v34 = vpop.f32.mrb[52].mxu0  ;;  %v4137_v36 = vshrl.u32 %v10597_v17, 16 }
 0x1bd   : > { %v12077_v58 = vadd.f32 %v8807_v42, %v11817_v4  ;;  %v8810_v51 = vadd.f32 %v8809_v14, %v8808_v22  ;;  %v10518_v4 = vld [vmem:[%s13895_s4 + $0x2a8] sm:$0xff]   ;;  %v12092_v42 = vadd.f32 %v9047_v60, %v9046_v9  ;;  %v4109_v22 = vshll.u32 %v10597_v17, 16 }
 0x1be   : > { %3225 = vmatmul.mubr.bf16.gmra.mrb[200].mxu1 %v12054_v59  ;;  %v4115_v20 = vor.u32 %v4113_v52, %v4087_v61  ;;  %v10528_v61 = vld [vmem:[%s13895_s4 + $0x2b0] sm:$0xff]  }
 0x1bf   : > { %v12086_v26 = vadd.f32 %v8810_v51, %v11827_v16  ;;  %3232 = vmatprep.mubr.bf16.mxu1 %v12057_v10  ;;  %9332 = vmatpush3.bf16.msra.mxu1 %v10508_v1  ;;  %13934 = vst [vmem:[#allocation21_spill] sm:$0xff] %v12092_v42  ;;  %v4107_v16 = vor.u32 %v4105_v3, %v4079_v55  ;;  %v4111_v11 = vrot.slane %v4109_v22, 1  ;;  %v12098_v1 = vld [vmem:[%s10881_s10 + $0x88] ss:$16 sps:$4 sm:$0xff]   ;;  %v12114_v55 = vld [vmem:[%s10881_s10 + $0xc4] ss:$16 sps:$4 sm:$0xff]  }
 0x1c0   : > { %9333 = vmatprep.subr.bf16.mxu1 %v10516_v30  ;;  %v12104_v9 = vsel %vm684_vm0, %v4115_v20, %v4119_v31  ;;  %v10536_v22 = vld [vmem:[%s13895_s4 + $0x2f8] sm:$0xff]   ;;  %v9050_v20 = vpop.f32.mrb[53].mxu0  ;;  %v4149_v0 = vshll.u32 %v12114_v55, 16 }
 0x1c1   : > { %v8827_v14 = vpop.f32.mrb[96].mxu1  ;;  %4545 = vmatprep.mubr.bf16.mxu0 %v12104_v9  ;;  %v12111_v3 = vsel %vm684_vm0, %v4107_v16, %v4111_v11  ;;  %v12123_v42 = vadd.f32 %v9050_v20, %v9049_v34  ;;  %v9052_v25 = vpop.f32.mrb[54].mxu0  ;;  %v4139_v34 = vor.u32 %v4137_v36, %v4111_v11  ;;  %v12155_v36 = vld [vmem:[%s10881_s10 + $0xe4] ss:$16 sps:$4 sm:$0xff]  }
 0x1c2   : > { %v8828_v51 = vpop.f32.mrb[97].mxu1  ;;  %v9053_v16 = vpop.f32.mrb[55].mxu0  ;;  %v4209_v56 = vshrl.u32 %v12155_v36, 16 }
 0x1c3   : > { %v8829_v30 = vadd.f32 %v8828_v51, %v8827_v14  ;;  %v8830_v60 = vpop.f32.mrb[98].mxu1  ;;  %9334 = vmatpush3.bf16.msra.mxu1 %v10518_v4  ;;  %v10603_v4 = vld [vmem:[%s10881_s10 + $0xc0] ss:$16 sps:$4 sm:$0xff]   ;;  %13936 = vst [vmem:[#allocation23_spill] sm:$0xff] %v12123_v42  ;;  %4546 = vmatmul.mubr.bf16.gmra.mrb[140].mxu0 %v12111_v3 }
 0x1c4   : > { %v8831_v52 = vpop.f32.mrb[99].mxu1  ;;  %9335 = vmatprep.subr.bf16.mxu1 %v10526_v6  ;;  %v4145_v6 = vshrl.u32 %v12070_v45, 16  ;;  %v10540_v45 = vld [vmem:[%s13893_s2 + $0x3c0] sm:$0xff]  }
 0x1c5   : > { %v12121_v14 = vadd.f32 %v8829_v30, %v11849_v23  ;;  %v8832_v51 = vadd.f32 %v8831_v52, %v8830_v60  ;;  %v10538_v23 = vld [vmem:[%s13895_s4 + $0x2b8] sm:$0xff]   ;;  %v12136_v30 = vadd.f32 %v9053_v16, %v9052_v25  ;;  %v4141_v60 = vshll.u32 %v10603_v4, 16 }
 0x1c6   : > { %3233 = vmatmul.mubr.bf16.gmra.mrb[204].mxu1 %v12098_v1  ;;  %v4147_v17 = vor.u32 %v4145_v6, %v4119_v31  ;;  %v10607_v6 = vld [vmem:[%s13895_s4 + $0x340] sm:$0xff]  }
 0x1c7   : > { %13935 = vst [vmem:[#allocation22_spill] sm:$0xff] %v12121_v14  ;;  %v12130_v47 = vadd.f32 %v8832_v51, %v11859_v7  ;;  %3240 = vmatprep.mubr.bf16.mxu1 %v12101_v35  ;;  %9336 = vmatpush3.bf16.msra.mxu1 %v10528_v61  ;;  %13938 = vst [vmem:[#allocation25_spill] sm:$0xff] %v12136_v30  ;;  %v4151_v7 = vrot.slane %v4149_v0, 1  ;;  %v4143_v20 = vrot.slane %v4141_v60, 1  ;;  %v12142_v51 = vld [vmem:[%s10881_s10 + $0xa8] ss:$16 sps:$4 sm:$0xff]  }
 0x1c8   : > { %9337 = vmatprep.subr.bf16.mxu1 %v10536_v22  ;;  %v12148_v22 = vld [vmem:[%s10881_s10 + $0xcc] ss:$16 sps:$4 sm:$0xff]   ;;  %v9055_v14 = vpop.f32.mrb[56].mxu0  ;;  %v10617_v60 = vld [vmem:[%s10881_s10 + $0xe0] ss:$16 sps:$4 sm:$0xff]   ;;  %9515 = vmatprep.subr.bf16.mxu0 %v10607_v6  ;;  %v4177_v30 = vshrl.u32 %v12114_v55, 16 }
 0x1c9   : > { %13937 = vst [vmem:[#allocation24_spill] sm:$0xff] %v12130_v47  ;;  %v8833_v52 = vpop.f32.mrb[100].mxu1  ;;  %v12145_v47 = vsel %vm684_vm0, %v4147_v17, %v4151_v7  ;;  %v12152_v0 = vsel %vm684_vm0, %v4139_v34, %v4143_v20  ;;  %v9056_v11 = vpop.f32.mrb[57].mxu0  ;;  %v10609_v34 = vld [vmem:[%s13895_s4 + $0x300] sm:$0xff]  }
 0x1ca   : > { %v8834_v61 = vpop.f32.mrb[101].mxu1  ;;  %4553 = vmatprep.mubr.bf16.mxu0 %v12145_v47  ;;  %9516 = vmatpush3.bf16.msra.mxu0 %v10609_v34  ;;  %v4179_v6 = vor.u32 %v4177_v30, %v4151_v7  ;;  %v12192_v30 = vld [vmem:[%s10881_s10 + $0xec] ss:$16 sps:$4 sm:$0xff]  }
 0x1cb   : > { %v8835_v25 = vadd.f32 %v8834_v61, %v8833_v52  ;;  %v8836_v16 = vpop.f32.mrb[102].mxu1  ;;  %9338 = vmatpush3.bf16.msra.mxu1 %v10538_v23  ;;  %v12164_v52 = vadd.f32 %v9056_v11, %v9055_v14  ;;  %v9058_v61 = vpop.f32.mrb[58].mxu0  ;;  %4554 = vmatmul.mubr.bf16.gmra.mrb[144].mxu0 %v12152_v0  ;;  %v10611_v11 = vld [vmem:[%s13895_s4 + $0x348] sm:$0xff]  }
 0x1cc   : > { %v8837_v31 = vpop.f32.mrb[103].mxu1  ;;  %9451 = vmatprep.subr.bf16.mxu1 %v10540_v45  ;;  %v9059_v45 = vpop.f32.mrb[59].mxu0  ;;  %9517 = vmatprep.subr.bf16.mxu0 %v10611_v11  ;;  %v10621_v11 = vld [vmem:[%s13895_s4 + $0x350] sm:$0xff]  }
 0x1cd   : > { %v12162_v17 = vadd.f32 %v8835_v25, %v11873_v24  ;;  %v8838_v23 = vadd.f32 %v8837_v31, %v8836_v16  ;;  %13940 = vst [vmem:[#allocation27_spill] sm:$0xff] %v12164_v52  ;;  %v4181_v24 = vshll.u32 %v12155_v36, 16  ;;  %v4169_v25 = vshrl.u32 %v10603_v4, 16  ;;  %v9061_v7 = vpop.f32.mrb[60].mxu0 }
 0x1ce   : > { %3241 = vmatmul.mubr.bf16.gmra.mrb[208].mxu1 %v12142_v51  ;;  %v12177_v16 = vadd.f32 %v9059_v45, %v9058_v61  ;;  %v4173_v31 = vshll.u32 %v10617_v60, 16  ;;  %v12186_v61 = vld [vmem:[%s10881_s10 + $0xc8] ss:$16 sps:$4 sm:$0xff]  }
 0x1cf   : > { %13939 = vst [vmem:[#allocation26_spill] sm:$0xff] %v12162_v17  ;;  %v12174_v14 = vadd.f32 %v8838_v23, %v11882_v46  ;;  %3248 = vmatprep.mubr.bf16.mxu1 %v12148_v22  ;;  %v4183_v55 = vrot.slane %v4181_v24, 1  ;;  %v4171_v17 = vor.u32 %v4169_v25, %v4143_v20  ;;  %v10615_v46 = vld [vmem:[%s13895_s4 + $0x308] sm:$0xff]   ;;  %v10627_v24 = vld [vmem:[%s10881_s10 + $0x104] ss:$16 sps:$4 sm:$0xff]  }
 0x1d0   : > { %13942 = vst [vmem:[#allocation29_spill] sm:$0xff] %v12177_v16  ;;  %v4175_v4 = vrot.slane %v4173_v31, 1  ;;  %9518 = vmatpush3.bf16.msra.mxu0 %v10615_v46  ;;  %v9062_v31 = vpop.f32.mrb[61].mxu0  ;;  %v4213_v49 = vshll.u32 %v10627_v24, 16 }
 0x1d1   : > { %13941 = vst [vmem:[#allocation28_spill] sm:$0xff] %v12174_v14  ;;  %v8839_v52 = vpop.f32.mrb[104].mxu1  ;;  %v12189_v34 = vsel %vm684_vm0, %v4179_v6, %v4183_v55  ;;  %v10631_v6 = vld [vmem:[%s10881_s10 + $0x100] ss:$16 sps:$4 sm:$0xff]   ;;  %v12206_v16 = vadd.f32 %v9062_v31, %v9061_v7  ;;  %v9064_v42 = vpop.f32.mrb[62].mxu0  ;;  %9519 = vmatprep.subr.bf16.mxu0 %v10621_v11  ;;  %v4211_v31 = vor.u32 %v4209_v56, %v4183_v55 }
 0x1d2   : > { %v8840_v23 = vpop.f32.mrb[105].mxu1  ;;  %4561 = vmatprep.mubr.bf16.mxu0 %v12189_v34  ;;  %v12196_v20 = vsel %vm684_vm0, %v4171_v17, %v4175_v4  ;;  %v10623_v17 = vld [vmem:[%s13895_s4 + $0x310] sm:$0xff]   ;;  %v9065_v46 = vpop.f32.mrb[63].mxu0  ;;  %v4205_v7 = vshll.u32 %v10631_v6, 16  ;;  %v4215_v36 = vrot.slane %v4213_v49, 1  ;;  %v10635_v55 = vld [vmem:[%s13895_s4 + $0x360] sm:$0xff]  }
 0x1d3   : > { %v8841_v45 = vadd.f32 %v8840_v23, %v8839_v52  ;;  %v8842_v14 = vpop.f32.mrb[106].mxu1  ;;  %13944 = vst [vmem:[#allocation31_spill] sm:$0xff] %v12206_v16  ;;  %4562 = vmatmul.mubr.bf16.gmra.mrb[148].mxu0 %v12196_v20  ;;  %v12234_v16 = vld [vmem:[%s10881_s10 + $0x10c] ss:$16 sps:$4 sm:$0xff]  }
 0x1d4   : > { %v8843_v25 = vpop.f32.mrb[107].mxu1  ;;  %9520 = vmatpush3.bf16.msra.mxu0 %v10623_v17  ;;  %v3788_v17 = vld [vmem:[%s10881_s10 + $0x120] sm:$0x11] }
 0x1d5   : > { %v12204_v52 = vadd.f32 %v8841_v45, %v11893_v43  ;;  %v8844_v23 = vadd.f32 %v8843_v25, %v8842_v14  ;;  %v4201_v43 = vshrl.u32 %v10617_v60, 16  ;;  %v12218_v45 = vadd.f32 %v9065_v46, %v9064_v42  ;;  %v10625_v25 = vld [vmem:[%s13895_s4 + $0x358] sm:$0xff]  }
 0x1d6   : > { %3249 = vmatmul.mubr.bf16.gmra.mrb[212].mxu1 %v12186_v61  ;;  %v4207_v60 = vrot.slane %v4205_v7, 1  ;;  %9521 = vmatprep.subr.bf16.mxu0 %v10625_v25  ;;  %v12230_v42 = vsel %vm684_vm0, %v4211_v31, %v4215_v36  ;;  %v10637_v25 = vld [vmem:[%s13895_s4 + $0x320] sm:$0xff]   ;;  %v4241_v31 = vshrl.u32 %v10627_v24, 16  ;;  %v10642_v24 = vld [vmem:[%s13895_s4 + $0x328] sm:$0xff]  }
 0x1d7   : > { %13943 = vst [vmem:[#allocation30_spill] sm:$0xff] %v12204_v52  ;;  %v12215_v14 = vadd.f32 %v8844_v23, %v11901_v12  ;;  %3256 = vmatprep.mubr.bf16.mxu1 %v12192_v30  ;;  %13946 = vst [vmem:[#allocation33_spill] sm:$0xff] %v12218_v45  ;;  %v4203_v11 = vor.u32 %v4201_v43, %v4175_v4  ;;  %v10629_v12 = vld [vmem:[%s13895_s4 + $0x318] sm:$0xff]   ;;  %4569 = vmatprep.mubr.bf16.mxu0 %v12230_v42 }
 0x1d8   : > { %9522 = vmatpush3.bf16.msra.mxu0 %v10629_v12  ;;  %v8282_v4 = vcombine.high %v3788_v17, %v3788_v17  ;;  %v8281_v43 = vcombine.low %v3788_v17, %v3788_v17  ;;  %v4233_v12 = vshrl.u32 %v10631_v6, 16 }
 0x1d9   : > { %13945 = vst [vmem:[#allocation32_spill] sm:$0xff] %v12215_v14  ;;  %v8845_v52 = vpop.f32.mrb[108].mxu1  ;;  %v12227_v14 = vld [vmem:[%s10881_s10 + $0xe8] ss:$16 sps:$4 sm:$0xff]   ;;  %v12238_v56 = vsel %vm684_vm0, %v4203_v11, %v4207_v60  ;;  %9523 = vmatprep.subr.bf16.mxu0 %v10635_v55 }
 0x1da   : > { %v8846_v23 = vpop.f32.mrb[109].mxu1  ;;  %v4245_v11 = vshll.u32 %v8282_v4, 16  ;;  %v12262_v4 = vld [vmem:[%s10881_s10 + $0x108] ss:$16 sps:$4 sm:$0xff]  }
 0x1db   : > { %v8847_v46 = vadd.f32 %v8846_v23, %v8845_v52  ;;  %v8848_v45 = vpop.f32.mrb[110].mxu1  ;;  %4570 = vmatmul.mubr.bf16.gmra.mrb[152].mxu0 %v12238_v56  ;;  %v4237_v23 = vshll.u32 %v8281_v43, 16 }
 0x1dc   : > { %v8849_v49 = vpop.f32.mrb[111].mxu1  ;;  %9524 = vmatpush3.bf16.msra.mxu0 %v10637_v25  ;;  %v10647_v25 = vld [vmem:[%s13895_s4 + $0x370] sm:$0xff]  }
 0x1dd   : > { %v12244_v7 = vadd.f32 %v8847_v46, %v11913_v38  ;;  %v8850_v52 = vadd.f32 %v8849_v49, %v8848_v45  ;;  %v10639_v38 = vld [vmem:[%s13895_s4 + $0x368] sm:$0xff]   ;;  %v4243_v45 = vor.u32 %v4241_v31, %v4215_v36  ;;  %v4247_v46 = vrot.slane %v4245_v11, 1 }
 0x1de   : > { %3257 = vmatmul.mubr.bf16.gmra.mrb[216].mxu1 %v12227_v14  ;;  %v4235_v49 = vor.u32 %v4233_v12, %v4207_v60  ;;  %9525 = vmatprep.subr.bf16.mxu0 %v10639_v38  ;;  %v10653_v38 = vld [vmem:[%s13895_s4 + $0x338] sm:$0xff]  }
 0x1df   : > { %13947 = vst [vmem:[#allocation34_spill] sm:$0xff] %v12244_v7  ;;  %v12252_v17 = vadd.f32 %v8850_v52, %v11921_v2  ;;  %3264 = vmatprep.mubr.bf16.mxu1 %v12234_v16  ;;  %v4239_v7 = vrot.slane %v4237_v23, 1  ;;  %v12265_v2 = vsel %vm684_vm0, %v4243_v45, %v4247_v46 }
 0x1e0   : > { %4577 = vmatprep.mubr.bf16.mxu0 %v12265_v2  ;;  %9526 = vmatpush3.bf16.msra.mxu0 %v10642_v24 }
 0x1e1   : > { %v8851_v55 = vpop.f32.mrb[112].mxu1  ;;  %v12268_v43 = vsel %vm684_vm0, %v4235_v49, %v4239_v7  ;;  %v10649_v7 = vld [vmem:[%s13895_s4 + $0x330] sm:$0xff]   ;;  %9527 = vmatprep.subr.bf16.mxu0 %v10647_v25  ;;  %v10552_v25 = vld [vmem:[%s13893_s2 + $0x3d8] sm:$0xff]  }
 0x1e2   : > { %v8852_v6 = vpop.f32.mrb[113].mxu1 }
 0x1e3   : > { %v8853_v52 = vadd.f32 %v8852_v6, %v8851_v55  ;;  %v8854_v36 = vpop.f32.mrb[114].mxu1  ;;  %4578 = vmatmul.mubr.bf16.gmra.mrb[156].mxu0 %v12268_v43  ;;  %v10544_v55 = vld [vmem:[%s13893_s2 + $0x3c8] sm:$0xff]  }
 0x1e4   : > { %v8855_v60 = vpop.f32.mrb[115].mxu1  ;;  %9528 = vmatpush3.bf16.msra.mxu0 %v10649_v7  ;;  %4988 = vmatprep.mubr.bf16.mxu0 %v11971_v53 }
 0x1e5   : > { %v12275_v31 = vadd.f32 %v8853_v52, %v11944_v63  ;;  %v8856_v11 = vadd.f32 %v8855_v60, %v8854_v36  ;;  %v10651_v63 = vld [vmem:[%s13895_s4 + $0x378] sm:$0xff]   ;;  %v10546_v52 = vld [vmem:[%s13893_s2 + $0x388] sm:$0xff]  }
 0x1e6   : > { %3265 = vmatmul.mubr.bf16.gmra.mrb[220].mxu1 %v12262_v4  ;;  %9529 = vmatprep.subr.bf16.mxu0 %v10651_v63  ;;  %v10554_v63 = vld [vmem:[%s13893_s2 + $0x398] sm:$0xff]  }
 0x1e7   : > { %v12283_v12 = vadd.f32 %v8856_v11, %v11958_v29  ;;  %3675 = vmatprep.mubr.bf16.mxu1 %v11935_v19  ;;  %v10542_v19 = vld [vmem:[%s13893_s2 + $0x380] sm:$0xff]  }
 0x1e8   : > { %9530 = vmatpush3.bf16.msra.mxu0 %v10653_v38 }
 0x1e9   : > { %v8857_v23 = vpop.f32.mrb[116].mxu1 }
 0x1ea   : > { %v8858_v45 = vpop.f32.mrb[117].mxu1 }
 0x1eb   : > { %v8859_v46 = vadd.f32 %v8858_v45, %v8857_v23  ;;  %v8860_v49 = vpop.f32.mrb[118].mxu1  ;;  %4989 = vmatmul.mubr.bf16.vlgmr.msra.gmra.mrb[160].mxu0 %v11978_v41  ;;  %v10560_v45 = vld [vmem:[%s13893_s2 + $0x3e8] sm:$0xff]  }
 0x1ec   : > { %v8861_v29 = vpop.f32.mrb[119].mxu1  ;;  %4996 = vmatprep.mubr.bf16.mxu0 %v12016_v40 }
 0x1ed   : > { %v12300_v53 = vadd.f32 %v8859_v46, %v11988_v13  ;;  %v8862_v24 = vadd.f32 %v8861_v29, %v8860_v49  ;;  %v10548_v13 = vld [vmem:[%s13893_s2 + $0x3d0] sm:$0xff]   ;;  %v10562_v29 = vld [vmem:[%s13893_s2 + $0x3a8] sm:$0xff]  }
 0x1ee   : > { %3676 = vmatmul.mubr.bf16.vlgmr.msra.gmra.mrb[224].mxu1 %v11965_v50 }
 0x1ef   : > { %13948 = vst [vmem:[#allocation35_spill] sm:$0xff] %v12300_v53  ;;  %v12305_v6 = vadd.f32 %v8862_v24, %v11998_v21  ;;  %9452 = vmatpush3.bf16.msra.mxu1 %v10542_v19  ;;  %3683 = vmatprep.mubr.bf16.mxu1 %v11974_v44  ;;  %v10550_v44 = vld [vmem:[%s13893_s2 + $0x390] sm:$0xff]  }
 0x1f0   : > { %9453 = vmatprep.subr.bf16.mxu1 %v10544_v55 }
 0x1f1   : > { %13949 = vst [vmem:[#allocation36_spill] sm:$0xff] %v12305_v6  ;;  %v8863_v50 = vpop.f32.mrb[120].mxu1 }
 0x1f2   : > { %v8864_v36 = vpop.f32.mrb[121].mxu1 }
 0x1f3   : > { %v8865_v41 = vadd.f32 %v8864_v36, %v8863_v50  ;;  %v8866_v60 = vpop.f32.mrb[122].mxu1  ;;  %9454 = vmatpush3.bf16.msra.mxu1 %v10546_v52  ;;  %4997 = vmatmul.mubr.bf16.gmra.mrb[164].mxu0 %v12023_v57  ;;  %v10566_v36 = vld [vmem:[%s13893_s2 + $0x3b0] sm:$0xff]  }
 0x1f4   : > { %v8867_v21 = vpop.f32.mrb[123].mxu1  ;;  %9455 = vmatprep.subr.bf16.mxu1 %v10548_v13  ;;  %5004 = vmatprep.mubr.bf16.mxu0 %v12060_v37  ;;  %v9147_v37 = vpop.f32.mrb[64].mxu0 }
 0x1f5   : > { %v12322_v11 = vadd.f32 %v8865_v41, %v12033_v27  ;;  %v8868_v7 = vadd.f32 %v8867_v21, %v8866_v60  ;;  %v10556_v27 = vld [vmem:[%s13893_s2 + $0x3e0] sm:$0xff]   ;;  %v9148_v55 = vpop.f32.mrb[65].mxu0  ;;  %v10568_v60 = vld [vmem:[%s13893_s2 + $0x3f8] sm:$0xff]  }
 0x1f6   : > { %3684 = vmatmul.mubr.bf16.gmra.mrb[228].mxu1 %v12010_v8 }
 0x1f7   : > { %13950 = vst [vmem:[#allocation37_spill] sm:$0xff] %v12322_v11  ;;  %v12327_v40 = vadd.f32 %v8868_v7, %v12042_v18  ;;  %3691 = vmatprep.mubr.bf16.mxu1 %v12013_v5  ;;  %9456 = vmatpush3.bf16.msra.mxu1 %v10550_v44  ;;  %v10558_v18 = vld [vmem:[%s13893_s2 + $0x3a0] sm:$0xff]   ;;  %v12640_v11 = vld [vmem:[%s10881_s10 + $0xec] ss:$16 sps:$4 sm:$0xff]  }
 0x1f8   : > { %9457 = vmatprep.subr.bf16.mxu1 %v10552_v25 }
 0x1f9   : > { %13951 = vst [vmem:[#allocation38_spill] sm:$0xff] %v12327_v40  ;;  %v8869_v8 = vpop.f32.mrb[124].mxu1 }
 0x1fa   : > { %v8870_v23 = vpop.f32.mrb[125].mxu1 }
 0x1fb   : > { %v8871_v57 = vadd.f32 %v8870_v23, %v8869_v8  ;;  %v8872_v38 = vpop.f32.mrb[126].mxu1  ;;  %9458 = vmatpush3.bf16.msra.mxu1 %v10554_v63  ;;  %5005 = vmatmul.mubr.bf16.gmra.mrb[168].mxu0 %v12067_v28  ;;  %v9150_v28 = vpop.f32.mrb[66].mxu0  ;;  %v10570_v63 = vld [vmem:[%s13893_s2 + $0x3b8] sm:$0xff]   ;;  %v10791_v23 = vmov 0  }
 0x1fc   : > { %v8873_v5 = vpop.f32.mrb[127].mxu1  ;;  %9459 = vmatprep.subr.bf16.mxu1 %v10556_v27  ;;  %5012 = vmatprep.mubr.bf16.mxu0 %v12104_v9  ;;  %v9151_v24 = vpop.f32.mrb[67].mxu0  ;;  %307 = vst [vmem:[#allocation2] sm:$0xff] %v10791_v23  ;;  %308 = vst [vmem:[#allocation2 + $0x8] sm:$0xff] %v10791_v23 }
 0x1fd   : > { %v12344_v46 = vadd.f32 %v8871_v57, %v12077_v58  ;;  %v8874_v49 = vadd.f32 %v8873_v5, %v8872_v38  ;;  %v10564_v58 = vld [vmem:[%s13893_s2 + $0x3f0] sm:$0xff]   ;;  %v9153_v21 = vpop.f32.mrb[68].mxu0  ;;  %10245 = vset.pattern.permute.xlu0 %v10791_v23  ;;  %316 = vst [vmem:[#allocation2 + $0x48] sm:$0xff] %v10791_v23  ;;  %317 = vst [vmem:[#allocation2 + $0x50] sm:$0xff] %v10791_v23  ;;  %10246 = vset.pattern.permute.xlu1 %v10791_v23 }
 0x1fe   : > { %3692 = vmatmul.mubr.bf16.gmra.mrb[232].mxu1 %v12054_v59  ;;  %v12358_v59 = vadd.f32 %v9148_v55, %v9147_v37  ;;  %v9154_v27 = vpop.f32.mrb[69].mxu0 }
 0x1ff   : > { %13952 = vst [vmem:[#allocation39_spill] sm:$0xff] %v12344_v46  ;;  %v12349_v19 = vadd.f32 %v8874_v49, %v12086_v26  ;;  %3699 = vmatprep.mubr.bf16.mxu1 %v12057_v10  ;;  %9460 = vmatpush3.bf16.msra.mxu1 %v10558_v18  ;;  %v12361_v10 = vadd.f32 %v9151_v24, %v9150_v28  ;;  %v5206_v49 = vld [vmem:[%s13892_s1 + $0x8] sm:$0xff] }
 0x200   : > { %9461 = vmatprep.subr.bf16.mxu1 %v10560_v45 }
 0x201   : > { %13953 = vst [vmem:[#allocation40_spill] sm:$0xff] %v12349_v19  ;;  %v8955_v26 = vpop.f32.mrb[128].mxu1  ;;  %v12598_v19 = vld [vmem:[%s10881_s10 + $0xcc] ss:$16 sps:$4 sm:$0xff]  }
 0x202   : > { %v8956_v52 = vpop.f32.mrb[129].mxu1 }
 0x203   : > { %v8957_v13 = vadd.f32 %v8956_v52, %v8955_v26  ;;  %v8958_v50 = vpop.f32.mrb[130].mxu1  ;;  %9462 = vmatpush3.bf16.msra.mxu1 %v10562_v29  ;;  %5013 = vmatmul.mubr.bf16.gmra.mrb[172].mxu0 %v12111_v3  ;;  %v12387_v3 = vadd.f32 %v9154_v27, %v9153_v21  ;;  %v5207_v29 = vld [vmem:[%s13892_s1 + $0x10] sm:$0xff]  ;;  %v5210_v21 = vld [vmem:[%s13892_s1 + $0x28] sm:$0xff] }
 0x204   : > { %v8959_v41 = vpop.f32.mrb[131].mxu1  ;;  %9463 = vmatprep.subr.bf16.mxu1 %v10564_v58  ;;  %5020 = vmatprep.mubr.bf16.mxu0 %v12145_v47  ;;  %v5205_v47 = vld [vmem:[%s13892_s1] sm:$0xff] }
 0x205   : > { %v2182_v9 = vadd.f32 %v8957_v13, %v11736_v32  ;;  %v8960_v44 = vadd.f32 %v8959_v41, %v8958_v50  ;;  %v10608_v32 = vld [vmem:[%s13895_s4 + $0x3c0] sm:$0xff]   ;;  %5223 = vperm.xlu0 %10245, %v5205_v47   ;;  %5233 = vperm.xlu1 %10246, %v5207_v29   ;;  %v10579_v41 = vld [vmem:[%s10881_s10 + $0x2c] ss:$16 sps:$4 sm:$0xff]  }
 0x206   : > { %3700 = vmatmul.mubr.bf16.gmra.mrb[236].mxu1 %v12098_v1  ;;  %v9156_v1 = vpop.f32.mrb[70].mxu0 }
 0x207   : > { %v2185_v25 = vadd.f32 %v8960_v44, %v11738_v33  ;;  %v12374_v7 = vadd.f32 %v11915_v54, %v2182_v9  ;;  %3707 = vmatprep.mubr.bf16.mxu1 %v12101_v35  ;;  %9464 = vmatpush3.bf16.msra.mxu1 %v10566_v36  ;;  %v9157_v35 = vpop.f32.mrb[71].mxu0 }
 0x208   : > { %9465 = vmatprep.subr.bf16.mxu1 %v10568_v60  ;;  %v12389_v57 = vadd.f32 %v9157_v35, %v9156_v1  ;;  %v9159_v37 = vpop.f32.mrb[72].mxu0 }
 0x209   : > { %v12385_v33 = vadd.f32 %v11924_v15, %v2185_v25  ;;  %v8961_v54 = vpop.f32.mrb[132].mxu1  ;;  %5228 = vperm.xlu0 %10245, %v5206_v49   ;;  %v5209_v25 = vld [vmem:[%s13892_s1 + $0x20] sm:$0xff] }
 0x20a   : > { %v8962_v8 = vpop.f32.mrb[133].mxu1 }
 0x20b   : > { %v8963_v15 = vadd.f32 %v8962_v8, %v8961_v54  ;;  %v8964_v38 = vpop.f32.mrb[134].mxu1  ;;  %9466 = vmatpush3.bf16.msra.mxu1 %v10570_v63  ;;  %5021 = vmatmul.mubr.bf16.gmra.mrb[176].mxu0 %v12152_v0  ;;  %v13954_v0 = vld [vmem:[#allocation15_spill] sm:$0xff]  ;;  %v13956_v63 = vld [vmem:[#allocation4_spill] sm:$0xff]  ;;  %v4032_v54 = vshll.u32 %v10579_v41, 16  ;;  %v13958_v8 = vld [vmem:[#allocation17_spill] sm:$0xff] }
 0x20c   : > { %v8965_v18 = vpop.f32.mrb[135].mxu1  ;;  %9579 = vmatprep.subr.bf16.mxu1 %v10608_v32  ;;  %5028 = vmatprep.mubr.bf16.mxu0 %v12189_v34  ;;  %v13955_v34 = vld [vmem:[#allocation3_spill] sm:$0xff]  ;;  %v13957_v32 = vld [vmem:[#allocation16_spill] sm:$0xff] }
 0x20d   : > { %v2190_v5 = vadd.f32 %v8963_v15, %v11743_v62  ;;  %v8966_v45 = vadd.f32 %v8965_v18, %v8964_v38  ;;  %v9160_v62 = vpop.f32.mrb[73].mxu0  ;;  %5243 = vperm.xlu0 %10245, %v5209_v25  }
 0x20e   : > { %3708 = vmatmul.mubr.bf16.gmra.mrb[240].mxu1 %v12142_v51  ;;  %v9162_v51 = vpop.f32.mrb[74].mxu0  ;;  %v12412_v24 = vadd.f32 %v9160_v62, %v9159_v37  ;;  %v10577_v37 = vld [vmem:[%s10881_s10 + $0x28] ss:$16 sps:$4 sm:$0xff]   ;;  %v4034_v62 = vrot.slane %v4032_v54, 1 }
 0x20f   : > { %v2193_v55 = vadd.f32 %v8966_v45, %v11753_v39  ;;  %v12405_v58 = vadd.f32 %v11946_v48, %v2190_v5  ;;  %3715 = vmatprep.mubr.bf16.mxu1 %v12148_v22  ;;  %v9163_v52 = vpop.f32.mrb[75].mxu0  ;;  %v5208_v48 = vld [vmem:[%s13892_s1 + $0x18] sm:$0xff]  ;;  %v5211_v45 = vld [vmem:[%s13892_s1 + $0x30] sm:$0xff] }
 0x210   : > { %v12414_v13 = vadd.f32 %v9163_v52, %v9162_v51  ;;  %5238 = vperm.xlu1 %10246, %v5208_v48   ;;  %v9165_v44 = vpop.f32.mrb[76].mxu0  ;;  %v5214_v48 = vld [vmem:[%s13892_s1 + $0x48] sm:$0xff] }
 0x211   : > { %v12410_v28 = vadd.f32 %v13954_v0, %v2193_v55  ;;  %v8967_v26 = vpop.f32.mrb[136].mxu1  ;;  %5253 = vperm.xlu0 %10245, %v5211_v45   ;;  %v4030_v55 = vshrl.u32 %v10579_v41, 16  ;;  %v13959_v0 = vld [vmem:[#allocation5_spill] sm:$0xff]  ;;  %v13961_v41 = vld [vmem:[#allocation18_spill] sm:$0xff] }
 0x212   : > { %v8968_v39 = vpop.f32.mrb[137].mxu1 }
 0x213   : > { %v8969_v22 = vadd.f32 %v8968_v39, %v8967_v26  ;;  %v8970_v50 = vpop.f32.mrb[138].mxu1  ;;  %5029 = vmatmul.mubr.bf16.gmra.mrb[180].mxu0 %v12196_v20  ;;  %v12435_v20 = vld [vmem:[%s10881_s10 + $0x4c] ss:$16 sps:$4 sm:$0xff]  }
 0x214   : > { %v8971_v36 = vpop.f32.mrb[139].mxu1  ;;  %5248 = vperm.xlu1 %10246, %v5210_v21   ;;  %5036 = vmatprep.mubr.bf16.mxu0 %v12230_v42  ;;  %v4037_v51 = vshll.u32 %v12435_v20, 16  ;;  %v12471_v21 = vld [vmem:[%s10881_s10 + $0x6c] ss:$16 sps:$4 sm:$0xff]  }
 0x215   : > { %v2198_v60 = vadd.f32 %v8969_v22, %v13955_v34  ;;  %v8972_v9 = vadd.f32 %v8971_v36, %v8970_v50  ;;  %v5213_v22 = vld [vmem:[%s13892_s1 + $0x40] sm:$0xff]  ;;  %v13960_v50 = vld [vmem:[#allocation6_spill] sm:$0xff] }
 0x216   : > { %3716 = vmatmul.mubr.bf16.gmra.mrb[244].mxu1 %v12186_v61  ;;  %v9166_v61 = vpop.f32.mrb[77].mxu0  ;;  %5263 = vperm.xlu0 %10245, %v5213_v22  }
 0x217   : > { %v2201_v27 = vadd.f32 %v8972_v9, %v13956_v63  ;;  %v12431_v1 = vadd.f32 %v13957_v32, %v2198_v60  ;;  %3723 = vmatprep.mubr.bf16.mxu1 %v12192_v30  ;;  %v9168_v35 = vpop.f32.mrb[78].mxu0  ;;  %v12441_v15 = vadd.f32 %v9166_v61, %v9165_v44  ;;  %v5212_v30 = vld [vmem:[%s13892_s1 + $0x38] sm:$0xff]  ;;  %v4035_v9 = vor.u32 %v4034_v62, %v4030_v55  ;;  %v13962_v63 = vld [vmem:[#allocation19_spill] sm:$0xff] }
 0x218   : > { %v9169_v38 = vpop.f32.mrb[79].mxu0  ;;  %5258 = vperm.xlu1 %10246, %v5212_v30   ;;  %v12468_v60 = vld [vmem:[%s10881_s10 + $0x48] ss:$16 sps:$4 sm:$0xff]   ;;  %v4039_v44 = vrot.slane %v4037_v51, 1  ;;  %v4069_v55 = vshll.u32 %v12471_v21, 16  ;;  %v13963_v62 = vld [vmem:[#allocation7_spill] sm:$0xff] }
 0x219   : > { %v12439_v23 = vadd.f32 %v13958_v8, %v2201_v27  ;;  %v8973_v47 = vpop.f32.mrb[140].mxu1  ;;  %v12443_v5 = vadd.f32 %v9169_v38, %v9168_v35  ;;  %v5216_v8 = vld [vmem:[%s13892_s1 + $0x58] sm:$0xff]  ;;  %v4025_v45 = vshll.u32 %v12468_v60, 16 }
 0x21a   : > { %v8974_v18 = vpop.f32.mrb[141].mxu1 }
 0x21b   : > { %v8975_v49 = vadd.f32 %v8974_v18, %v8973_v47  ;;  %v8976_v42 = vpop.f32.mrb[142].mxu1  ;;  %5037 = vmatmul.mubr.bf16.gmra.mrb[184].mxu0 %v12238_v56  ;;  %v5215_v47 = vld [vmem:[%s13892_s1 + $0x50] sm:$0xff]  ;;  %v4018_v18 = vshrl.u32 %v10577_v37, 16 }
 0x21c   : > { %v8977_v29 = vpop.f32.mrb[143].mxu1  ;;  %v9171_v39 = vpop.f32.mrb[80].mxu0  ;;  %5268 = vperm.xlu1 %10246, %v5214_v48   ;;  %5044 = vmatprep.mubr.bf16.mxu0 %v12265_v2  ;;  %v13965_v48 = vld [vmem:[#allocation20_spill] sm:$0xff] }
 0x21d   : > { %v2206_v26 = vadd.f32 %v8975_v49, %v13959_v0  ;;  %v8978_v52 = vadd.f32 %v8977_v29, %v8976_v42  ;;  %v9172_v56 = vpop.f32.mrb[81].mxu0  ;;  %5273 = vperm.xlu0 %10245, %v5215_v47   ;;  %v12489_v42 = vsel %vm684_vm0, %v4035_v9, %v4039_v44  ;;  %v4065_v29 = vshrl.u32 %v12435_v20, 16  ;;  %v5217_v20 = vld [vmem:[%s13892_s1 + $0x60] sm:$0xff] }
 0x21e   : > { %3724 = vmatmul.mubr.bf16.gmra.mrb[248].mxu1 %v12227_v14  ;;  %v4020_v14 = vshll.u32 %v10577_v37, 16  ;;  %v9174_v25 = vpop.f32.mrb[82].mxu0  ;;  %v12477_v61 = vadd.f32 %v9172_v56, %v9171_v39  ;;  %v12511_v56 = vld [vmem:[%s10881_s10 + $0x8c] ss:$16 sps:$4 sm:$0xff]  }
 0x21f   : > { %v2209_v36 = vadd.f32 %v8978_v52, %v13960_v50  ;;  %v12464_v34 = vadd.f32 %v13961_v41, %v2206_v26  ;;  %3731 = vmatprep.mubr.bf16.mxu1 %v12234_v16  ;;  %v9175_v16 = vpop.f32.mrb[83].mxu0  ;;  %v5218_v26 = vld [vmem:[%s13892_s1 + $0x68] sm:$0xff]  ;;  %v4067_v41 = vor.u32 %v4065_v29, %v4039_v44  ;;  %v5219_v44 = vld [vmem:[%s13892_s1 + $0x70] sm:$0xff]  ;;  %v10610_v29 = vld [vmem:[%s13895_s4 + $0x380] sm:$0xff]  }
 0x220   : > { %v12479_v35 = vadd.f32 %v9175_v16, %v9174_v25  ;;  %v4022_v30 = vrot.slane %v4020_v14, 1  ;;  %5278 = vperm.xlu1 %10246, %v5216_v8   ;;  %v13964_v52 = vld [vmem:[#allocation8_spill] sm:$0xff]  ;;  %v4071_v14 = vrot.slane %v4069_v55, 1  ;;  %v13966_v25 = vld [vmem:[#allocation21_spill] sm:$0xff] }
 0x221   : > { %v12475_v27 = vadd.f32 %v13962_v63, %v2209_v36  ;;  %v8979_v32 = vpop.f32.mrb[144].mxu1  ;;  %v4027_v36 = vrot.slane %v4025_v45, 1  ;;  %5283 = vperm.xlu0 %10245, %v5217_v20   ;;  %v4057_v45 = vshrl.u32 %v12468_v60, 16  ;;  %v10612_v60 = vld [vmem:[%s13895_s4 + $0x3c8] sm:$0xff]  }
 0x222   : > { %v8980_v54 = vpop.f32.mrb[145].mxu1  ;;  %v4023_v50 = vor.u32 %v4022_v30, %v4018_v18 }
 0x223   : > { %v8981_v38 = vadd.f32 %v8980_v54, %v8979_v32  ;;  %v8982_v2 = vpop.f32.mrb[146].mxu1  ;;  %5045 = vmatmul.mubr.bf16.gmra.mrb[188].mxu0 %v12268_v43 }
 0x224   : > { %v8983_v49 = vpop.f32.mrb[147].mxu1  ;;  %v9177_v37 = vpop.f32.mrb[84].mxu0  ;;  %5288 = vperm.xlu1 %10246, %v5218_v26   ;;  %v12527_v30 = vsel %vm684_vm0, %v4023_v50, %v4027_v36  ;;  %v13970_v50 = vld [vmem:[#allocation23_spill] sm:$0xff] }
 0x225   : > { %v2214_v51 = vadd.f32 %v8981_v38, %v13963_v62  ;;  %v8984_v0 = vadd.f32 %v8983_v49, %v8982_v2  ;;  %v9178_v43 = vpop.f32.mrb[85].mxu0  ;;  %v5220_v38 = vld [vmem:[%s13892_s1 + $0x78] sm:$0xff]  ;;  %5293 = vperm.xlu0 %10245, %v5219_v44   ;;  %v12535_v62 = vsel %vm684_vm0, %v4067_v41, %v4071_v14 }
 0x226   : > { %3732 = vmatmul.mubr.bf16.gmra.mrb[252].mxu1 %v12262_v4  ;;  %v12508_v4 = vld [vmem:[%s10881_s10 + $0x68] ss:$16 sps:$4 sm:$0xff]   ;;  %v9180_v9 = vpop.f32.mrb[86].mxu0  ;;  %v12516_v16 = vadd.f32 %v9178_v43, %v9177_v37  ;;  %v13968_v37 = vld [vmem:[#allocation9_spill] sm:$0xff] }
 0x227   : > { %v2217_v39 = vadd.f32 %v8984_v0, %v13964_v52  ;;  %v12504_v22 = vadd.f32 %v13965_v48, %v2214_v51  ;;  %4618 = vmatprep.mubr.bf16.mxu1 %v12489_v42  ;;  %v9181_v54 = vpop.f32.mrb[87].mxu0  ;;  %v4061_v49 = vshll.u32 %v12508_v4, 16  ;;  %v4097_v51 = vshrl.u32 %v12471_v21, 16 }
 0x228   : > { %v12518_v47 = vadd.f32 %v9181_v54, %v9180_v9  ;;  %v4101_v0 = vshll.u32 %v12511_v56, 16  ;;  %5298 = vperm.xlu1 %10246, %v5220_v38   ;;  %v4059_v21 = vor.u32 %v4057_v45, %v4027_v36  ;;  %v12550_v9 = vld [vmem:[%s10881_s10 + $0x88] ss:$16 sps:$4 sm:$0xff]   ;;  %v12556_v38 = vld [vmem:[%s10881_s10 + $0xac] ss:$16 sps:$4 sm:$0xff]   ;;  %v10622_v36 = vld [vmem:[%s13895_s4 + $0x3d0] sm:$0xff]  }
 0x229   : > { %v12514_v63 = vadd.f32 %v13966_v25, %v2217_v39  ;;  %v8985_v32 = vpop.f32.mrb[148].mxu1  ;;  %v13969_v39 = vld [vmem:[#allocation10_spill] sm:$0xff]  ;;  %v4063_v41 = vrot.slane %v4061_v49, 1  ;;  %v10616_v25 = vld [vmem:[%s13895_s4 + $0x388] sm:$0xff]   ;;  %v4099_v54 = vor.u32 %v4097_v51, %v4071_v14 }
 0x22a   : > { %v8986_v8 = vpop.f32.mrb[149].mxu1  ;;  %13967 = vst [vmem:[#allocation15_spill] sm:$0xff] %v12518_v47 }
 0x22b   : > { %v8987_v2 = vadd.f32 %v8986_v8, %v8985_v32  ;;  %v8988_v18 = vpop.f32.mrb[150].mxu1  ;;  %v4103_v8 = vrot.slane %v4101_v0, 1  ;;  %v4089_v0 = vshrl.u32 %v12508_v4, 16  ;;  %v10626_v4 = vld [vmem:[%s13895_s4 + $0x3d8] sm:$0xff]  }
 0x22c   : > { %v8989_v55 = vpop.f32.mrb[151].mxu1  ;;  %v9183_v52 = vpop.f32.mrb[88].mxu0 }
 0x22d   : > { %v2222_v26 = vadd.f32 %v8987_v2, %v13968_v37  ;;  %v8990_v20 = vadd.f32 %v8989_v55, %v8988_v18  ;;  %v9184_v32 = vpop.f32.mrb[89].mxu0  ;;  %v13971_v2 = vld [vmem:[#allocation25_spill] sm:$0xff] }
 0x22e   : > { %4619 = vmatmul.mubr.bf16.vlgmr.msra.gmra.mrb[0].mxu1 %v12527_v30  ;;  %v9186_v44 = vpop.f32.mrb[90].mxu0  ;;  %v12564_v49 = vadd.f32 %v9184_v32, %v9183_v52 }
 0x22f   : > { %v2225_v48 = vadd.f32 %v8990_v20, %v13969_v39  ;;  %v12546_v43 = vadd.f32 %v13970_v50, %v2222_v26  ;;  %4626 = vmatprep.mubr.bf16.mxu1 %v12535_v62  ;;  %9580 = vmatpush3.bf16.msra.mxu1 %v10610_v29  ;;  %v9187_v29 = vpop.f32.mrb[91].mxu0  ;;  %v4093_v26 = vshll.u32 %v12550_v9, 16  ;;  %v10624_v20 = vld [vmem:[%s13895_s4 + $0x390] sm:$0xff]   ;;  %v12577_v39 = vsel %vm684_vm0, %v4099_v54, %v4103_v8  ;;  %v13976_v54 = vld [vmem:[#allocation27_spill] sm:$0xff] }
 0x230   : > { %9581 = vmatprep.subr.bf16.mxu1 %v10612_v60  ;;  %13972 = vst [vmem:[#allocation3_spill] sm:$0xff] %v12564_v49  ;;  %v12566_v37 = vadd.f32 %v9187_v29, %v9186_v44  ;;  %v12570_v60 = vsel %vm684_vm0, %v4059_v21, %v4063_v41  ;;  %v4133_v50 = vshll.u32 %v12556_v38, 16  ;;  %v13974_v21 = vld [vmem:[#allocation11_spill] sm:$0xff] }
 0x231   : > { %v12562_v18 = vadd.f32 %v13971_v2, %v2225_v48  ;;  %v8991_v45 = vpop.f32.mrb[152].mxu1  ;;  %v4129_v48 = vshrl.u32 %v12511_v56, 16  ;;  %v13975_v2 = vld [vmem:[#allocation12_spill] sm:$0xff]  ;;  %v4091_v56 = vor.u32 %v4089_v0, %v4063_v41  ;;  %v10636_v41 = vld [vmem:[%s13895_s4 + $0x3e0] sm:$0xff]  }
 0x232   : > { %v8992_v55 = vpop.f32.mrb[153].mxu1  ;;  %13973 = vst [vmem:[#allocation4_spill] sm:$0xff] %v12566_v37 }
 0x233   : > { %v8993_v14 = vadd.f32 %v8992_v55, %v8991_v45  ;;  %v8994_v51 = vpop.f32.mrb[154].mxu1  ;;  %9582 = vmatpush3.bf16.msra.mxu1 %v10616_v25  ;;  %v4095_v55 = vrot.slane %v4093_v26, 1  ;;  %v13977_v26 = vld [vmem:[#allocation29_spill] sm:$0xff] }
 0x234   : > { %v8995_v52 = vpop.f32.mrb[155].mxu1  ;;  %9583 = vmatprep.subr.bf16.mxu1 %v10622_v36  ;;  %v9189_v44 = vpop.f32.mrb[92].mxu0  ;;  %v12592_v36 = vld [vmem:[%s10881_s10 + $0xa8] ss:$16 sps:$4 sm:$0xff]  }
 0x235   : > { %v2230_v25 = vadd.f32 %v8993_v14, %v13974_v21  ;;  %v8996_v32 = vadd.f32 %v8995_v52, %v8994_v51  ;;  %v10630_v14 = vld [vmem:[%s13895_s4 + $0x398] sm:$0xff]   ;;  %v9190_v51 = vpop.f32.mrb[93].mxu0  ;;  %v4131_v52 = vor.u32 %v4129_v48, %v4103_v8  ;;  %v4135_v21 = vrot.slane %v4133_v50, 1 }
 0x236   : > { %4627 = vmatmul.mubr.bf16.gmra.mrb[4].mxu1 %v12570_v60  ;;  %v9192_v0 = vpop.f32.mrb[94].mxu0  ;;  %v4121_v50 = vshrl.u32 %v12550_v9, 16  ;;  %v4125_v40 = vshll.u32 %v12592_v36, 16  ;;  %v10640_v9 = vld [vmem:[%s13895_s4 + $0x3e8] sm:$0xff]  }
 0x237   : > { %v2233_v45 = vadd.f32 %v8996_v32, %v13975_v2  ;;  %v12588_v29 = vadd.f32 %v13976_v54, %v2230_v25  ;;  %4634 = vmatprep.mubr.bf16.mxu1 %v12577_v39  ;;  %9584 = vmatpush3.bf16.msra.mxu1 %v10624_v20  ;;  %v12606_v20 = vadd.f32 %v9190_v51, %v9189_v44  ;;  %v9193_v2 = vpop.f32.mrb[95].mxu0 }
 0x238   : > { %9585 = vmatprep.subr.bf16.mxu1 %v10626_v4  ;;  %v12608_v46 = vadd.f32 %v9193_v2, %v9192_v0  ;;  %v12612_v4 = vsel %vm684_vm0, %v4091_v56, %v4095_v55  ;;  %v12619_v51 = vsel %vm684_vm0, %v4131_v52, %v4135_v21  ;;  %v4161_v0 = vshrl.u32 %v12556_v38, 16  ;;  %v13980_v56 = vld [vmem:[#allocation13_spill] sm:$0xff]  ;;  %v13982_v52 = vld [vmem:[#allocation31_spill] sm:$0xff] }
 0x239   : > { %v12604_v25 = vadd.f32 %v13977_v26, %v2233_v45  ;;  %v8997_v32 = vpop.f32.mrb[156].mxu1  ;;  %13978 = vst [vmem:[#allocation16_spill] sm:$0xff] %v12606_v20  ;;  %v10638_v45 = vld [vmem:[%s13895_s4 + $0x3a0] sm:$0xff]   ;;  %v4165_v26 = vshll.u32 %v12598_v19, 16  ;;  %v4123_v38 = vor.u32 %v4121_v50, %v4095_v55  ;;  %v4127_v37 = vrot.slane %v4125_v40, 1  ;;  %v10648_v55 = vld [vmem:[%s13895_s4 + $0x3f0] sm:$0xff]  }
 0x23a   : > { %v8998_v54 = vpop.f32.mrb[157].mxu1  ;;  %13979 = vst [vmem:[#allocation17_spill] sm:$0xff] %v12608_v46  ;;  %v13983_v50 = vld [vmem:[#allocation33_spill] sm:$0xff] }
 0x23b   : > { %v8999_v8 = vadd.f32 %v8998_v54, %v8997_v32  ;;  %v9000_v48 = vpop.f32.mrb[158].mxu1  ;;  %9586 = vmatpush3.bf16.msra.mxu1 %v10630_v14  ;;  %v13981_v54 = vld [vmem:[#allocation14_spill] sm:$0xff] }
 0x23c   : > { %v9001_v44 = vpop.f32.mrb[159].mxu1  ;;  %9587 = vmatprep.subr.bf16.mxu1 %v10636_v41  ;;  %v9275_v2 = vpop.f32.mrb[96].mxu0  ;;  %v12634_v41 = vld [vmem:[%s10881_s10 + $0xc8] ss:$16 sps:$4 sm:$0xff]  }
 0x23d   : > { %v2238_v14 = vadd.f32 %v8999_v8, %v13980_v56  ;;  %v9002_v32 = vadd.f32 %v9001_v44, %v9000_v48  ;;  %v10643_v8 = vld [vmem:[%s13895_s4 + $0x3a8] sm:$0xff]   ;;  %v9276_v48 = vpop.f32.mrb[97].mxu0  ;;  %v4163_v44 = vor.u32 %v4161_v0, %v4135_v21  ;;  %v4167_v56 = vrot.slane %v4165_v26, 1 }
 0x23e   : > { %4635 = vmatmul.mubr.bf16.gmra.mrb[8].mxu1 %v12612_v4  ;;  %v9278_v40 = vpop.f32.mrb[98].mxu0  ;;  %v4153_v26 = vshrl.u32 %v12592_v36, 16  ;;  %v4157_v6 = vshll.u32 %v12634_v41, 16  ;;  %v10652_v36 = vld [vmem:[%s13895_s4 + $0x3f8] sm:$0xff]  }
 0x23f   : > { %v2241_v46 = vadd.f32 %v9002_v32, %v13981_v54  ;;  %v12630_v20 = vadd.f32 %v13982_v52, %v2238_v14  ;;  %4642 = vmatprep.mubr.bf16.mxu1 %v12619_v51  ;;  %9588 = vmatpush3.bf16.msra.mxu1 %v10638_v45  ;;  %v12648_v45 = vadd.f32 %v9276_v48, %v9275_v2  ;;  %v9279_v54 = vpop.f32.mrb[99].mxu0 }
 0x240   : > { %9589 = vmatprep.subr.bf16.mxu1 %v10640_v9  ;;  %v12650_v49 = vadd.f32 %v9279_v54, %v9278_v40  ;;  %v12654_v9 = vsel %vm684_vm0, %v4123_v38, %v4127_v37  ;;  %v12661_v48 = vsel %vm684_vm0, %v4163_v44, %v4167_v56  ;;  %v4193_v40 = vshrl.u32 %v12598_v19, 16 }
 0x241   : > { %v12646_v14 = vadd.f32 %v13983_v50, %v2241_v46  ;;  %v9083_v32 = vpop.f32.mrb[160].mxu1  ;;  %13984 = vst [vmem:[#allocation5_spill] sm:$0xff] %v12648_v45  ;;  %v10650_v46 = vld [vmem:[%s13895_s4 + $0x3b0] sm:$0xff]   ;;  %v4197_v50 = vshll.u32 %v12640_v11, 16  ;;  %v4155_v54 = vor.u32 %v4153_v26, %v4127_v37  ;;  %v4159_v19 = vrot.slane %v4157_v6, 1 }
 0x242   : > { %v9084_v52 = vpop.f32.mrb[161].mxu1  ;;  %13985 = vst [vmem:[#allocation6_spill] sm:$0xff] %v12650_v49 }
 0x243   : > { %v9085_v21 = vadd.f32 %v9084_v52, %v9083_v32  ;;  %v9086_v0 = vpop.f32.mrb[162].mxu1  ;;  %9590 = vmatpush3.bf16.msra.mxu1 %v10643_v8  ;;  %v10654_v52 = vld [vmem:[%s13895_s4 + $0x3b8] sm:$0xff]  }
 0x244   : > { %v9087_v2 = vpop.f32.mrb[163].mxu1  ;;  %9591 = vmatprep.subr.bf16.mxu1 %v10648_v55  ;;  %v9281_v32 = vpop.f32.mrb[100].mxu0  ;;  %v10618_v55 = vld [vmem:[%s10881_s10 + $0xe8] ss:$16 sps:$4 sm:$0xff]  }
 0x245   : > { %v12669_v38 = vadd.f32 %v9085_v21, %v12374_v7  ;;  %v9088_v8 = vadd.f32 %v9087_v2, %v9086_v0  ;;  %v9282_v49 = vpop.f32.mrb[101].mxu0  ;;  %v4195_v7 = vor.u32 %v4193_v40, %v4167_v56  ;;  %v4199_v21 = vrot.slane %v4197_v50, 1  ;;  %v10634_v0 = vld [vmem:[%s10881_s10 + $0x10c] ss:$16 sps:$4 sm:$0xff]  }
 0x246   : > { %4643 = vmatmul.mubr.bf16.gmra.mrb[12].mxu1 %v12654_v9  ;;  %v9284_v2 = vpop.f32.mrb[102].mxu0  ;;  %v12681_v45 = vadd.f32 %v9282_v49, %v9281_v32  ;;  %v4189_v56 = vshll.u32 %v10618_v55, 16  ;;  %v4225_v49 = vshrl.u32 %v12640_v11, 16 }
 0x247   : > { %13986 = vst [vmem:[#allocation18_spill] sm:$0xff] %v12669_v38  ;;  %v12673_v44 = vadd.f32 %v9088_v8, %v12385_v33  ;;  %4650 = vmatprep.mubr.bf16.mxu1 %v12661_v48  ;;  %9592 = vmatpush3.bf16.msra.mxu1 %v10650_v46  ;;  %v9285_v33 = vpop.f32.mrb[103].mxu0  ;;  %v4185_v8 = vshrl.u32 %v12634_v41, 16  ;;  %v12690_v50 = vsel %vm684_vm0, %v4195_v7, %v4199_v21  ;;  %v10632_v7 = vld [vmem:[%s10881_s10 + $0x108] ss:$16 sps:$4 sm:$0xff]  }
 0x248   : > { %9593 = vmatprep.subr.bf16.mxu1 %v10652_v36  ;;  %13988 = vst [vmem:[#allocation7_spill] sm:$0xff] %v12681_v45  ;;  %v12683_v37 = vadd.f32 %v9285_v33, %v9284_v2  ;;  %v4229_v36 = vshll.u32 %v10634_v0, 16  ;;  %v3789_v2 = vld [vmem:[%s10881_s10 + $0x128] sm:$0x11] }
 0x249   : > { %13987 = vst [vmem:[#allocation19_spill] sm:$0xff] %v12673_v44  ;;  %v9089_v38 = vpop.f32.mrb[164].mxu1  ;;  %v12687_v44 = vsel %vm684_vm0, %v4155_v54, %v4159_v19  ;;  %v4187_v33 = vor.u32 %v4185_v8, %v4159_v19  ;;  %v8284_v45 = vcombine.high %v3789_v2, %v3789_v2  ;;  %v4221_v8 = vshll.u32 %v10632_v7, 16 }
 0x24a   : > { %v9090_v6 = vpop.f32.mrb[165].mxu1  ;;  %13989 = vst [vmem:[#allocation8_spill] sm:$0xff] %v12683_v37  ;;  %v4227_v37 = vor.u32 %v4225_v49, %v4199_v21  ;;  %v4231_v11 = vrot.slane %v4229_v36, 1  ;;  %v4257_v49 = vshrl.u32 %v10634_v0, 16 }
 0x24b   : > { %v9091_v26 = vadd.f32 %v9090_v6, %v9089_v38  ;;  %v9092_v46 = vpop.f32.mrb[166].mxu1  ;;  %9594 = vmatpush3.bf16.msra.mxu1 %v10654_v52  ;;  %v4191_v52 = vrot.slane %v4189_v56, 1  ;;  %v4261_v36 = vshll.u32 %v8284_v45, 16 }
 0x24c   : > { %v9093_v40 = vpop.f32.mrb[167].mxu1  ;;  %v9287_v41 = vpop.f32.mrb[104].mxu0  ;;  %v12711_v21 = vsel %vm684_vm0, %v4227_v37, %v4231_v11  ;;  %v4259_v37 = vor.u32 %v4257_v49, %v4231_v11 }
 0x24d   : > { %v12694_v32 = vadd.f32 %v9091_v26, %v12405_v58  ;;  %v9094_v38 = vadd.f32 %v9093_v40, %v9092_v46  ;;  %v9288_v6 = vpop.f32.mrb[105].mxu0  ;;  %v12708_v19 = vsel %vm684_vm0, %v4187_v33, %v4191_v52  ;;  %v4223_v33 = vrot.slane %v4221_v8, 1 }
 0x24e   : > { %4651 = vmatmul.mubr.bf16.gmra.mrb[16].mxu1 %v12687_v44  ;;  %v9290_v47 = vpop.f32.mrb[106].mxu0  ;;  %v12703_v26 = vadd.f32 %v9288_v6, %v9287_v41 }
 0x24f   : > { %13990 = vst [vmem:[#allocation20_spill] sm:$0xff] %v12694_v32  ;;  %v12699_v54 = vadd.f32 %v9094_v38, %v12410_v28  ;;  %4658 = vmatprep.mubr.bf16.mxu1 %v12690_v50  ;;  %v9291_v46 = vpop.f32.mrb[107].mxu0  ;;  %v4217_v38 = vshrl.u32 %v10618_v55, 16 }
 0x250   : > { %13991 = vst [vmem:[#allocation21_spill] sm:$0xff] %v12703_v26  ;;  %v12705_v32 = vadd.f32 %v9291_v46, %v9290_v47  ;;  %v8283_v46 = vcombine.low %v3789_v2, %v3789_v2 }
 0x251   : > { %v9095_v58 = vpop.f32.mrb[168].mxu1  ;;  %v4219_v55 = vor.u32 %v4217_v38, %v4191_v52 }
 0x252   : > { %v9096_v40 = vpop.f32.mrb[169].mxu1  ;;  %13992 = vst [vmem:[#allocation9_spill] sm:$0xff] %v12705_v32  ;;  %v4263_v32 = vrot.slane %v4261_v36, 1  ;;  %v4253_v38 = vshll.u32 %v8283_v46, 16 }
 0x253   : > { %v9097_v53 = vadd.f32 %v9096_v40, %v9095_v58  ;;  %v9098_v28 = vpop.f32.mrb[170].mxu1  ;;  %v12726_v52 = vsel %vm684_vm0, %v4219_v55, %v4223_v33 }
 0x254   : > { %v9099_v56 = vpop.f32.mrb[171].mxu1  ;;  %v9293_v47 = vpop.f32.mrb[108].mxu0  ;;  %v12729_v2 = vsel %vm684_vm0, %v4259_v37, %v4263_v32 }
 0x255   : > { %v12714_v41 = vadd.f32 %v9097_v53, %v12431_v1  ;;  %v9100_v6 = vadd.f32 %v9099_v56, %v9098_v28  ;;  %v9294_v40 = vpop.f32.mrb[109].mxu0 }
 0x256   : > { %4659 = vmatmul.mubr.bf16.gmra.mrb[20].mxu1 %v12708_v19  ;;  %v9296_v0 = vpop.f32.mrb[110].mxu0  ;;  %v12721_v26 = vadd.f32 %v9294_v40, %v9293_v47  ;;  %v4255_v47 = vrot.slane %v4253_v38, 1 }
 0x257   : > { %13993 = vst [vmem:[#allocation10_spill] sm:$0xff] %v12714_v41  ;;  %v12718_v58 = vadd.f32 %v9100_v6, %v12439_v23  ;;  %4666 = vmatprep.mubr.bf16.mxu1 %v12711_v21  ;;  %v9297_v53 = vpop.f32.mrb[111].mxu0  ;;  %v4249_v23 = vshrl.u32 %v10632_v7, 16 }
 0x258   : > { %v12723_v28 = vadd.f32 %v9297_v53, %v9296_v0 }
 0x259   : > { %v9101_v45 = vpop.f32.mrb[172].mxu1  ;;  %v4251_v6 = vor.u32 %v4249_v23, %v4223_v33 }
 0x25a   : > { %v9102_v1 = vpop.f32.mrb[173].mxu1 }
 0x25b   : > { %v9103_v56 = vadd.f32 %v9102_v1, %v9101_v45  ;;  %v9104_v41 = vpop.f32.mrb[174].mxu1 }
 0x25c   : > { %v9105_v8 = vpop.f32.mrb[175].mxu1  ;;  %v9299_v7 = vpop.f32.mrb[112].mxu0 }
 0x25d   : > { %v12732_v11 = vadd.f32 %v9103_v56, %v12464_v34  ;;  %v9106_v49 = vadd.f32 %v9105_v8, %v9104_v41  ;;  %v9300_v46 = vpop.f32.mrb[113].mxu0  ;;  %v12742_v41 = vsel %vm684_vm0, %v4251_v6, %v4255_v47 }
 0x25e   : > { %4667 = vmatmul.mubr.bf16.gmra.mrb[24].mxu1 %v12726_v52  ;;  %v12739_v0 = vadd.f32 %v9300_v46, %v9299_v7  ;;  %v9302_v32 = vpop.f32.mrb[114].mxu0 }
 0x25f   : > { %v12736_v36 = vadd.f32 %v9106_v49, %v12475_v27  ;;  %4674 = vmatprep.mubr.bf16.mxu1 %v12729_v2  ;;  %v9303_v45 = vpop.f32.mrb[115].mxu0 }
 0x260   : > { %v12744_v27 = vadd.f32 %v9303_v45, %v9302_v32 }
 0x261   : > { %v9107_v55 = vpop.f32.mrb[176].mxu1 }
 0x262   : > { %v9108_v40 = vpop.f32.mrb[177].mxu1 }
 0x263   : > { %v9109_v37 = vadd.f32 %v9108_v40, %v9107_v55  ;;  %v9110_v34 = vpop.f32.mrb[178].mxu1 }
 0x264   : > { %v9111_v53 = vpop.f32.mrb[179].mxu1  ;;  %v9305_v23 = vpop.f32.mrb[116].mxu0 }
 0x265   : > { %v12747_v33 = vadd.f32 %v9109_v37, %v12504_v22  ;;  %v9112_v1 = vadd.f32 %v9111_v53, %v9110_v34  ;;  %v9306_v8 = vpop.f32.mrb[117].mxu0 }
 0x266   : > { %4675 = vmatmul.mubr.bf16.gmra.mrb[28].mxu1 %v12742_v41  ;;  %v12754_v6 = vadd.f32 %v9306_v8, %v9305_v23  ;;  %v9308_v47 = vpop.f32.mrb[118].mxu0 }
 0x267   : > { %v12751_v56 = vadd.f32 %v9112_v1, %v12514_v63  ;;  %5085 = vmatprep.mubr.bf16.mxu1 %v12489_v42  ;;  %v9309_v46 = vpop.f32.mrb[119].mxu0 }
 0x268   : > { %v12756_v40 = vadd.f32 %v9309_v46, %v9308_v47 }
 0x269   : > { %v9113_v38 = vpop.f32.mrb[180].mxu1 }
 0x26a   : > { %v9114_v49 = vpop.f32.mrb[181].mxu1 }
 0x26b   : > { %v9115_v7 = vadd.f32 %v9114_v49, %v9113_v38  ;;  %v9116_v55 = vpop.f32.mrb[182].mxu1 }
 0x26c   : > { %v9117_v22 = vpop.f32.mrb[183].mxu1  ;;  %v9311_v37 = vpop.f32.mrb[120].mxu0 }
 0x26d   : > { %v12759_v32 = vadd.f32 %v9115_v7, %v12546_v43  ;;  %v9118_v63 = vadd.f32 %v9117_v22, %v9116_v55  ;;  %v9312_v45 = vpop.f32.mrb[121].mxu0 }
 0x26e   : > { %5086 = vmatmul.mubr.bf16.vlgmr.msra.gmra.mrb[32].mxu1 %v12527_v30  ;;  %v12766_v1 = vadd.f32 %v9312_v45, %v9311_v37  ;;  %v9314_v23 = vpop.f32.mrb[122].mxu0 }
 0x26f   : > { %v12763_v42 = vadd.f32 %v9118_v63, %v12562_v18  ;;  %5093 = vmatprep.mubr.bf16.mxu1 %v12535_v62  ;;  %v9315_v49 = vpop.f32.mrb[123].mxu0 }
 0x270   : > { %v12768_v47 = vadd.f32 %v9315_v49, %v9314_v23 }
 0x271   : > { %v9119_v34 = vpop.f32.mrb[184].mxu1 }
 0x272   : > { %v9120_v53 = vpop.f32.mrb[185].mxu1 }
 0x273   : > { %v9121_v38 = vadd.f32 %v9120_v53, %v9119_v34  ;;  %v9122_v8 = vpop.f32.mrb[186].mxu1 }
 0x274   : > { %v9123_v43 = vpop.f32.mrb[187].mxu1  ;;  %v9317_v7 = vpop.f32.mrb[124].mxu0 }
 0x275   : > { %v12771_v30 = vadd.f32 %v9121_v38, %v12588_v29  ;;  %v9124_v18 = vadd.f32 %v9123_v43, %v9122_v8  ;;  %v9318_v46 = vpop.f32.mrb[125].mxu0 }
 0x276   : > { %5094 = vmatmul.mubr.bf16.gmra.mrb[36].mxu1 %v12570_v60  ;;  %v12778_v63 = vadd.f32 %v9318_v46, %v9317_v7  ;;  %v9320_v37 = vpop.f32.mrb[126].mxu0 }
 0x277   : > { %v12775_v62 = vadd.f32 %v9124_v18, %v12604_v25  ;;  %5101 = vmatprep.mubr.bf16.mxu1 %v12577_v39  ;;  %v9321_v53 = vpop.f32.mrb[127].mxu0 }
 0x278   : > { %v12780_v23 = vadd.f32 %v9321_v53, %v9320_v37 }
 0x279   : > { %v9125_v55 = vpop.f32.mrb[188].mxu1 }
 0x27a   : > { %v9126_v22 = vpop.f32.mrb[189].mxu1 }
 0x27b   : > { %v9127_v34 = vadd.f32 %v9126_v22, %v9125_v55  ;;  %v9128_v45 = vpop.f32.mrb[190].mxu1 }
 0x27c   : > { %v9129_v29 = vpop.f32.mrb[191].mxu1 }
 0x27d   : > { %v12783_v60 = vadd.f32 %v9127_v34, %v12630_v20  ;;  %v9130_v25 = vadd.f32 %v9129_v29, %v9128_v45  ;;  %v10655_v20 = vld [vmem:[%s13897_s6] sm:$0xff]   ;;  %v13994_v34 = vld [vmem:[#allocation22_spill] sm:$0xff]  ;;  %v10656_v29 = vld [vmem:[%s13897_s6 + $0x8] sm:$0xff]  }
 0x27e   : > { %5102 = vmatmul.mubr.bf16.gmra.mrb[40].mxu1 %v12612_v4  ;;  %v9403_v38 = vpop.f32.mrb[128].mxu0  ;;  %9787 = vmatprep.subr.bf16.mxu0 %v10655_v20 }
 0x27f   : > { %v12787_v39 = vadd.f32 %v9130_v25, %v12646_v14  ;;  %5109 = vmatprep.mubr.bf16.mxu1 %v12619_v51  ;;  %v9404_v49 = vpop.f32.mrb[129].mxu0  ;;  %9788 = vmatpush3.bf16.msra.mxu0 %v10655_v20 }
 0x280   : > { %v12790_v18 = vadd.f32 %v9404_v49, %v9403_v38  ;;  %v9406_v7 = vpop.f32.mrb[130].mxu0  ;;  %v13995_v38 = vld [vmem:[#allocation24_spill] sm:$0xff]  ;;  %9789 = vmatprep.subr.bf16.mxu0 %v10656_v29 }
 0x281   : > { %v9211_v8 = vpop.f32.mrb[192].mxu1  ;;  %v9407_v22 = vpop.f32.mrb[131].mxu0 }
 0x282   : > { %v9212_v43 = vpop.f32.mrb[193].mxu1  ;;  %v12795_v37 = vadd.f32 %v9407_v22, %v9406_v7 }
 0x283   : > { %v9213_v55 = vadd.f32 %v9212_v43, %v9211_v8  ;;  %v9214_v46 = vpop.f32.mrb[194].mxu1  ;;  %9790 = vmatpush3.bf16.msra.mxu0 %v10656_v29  ;;  %v10658_v29 = vld [vmem:[%s13897_s6 + $0x18] sm:$0xff]  }
 0x284   : > { %v9215_v4 = vpop.f32.mrb[195].mxu1 }
 0x285   : > { %v3211_v14 = vadd.f32 %v9213_v55, %v12358_v59  ;;  %v9216_v51 = vadd.f32 %v9215_v4, %v9214_v46 }
 0x286   : > { %5110 = vmatmul.mubr.bf16.gmra.mrb[44].mxu1 %v12654_v9  ;;  %v9409_v25 = vpop.f32.mrb[132].mxu0 }
 0x287   : > { %v12800_v45 = vadd.f32 %v3211_v14, %v13994_v34  ;;  %v3214_v53 = vadd.f32 %v9216_v51, %v12361_v10  ;;  %5117 = vmatprep.mubr.bf16.mxu1 %v12661_v48  ;;  %v9410_v49 = vpop.f32.mrb[133].mxu0  ;;  %v10657_v48 = vld [vmem:[%s13897_s6 + $0x10] sm:$0xff]   ;;  %v13996_v51 = vld [vmem:[#allocation26_spill] sm:$0xff] }
 0x288   : > { %v12810_v43 = vadd.f32 %v9410_v49, %v9409_v25  ;;  %v9412_v7 = vpop.f32.mrb[134].mxu0  ;;  %9791 = vmatprep.subr.bf16.mxu0 %v10657_v48 }
 0x289   : > { %v12808_v8 = vadd.f32 %v3214_v53, %v13995_v38  ;;  %v9217_v59 = vpop.f32.mrb[196].mxu1  ;;  %v9413_v22 = vpop.f32.mrb[135].mxu0  ;;  %9792 = vmatpush3.bf16.msra.mxu0 %v10657_v48 }
 0x28a   : > { %v9218_v9 = vpop.f32.mrb[197].mxu1  ;;  %v12816_v14 = vadd.f32 %v9413_v22, %v9412_v7  ;;  %9793 = vmatprep.subr.bf16.mxu0 %v10658_v29 }
 0x28b   : > { %v9219_v55 = vadd.f32 %v9218_v9, %v9217_v59  ;;  %v9220_v10 = vpop.f32.mrb[198].mxu1 }
 0x28c   : > { %v9221_v46 = vpop.f32.mrb[199].mxu1 }
 0x28d   : > { %v3219_v20 = vadd.f32 %v9219_v55, %v12387_v3  ;;  %v9222_v4 = vadd.f32 %v9221_v46, %v9220_v10  ;;  %v13997_v3 = vld [vmem:[#allocation28_spill] sm:$0xff]  ;;  %9794 = vmatpush3.bf16.msra.mxu0 %v10658_v29  ;;  %v10659_v46 = vld [vmem:[%s13897_s6 + $0x20] sm:$0xff]  }
 0x28e   : > { %5118 = vmatmul.mubr.bf16.gmra.mrb[48].mxu1 %v12687_v44  ;;  %v9415_v25 = vpop.f32.mrb[136].mxu0  ;;  %9795 = vmatprep.subr.bf16.mxu0 %v10659_v46 }
 0x28f   : > { %v12820_v34 = vadd.f32 %v3219_v20, %v13996_v51  ;;  %v3222_v53 = vadd.f32 %v9222_v4, %v12389_v57  ;;  %5125 = vmatprep.mubr.bf16.mxu1 %v12690_v50  ;;  %v9416_v49 = vpop.f32.mrb[137].mxu0  ;;  %v13998_v4 = vld [vmem:[#allocation30_spill] sm:$0xff] }
 0x290   : > { %v12830_v9 = vadd.f32 %v9416_v49, %v9415_v25  ;;  %v9418_v7 = vpop.f32.mrb[138].mxu0  ;;  %v10660_v25 = vld [vmem:[%s13897_s6 + $0x28] sm:$0xff]  }
 0x291   : > { %v12828_v38 = vadd.f32 %v3222_v53, %v13997_v3  ;;  %v9223_v59 = vpop.f32.mrb[200].mxu1  ;;  %v9419_v10 = vpop.f32.mrb[139].mxu0  ;;  %9796 = vmatpush3.bf16.msra.mxu0 %v10659_v46  ;;  %v13999_v3 = vld [vmem:[#allocation32_spill] sm:$0xff] }
 0x292   : > { %v9224_v44 = vpop.f32.mrb[201].mxu1  ;;  %v12832_v48 = vadd.f32 %v9419_v10, %v9418_v7  ;;  %9797 = vmatprep.subr.bf16.mxu0 %v10660_v25 }
 0x293   : > { %v9225_v55 = vadd.f32 %v9224_v44, %v9223_v59  ;;  %v9226_v57 = vpop.f32.mrb[202].mxu1 }
 0x294   : > { %v9227_v50 = vpop.f32.mrb[203].mxu1 }
 0x295   : > { %v3227_v22 = vadd.f32 %v9225_v55, %v12412_v24  ;;  %v9228_v20 = vadd.f32 %v9227_v50, %v9226_v57  ;;  %9798 = vmatpush3.bf16.msra.mxu0 %v10660_v25  ;;  %v10661_v50 = vld [vmem:[%s13897_s6 + $0x30] sm:$0xff]   ;;  %v10662_v25 = vld [vmem:[%s13897_s6 + $0x38] sm:$0xff]  }
 0x296   : > { %5126 = vmatmul.mubr.bf16.gmra.mrb[52].mxu1 %v12708_v19  ;;  %v9421_v29 = vpop.f32.mrb[140].mxu0  ;;  %9799 = vmatprep.subr.bf16.mxu0 %v10661_v50 }
 0x297   : > { %v12840_v51 = vadd.f32 %v3227_v22, %v13998_v4  ;;  %v3230_v53 = vadd.f32 %v9228_v20, %v12414_v13  ;;  %5133 = vmatprep.mubr.bf16.mxu1 %v12711_v21  ;;  %v9422_v49 = vpop.f32.mrb[141].mxu0  ;;  %v14000_v20 = vld [vmem:[#allocation34_spill] sm:$0xff] }
 0x298   : > { %v12850_v44 = vadd.f32 %v9422_v49, %v9421_v29  ;;  %v9424_v7 = vpop.f32.mrb[142].mxu0 }
 0x299   : > { %v12848_v59 = vadd.f32 %v3230_v53, %v13999_v3  ;;  %v9229_v24 = vpop.f32.mrb[204].mxu1  ;;  %v9425_v57 = vpop.f32.mrb[143].mxu0  ;;  %9800 = vmatpush3.bf16.msra.mxu0 %v10661_v50 }
 0x29a   : > { %v9230_v19 = vpop.f32.mrb[205].mxu1  ;;  %v12852_v10 = vadd.f32 %v9425_v57, %v9424_v7  ;;  %9801 = vmatprep.subr.bf16.mxu0 %v10662_v25 }
 0x29b   : > { %v9231_v55 = vadd.f32 %v9230_v19, %v9229_v24  ;;  %v9232_v13 = vpop.f32.mrb[206].mxu1 }
 0x29c   : > { %v9233_v21 = vpop.f32.mrb[207].mxu1 }
 0x29d   : > { %v3235_v46 = vadd.f32 %v9231_v55, %v12441_v15  ;;  %v9234_v22 = vadd.f32 %v9233_v21, %v9232_v13  ;;  %9802 = vmatpush3.bf16.msra.mxu0 %v10662_v25 }
 0x29e   : > { %5134 = vmatmul.mubr.bf16.gmra.mrb[56].mxu1 %v12726_v52  ;;  %v9427_v29 = vpop.f32.mrb[144].mxu0 }
 0x29f   : > { %v12860_v4 = vadd.f32 %v3235_v46, %v14000_v20  ;;  %v3238_v53 = vadd.f32 %v9234_v22, %v12443_v5  ;;  %5141 = vmatprep.mubr.bf16.mxu1 %v12729_v2  ;;  %v9428_v52 = vpop.f32.mrb[145].mxu0 }
 0x2a0   : > { %v12870_v7 = vadd.f32 %v9428_v52, %v9427_v29  ;;  %v9430_v5 = vpop.f32.mrb[146].mxu0 }
 0x2a1   : > { %v12868_v3 = vadd.f32 %v3238_v53, %v12252_v17  ;;  %v9235_v15 = vpop.f32.mrb[208].mxu1  ;;  %v9431_v55 = vpop.f32.mrb[147].mxu0 }
 0x2a2   : > { %v9236_v24 = vpop.f32.mrb[209].mxu1  ;;  %v12873_v21 = vadd.f32 %v9431_v55, %v9430_v5 }
 0x2a3   : > { %v9237_v49 = vadd.f32 %v9236_v24, %v9235_v15  ;;  %v9238_v19 = vpop.f32.mrb[210].mxu1 }
 0x2a4   : > { %v9239_v2 = vpop.f32.mrb[211].mxu1 }
 0x2a5   : > { %v3243_v13 = vadd.f32 %v9237_v49, %v12477_v61  ;;  %v9240_v57 = vadd.f32 %v9239_v2, %v9238_v19 }
 0x2a6   : > { %5142 = vmatmul.mubr.bf16.gmra.mrb[60].mxu1 %v12742_v41  ;;  %v9433_v46 = vpop.f32.mrb[148].mxu0 }
 0x2a7   : > { %v12877_v17 = vadd.f32 %v3243_v13, %v12275_v31  ;;  %v3246_v50 = vadd.f32 %v9240_v57, %v12479_v35  ;;  %v9434_v15 = vpop.f32.mrb[149].mxu0  ;;  %v14002_v35 = vld [vmem:[#allocation35_spill] sm:$0xff]  ;;  %v14004_v13 = vld [vmem:[#allocation36_spill] sm:$0xff] }
 0x2a8   : > { %v12883_v24 = vadd.f32 %v9434_v15, %v9433_v46  ;;  %v9436_v52 = vpop.f32.mrb[150].mxu0 }
 0x2a9   : > { %v12881_v22 = vadd.f32 %v3246_v50, %v12283_v12  ;;  %v9241_v20 = vpop.f32.mrb[212].mxu1  ;;  %v9437_v31 = vpop.f32.mrb[151].mxu0  ;;  %v14003_v12 = vld [vmem:[#allocation15_spill] sm:$0xff] }
 0x2aa   : > { %v9242_v53 = vpop.f32.mrb[213].mxu1  ;;  %14001 = vst [vmem:[#allocation23_spill] sm:$0xff] %v12883_v24  ;;  %v12886_v19 = vadd.f32 %v9437_v31, %v9436_v52  ;;  %v14008_v52 = vld [vmem:[#allocation3_spill] sm:$0xff] }
 0x2ab   : > { %v9243_v29 = vadd.f32 %v9242_v53, %v9241_v20  ;;  %v9244_v25 = vpop.f32.mrb[214].mxu1 }
 0x2ac   : > { %v9245_v61 = vpop.f32.mrb[215].mxu1 }
 0x2ad   : > { %v3251_v41 = vadd.f32 %v9243_v29, %v12516_v16  ;;  %v9246_v49 = vadd.f32 %v9245_v61, %v9244_v25 }
 0x2ae   : > { %v9439_v55 = vpop.f32.mrb[152].mxu0 }
 0x2af   : > { %v12889_v5 = vadd.f32 %v3251_v41, %v14002_v35  ;;  %v3254_v2 = vadd.f32 %v9246_v49, %v14003_v12  ;;  %v9440_v20 = vpop.f32.mrb[153].mxu0  ;;  %v10663_v49 = vld [vmem:[%s13897_s6 + $0x200] sm:$0xff]   ;;  %v14009_v35 = vld [vmem:[#allocation37_spill] sm:$0xff] }
 0x2b0   : > { %v9442_v53 = vpop.f32.mrb[154].mxu0  ;;  %v12895_v25 = vadd.f32 %v9440_v20, %v9439_v55  ;;  %10075 = vmatprep.subr.bf16.mxu1 %v10663_v49 }
 0x2b1   : > { %v12893_v57 = vadd.f32 %v3254_v2, %v14004_v13  ;;  %v9247_v50 = vpop.f32.mrb[216].mxu1  ;;  %v9443_v16 = vpop.f32.mrb[155].mxu0  ;;  %v14011_v2 = vld [vmem:[#allocation4_spill] sm:$0xff]  ;;  %10083 = vmatpush3.bf16.msra.mxu1 %v10663_v49 }
 0x2b2   : > { %v9248_v46 = vpop.f32.mrb[217].mxu1  ;;  %14006 = vst [vmem:[#allocation11_spill] sm:$0xff] %v12895_v25  ;;  %v12897_v61 = vadd.f32 %v9443_v16, %v9442_v53  ;;  %v14016_v49 = vld [vmem:[#allocation16_spill] sm:$0xff] }
 0x2b3   : > { %14005 = vst [vmem:[#allocation25_spill] sm:$0xff] %v12893_v57  ;;  %v9249_v15 = vadd.f32 %v9248_v46, %v9247_v50  ;;  %v9250_v24 = vpop.f32.mrb[218].mxu1  ;;  %v14012_v46 = vld [vmem:[#allocation38_spill] sm:$0xff]  ;;  %v14020_v25 = vld [vmem:[#allocation40_spill] sm:$0xff] }
 0x2b4   : > { %v9251_v29 = vpop.f32.mrb[219].mxu1  ;;  %14007 = vst [vmem:[#allocation12_spill] sm:$0xff] %v12897_v61  ;;  %v14017_v61 = vld [vmem:[#allocation39_spill] sm:$0xff] }
 0x2b5   : > { %v3259_v41 = vadd.f32 %v9249_v15, %v14008_v52  ;;  %v9252_v31 = vadd.f32 %v9251_v29, %v9250_v24  ;;  %v10664_v24 = vld [vmem:[%s13897_s6 + $0x208] sm:$0xff]  }
 0x2b6   : > { %v9445_v50 = vpop.f32.mrb[156].mxu0  ;;  %10076 = vmatprep.subr.bf16.mxu1 %v10664_v24 }
 0x2b7   : > { %v12904_v12 = vadd.f32 %v3259_v41, %v14009_v35  ;;  %v3262_v13 = vadd.f32 %v9252_v31, %v14011_v2  ;;  %v9446_v53 = vpop.f32.mrb[157].mxu0  ;;  %10084 = vmatpush3.bf16.msra.mxu1 %v10664_v24  ;;  %v10668_v24 = vld [vmem:[%s13897_s6 + $0x218] sm:$0xff]  }
 0x2b8   : > { %v9448_v16 = vpop.f32.mrb[158].mxu0  ;;  %v12913_v31 = vadd.f32 %v9446_v53, %v9445_v50 }
 0x2b9   : > { %14010 = vst [vmem:[#allocation27_spill] sm:$0xff] %v12904_v12  ;;  %v12908_v55 = vadd.f32 %v3262_v13, %v14012_v46  ;;  %v9253_v20 = vpop.f32.mrb[220].mxu1  ;;  %v9449_v41 = vpop.f32.mrb[159].mxu0 }
 0x2ba   : > { %v9254_v15 = vpop.f32.mrb[221].mxu1  ;;  %14014 = vst [vmem:[#allocation13_spill] sm:$0xff] %v12913_v31  ;;  %v12915_v2 = vadd.f32 %v9449_v41, %v9448_v16 }
 0x2bb   : > { %14013 = vst [vmem:[#allocation29_spill] sm:$0xff] %v12908_v55  ;;  %v9255_v29 = vadd.f32 %v9254_v15, %v9253_v20  ;;  %v9256_v52 = vpop.f32.mrb[222].mxu1  ;;  %v10666_v55 = vld [vmem:[%s13897_s6 + $0x210] sm:$0xff]  }
 0x2bc   : > { %v9257_v35 = vpop.f32.mrb[223].mxu1  ;;  %14015 = vst [vmem:[#allocation14_spill] sm:$0xff] %v12915_v2  ;;  %v14019_v20 = vld [vmem:[#allocation17_spill] sm:$0xff]  ;;  %10077 = vmatprep.subr.bf16.mxu1 %v10666_v55 }
 0x2bd   : > { %v3267_v13 = vadd.f32 %v9255_v29, %v14016_v49  ;;  %v9258_v46 = vadd.f32 %v9257_v35, %v9256_v52  ;;  %10085 = vmatpush3.bf16.msra.mxu1 %v10666_v55  ;;  %v14022_v49 = vld [vmem:[#allocation5_spill] sm:$0xff] }
 0x2be   : > { %v9531_v41 = vpop.f32.mrb[160].mxu0  ;;  %10078 = vmatprep.subr.bf16.mxu1 %v10668_v24 }
 0x2bf   : > { %v12922_v12 = vadd.f32 %v3267_v13, %v14017_v61  ;;  %v3270_v15 = vadd.f32 %v9258_v46, %v14019_v20  ;;  %v9532_v61 = vpop.f32.mrb[161].mxu0  ;;  %v12937_v20 = vld [vmem:[%s13897_s6 + $0x40] sm:$0xff]  }
 0x2c0   : > { %v12932_v55 = vadd.f32 %v9532_v61, %v9531_v41  ;;  %9819 = vmatprep.subr.bf16.mxu0 %v12937_v20  ;;  %v10672_v61 = vld [vmem:[%s13897_s6 + $0x228] sm:$0xff]  }
 0x2c1   : > { %14018 = vst [vmem:[#allocation31_spill] sm:$0xff] %v12922_v12  ;;  %v12926_v50 = vadd.f32 %v3270_v15, %v14020_v25  ;;  %v9339_v53 = vpop.f32.mrb[224].mxu1  ;;  %10086 = vmatpush3.bf16.msra.mxu1 %v10668_v24  ;;  %v9534_v25 = vpop.f32.mrb[162].mxu0  ;;  %v10670_v15 = vld [vmem:[%s13897_s6 + $0x220] sm:$0xff]   ;;  %v14026_v24 = vld [vmem:[#allocation6_spill] sm:$0xff] }
 0x2c2   : > { %v9340_v16 = vpop.f32.mrb[225].mxu1  ;;  %14023 = vst [vmem:[#allocation22_spill] sm:$0xff] %v12932_v55  ;;  %10079 = vmatprep.subr.bf16.mxu1 %v10670_v15 }
 0x2c3   : > { %14021 = vst [vmem:[#allocation33_spill] sm:$0xff] %v12926_v50  ;;  %v9341_v29 = vadd.f32 %v9340_v16, %v9339_v53  ;;  %v9342_v52 = vpop.f32.mrb[226].mxu1  ;;  %v9535_v53 = vpop.f32.mrb[163].mxu0  ;;  %v14024_v16 = vld [vmem:[#allocation18_spill] sm:$0xff] }
 0x2c4   : > { %v9343_v35 = vpop.f32.mrb[227].mxu1 }
 0x2c5   : > { %v3678_v13 = vadd.f32 %v9341_v29, %v14022_v49  ;;  %v9344_v46 = vadd.f32 %v9343_v35, %v9342_v52  ;;  %v12946_v29 = vadd.f32 %v9535_v53, %v9534_v25  ;;  %10087 = vmatpush3.bf16.msra.mxu1 %v10670_v15  ;;  %v14028_v52 = vld [vmem:[#allocation19_spill] sm:$0xff] }
 0x2c6   : > { %10080 = vmatprep.subr.bf16.mxu1 %v10672_v61  ;;  %v14030_v53 = vld [vmem:[#allocation7_spill] sm:$0xff] }
 0x2c7   : > { %v12943_v50 = vadd.f32 %v3678_v13, %v14024_v16  ;;  %v3681_v2 = vadd.f32 %v9344_v46, %v14026_v24  ;;  %14027 = vst [vmem:[#allocation26_spill] sm:$0xff] %v12946_v29  ;;  %v9537_v16 = vpop.f32.mrb[164].mxu0  ;;  %v14032_v29 = vld [vmem:[#allocation20_spill] sm:$0xff] }
 0x2c8   : > { %v9538_v25 = vpop.f32.mrb[165].mxu0 }
 0x2c9   : > { %14025 = vst [vmem:[#allocation24_spill] sm:$0xff] %v12943_v50  ;;  %v12950_v41 = vadd.f32 %v3681_v2, %v14028_v52  ;;  %v9345_v35 = vpop.f32.mrb[228].mxu1  ;;  %10088 = vmatpush3.bf16.msra.mxu1 %v10672_v61  ;;  %v12956_v15 = vadd.f32 %v9538_v25, %v9537_v16  ;;  %v9540_v2 = vpop.f32.mrb[166].mxu0  ;;  %v10674_v52 = vld [vmem:[%s13897_s6 + $0x230] sm:$0xff]   ;;  %v10676_v16 = vld [vmem:[%s13897_s6 + $0x238] sm:$0xff]  }
 0x2ca   : > { %v9346_v49 = vpop.f32.mrb[229].mxu1  ;;  %10081 = vmatprep.subr.bf16.mxu1 %v10674_v52 }
 0x2cb   : > { %14029 = vst [vmem:[#allocation28_spill] sm:$0xff] %v12950_v41  ;;  %v9347_v55 = vadd.f32 %v9346_v49, %v9345_v35  ;;  %v9348_v13 = vpop.f32.mrb[230].mxu1  ;;  %14031 = vst [vmem:[#allocation30_spill] sm:$0xff] %v12956_v15  ;;  %v9541_v41 = vpop.f32.mrb[167].mxu0  ;;  %v14034_v35 = vld [vmem:[#allocation8_spill] sm:$0xff] }
 0x2cc   : > { %v9349_v46 = vpop.f32.mrb[231].mxu1  ;;  %v12965_v31 = vadd.f32 %v9541_v41, %v9540_v2  ;;  %v14038_v41 = vld [vmem:[#allocation21_spill] sm:$0xff] }
 0x2cd   : > { %v3686_v24 = vadd.f32 %v9347_v55, %v14030_v53  ;;  %v9350_v50 = vadd.f32 %v9349_v46, %v9348_v13  ;;  %10089 = vmatpush3.bf16.msra.mxu1 %v10674_v52 }
 0x2ce   : > { %14035 = vst [vmem:[#allocation34_spill] sm:$0xff] %v12965_v31  ;;  %v9543_v13 = vpop.f32.mrb[168].mxu0  ;;  %10082 = vmatprep.subr.bf16.mxu1 %v10676_v16 }
 0x2cf   : > { %v12962_v12 = vadd.f32 %v3686_v24, %v14032_v29  ;;  %v3689_v49 = vadd.f32 %v9350_v50, %v14034_v35  ;;  %v9544_v25 = vpop.f32.mrb[169].mxu0 }
 0x2d0   : > { %v12973_v24 = vadd.f32 %v9544_v25, %v9543_v13 }
 0x2d1   : > { %14033 = vst [vmem:[#allocation32_spill] sm:$0xff] %v12962_v12  ;;  %v12968_v55 = vadd.f32 %v3689_v49, %v12699_v54  ;;  %v9351_v61 = vpop.f32.mrb[232].mxu1  ;;  %10090 = vmatpush3.bf16.msra.mxu1 %v10676_v16  ;;  %v9546_v54 = vpop.f32.mrb[170].mxu0  ;;  %v14039_v49 = vld [vmem:[#allocation10_spill] sm:$0xff]  ;;  %v14041_v12 = vld [vmem:[#allocation9_spill] sm:$0xff] }
 0x2d2   : > { %v9352_v46 = vpop.f32.mrb[233].mxu1  ;;  %14037 = vst [vmem:[#allocation15_spill] sm:$0xff] %v12973_v24  ;;  %v9547_v35 = vpop.f32.mrb[171].mxu0 }
 0x2d3   : > { %14036 = vst [vmem:[#allocation35_spill] sm:$0xff] %v12968_v55  ;;  %v9353_v53 = vadd.f32 %v9352_v46, %v9351_v61  ;;  %v9354_v29 = vpop.f32.mrb[234].mxu1  ;;  %v12980_v15 = vadd.f32 %v9547_v35, %v9546_v54 }
 0x2d4   : > { %v9355_v50 = vpop.f32.mrb[235].mxu1 }
 0x2d5   : > { %v3694_v2 = vadd.f32 %v9353_v53, %v14038_v41  ;;  %v9356_v52 = vadd.f32 %v9355_v50, %v9354_v29 }
 0x2d6   : > { %v9549_v46 = vpop.f32.mrb[172].mxu0 }
 0x2d7   : > { %v12977_v55 = vadd.f32 %v3694_v2, %v14039_v49  ;;  %v3697_v31 = vadd.f32 %v9356_v52, %v14041_v12  ;;  %v9550_v24 = vpop.f32.mrb[173].mxu0 }
 0x2d8   : > { %v12985_v53 = vadd.f32 %v9550_v24, %v9549_v46  ;;  %v9552_v2 = vpop.f32.mrb[174].mxu0 }
 0x2d9   : > { %14040 = vst [vmem:[#allocation36_spill] sm:$0xff] %v12977_v55  ;;  %v12983_v61 = vadd.f32 %v3697_v31, %v12718_v58  ;;  %v9357_v13 = vpop.f32.mrb[236].mxu1  ;;  %v9553_v49 = vpop.f32.mrb[175].mxu0 }
 0x2da   : > { %v9358_v25 = vpop.f32.mrb[237].mxu1  ;;  %v12992_v31 = vadd.f32 %v9553_v49, %v9552_v2 }
 0x2db   : > { %14042 = vst [vmem:[#allocation3_spill] sm:$0xff] %v12983_v61  ;;  %v9359_v16 = vadd.f32 %v9358_v25, %v9357_v13  ;;  %v9360_v57 = vpop.f32.mrb[238].mxu1 }
 0x2dc   : > { %v9361_v29 = vpop.f32.mrb[239].mxu1 }
 0x2dd   : > { %v3702_v50 = vadd.f32 %v9359_v16, %v12721_v26  ;;  %v9362_v41 = vadd.f32 %v9361_v29, %v9360_v57 }
 0x2de   : > { %v9555_v35 = vpop.f32.mrb[176].mxu0 }
 0x2df   : > { %v12989_v12 = vadd.f32 %v3702_v50, %v12732_v11  ;;  %v3705_v58 = vadd.f32 %v9362_v41, %v12723_v28  ;;  %v9556_v13 = vpop.f32.mrb[177].mxu0 }
 0x2e0   : > { %v12997_v26 = vadd.f32 %v9556_v13, %v9555_v35  ;;  %v9558_v29 = vpop.f32.mrb[178].mxu0 }
 0x2e1   : > { %v12995_v52 = vadd.f32 %v3705_v58, %v12736_v36  ;;  %v9363_v54 = vpop.f32.mrb[240].mxu1  ;;  %v9559_v50 = vpop.f32.mrb[179].mxu0 }
 0x2e2   : > { %v9364_v24 = vpop.f32.mrb[241].mxu1  ;;  %v13004_v41 = vadd.f32 %v9559_v50, %v9558_v29 }
 0x2e3   : > { %14043 = vst [vmem:[#allocation37_spill] sm:$0xff] %v12995_v52  ;;  %v9365_v46 = vadd.f32 %v9364_v24, %v9363_v54  ;;  %v9366_v25 = vpop.f32.mrb[242].mxu1 }
 0x2e4   : > { %v9367_v57 = vpop.f32.mrb[243].mxu1 }
 0x2e5   : > { %v3710_v16 = vadd.f32 %v9365_v46, %v12739_v0  ;;  %v9368_v11 = vadd.f32 %v9367_v57, %v9366_v25 }
 0x2e6   : > { %v9561_v58 = vpop.f32.mrb[180].mxu0 }
 0x2e7   : > { %v13001_v28 = vadd.f32 %v3710_v16, %v12747_v33  ;;  %v3713_v36 = vadd.f32 %v9368_v11, %v12744_v27  ;;  %v9562_v35 = vpop.f32.mrb[181].mxu0 }
 0x2e8   : > { %v13009_v0 = vadd.f32 %v9562_v35, %v9561_v58  ;;  %v9564_v57 = vpop.f32.mrb[182].mxu0 }
 0x2e9   : > { %v13007_v2 = vadd.f32 %v3713_v36, %v12751_v56  ;;  %v9369_v49 = vpop.f32.mrb[244].mxu1  ;;  %v9565_v16 = vpop.f32.mrb[183].mxu0 }
 0x2ea   : > { %v9370_v54 = vpop.f32.mrb[245].mxu1  ;;  %v13016_v11 = vadd.f32 %v9565_v16, %v9564_v57 }
 0x2eb   : > { %v9371_v24 = vadd.f32 %v9370_v54, %v9369_v49  ;;  %v9372_v13 = vpop.f32.mrb[246].mxu1 }
 0x2ec   : > { %v9373_v46 = vpop.f32.mrb[247].mxu1 }
 0x2ed   : > { %v3718_v25 = vadd.f32 %v9371_v24, %v12754_v6  ;;  %v9374_v33 = vadd.f32 %v9373_v46, %v9372_v13 }
 0x2ee   : > { %v9567_v36 = vpop.f32.mrb[184].mxu0 }
 0x2ef   : > { %v13013_v27 = vadd.f32 %v3718_v25, %v12759_v32  ;;  %v3721_v56 = vadd.f32 %v9374_v33, %v12756_v40  ;;  %v9568_v58 = vpop.f32.mrb[185].mxu0 }
 0x2f0   : > { %v13021_v6 = vadd.f32 %v9568_v58, %v9567_v36  ;;  %v9570_v46 = vpop.f32.mrb[186].mxu0 }
 0x2f1   : > { %v13019_v29 = vadd.f32 %v3721_v56, %v12763_v42  ;;  %v9375_v50 = vpop.f32.mrb[248].mxu1  ;;  %v9571_v25 = vpop.f32.mrb[187].mxu0 }
 0x2f2   : > { %v9376_v49 = vpop.f32.mrb[249].mxu1  ;;  %v13028_v33 = vadd.f32 %v9571_v25, %v9570_v46 }
 0x2f3   : > { %v9377_v54 = vadd.f32 %v9376_v49, %v9375_v50  ;;  %v9378_v35 = vpop.f32.mrb[250].mxu1 }
 0x2f4   : > { %v9379_v24 = vpop.f32.mrb[251].mxu1 }
 0x2f5   : > { %v3726_v13 = vadd.f32 %v9377_v54, %v12766_v1  ;;  %v9380_v32 = vadd.f32 %v9379_v24, %v9378_v35 }
 0x2f6   : > { %v9573_v56 = vpop.f32.mrb[188].mxu0 }
 0x2f7   : > { %v13025_v40 = vadd.f32 %v3726_v13, %v12771_v30  ;;  %v3729_v42 = vadd.f32 %v9380_v32, %v12768_v47  ;;  %v9574_v36 = vpop.f32.mrb[189].mxu0 }
 0x2f8   : > { %v13033_v1 = vadd.f32 %v9574_v36, %v9573_v56  ;;  %v9576_v24 = vpop.f32.mrb[190].mxu0 }
 0x2f9   : > { %v13031_v57 = vadd.f32 %v3729_v42, %v12775_v62  ;;  %v9381_v16 = vpop.f32.mrb[252].mxu1  ;;  %v9577_v13 = vpop.f32.mrb[191].mxu0 }
 0x2fa   : > { %v9382_v50 = vpop.f32.mrb[253].mxu1  ;;  %v13040_v32 = vadd.f32 %v9577_v13, %v9576_v24 }
 0x2fb   : > { %v9383_v49 = vadd.f32 %v9382_v50, %v9381_v16  ;;  %v9384_v58 = vpop.f32.mrb[254].mxu1 }
 0x2fc   : > { %v9385_v54 = vpop.f32.mrb[255].mxu1 }
 0x2fd   : > { %v3734_v35 = vadd.f32 %v9383_v49, %v12778_v63  ;;  %v9386_v30 = vadd.f32 %v9385_v54, %v9384_v58  ;;  %v5224_v49 = vpop.permute.xlu0 %5223 }
 0x2ff   : > { %v13037_v47 = vadd.f32 %v3734_v35, %v12783_v60  ;;  %v3737_v62 = vadd.f32 %v9386_v30, %v12780_v23  ;;  %v13049_v60 = vld [vmem:[%s13894_s3] ss:$0 sm:$0xff] }
 0x301   : > { %v13043_v46 = vadd.f32 %v3737_v62, %v12787_v39  ;;  %v9467_v25 = vpop.f32.mrb[0].mxu1 }
 0x302   : > { %v9468_v42 = vpop.f32.mrb[1].mxu1 }
 0x303   : > { %14044 = vst [vmem:[#allocation4_spill] sm:$0xff] %v13043_v46  ;;  %v9469_v16 = vadd.f32 %v9468_v42, %v9467_v25  ;;  %v9470_v56 = vpop.f32.mrb[2].mxu1  ;;  %v5229_v42 = vpop.permute.xlu0 %5228 }
 0x304   : > { %v9471_v50 = vpop.f32.mrb[3].mxu1 }
 0x305   : > { %v4621_v63 = vadd.f32 %v9469_v16, %v12790_v18  ;;  %v9472_v36 = vadd.f32 %v9471_v50, %v9470_v56 }
 0x307   : > { %v4683_v23 = vadd.f32 %v4621_v63, %v12800_v45  ;;  %v4624_v58 = vadd.f32 %v9472_v36, %v12795_v37  ;;  %v5234_v36 = vpop.permute.xlu1 %5233 }
 0x309   : > { %v4684_v39 = vadd.f32 %v4624_v58, %v12808_v8  ;;  %v9473_v54 = vpop.f32.mrb[4].mxu1  ;;  %v5173_v35 = vadd.f32 %v13049_v60, %v4683_v23 }
 0x30a   : > { %v9474_v30 = vpop.f32.mrb[5].mxu1 }
 0x30b   : > { %v5189_v24 = vmax.f32 %v5173_v35, 0.0  ;;  %v9475_v13 = vadd.f32 %v9474_v30, %v9473_v54  ;;  %v9476_v18 = vpop.f32.mrb[6].mxu1  ;;  %v5174_v62 = vadd.f32 %v13049_v60, %v4684_v39  ;;  %v5390_v39 = vld [vmem:[#allocation2] sm:$0xf8] }
 0x30c   : > { %v9477_v25 = vpop.f32.mrb[7].mxu1 }
 0x30d   : > { %v4629_v16 = vadd.f32 %v9475_v13, %v12810_v43  ;;  %v9478_v56 = vadd.f32 %v9477_v25, %v9476_v18  ;;  %v5190_v50 = vmax.f32 %v5174_v62, 0.0  ;;  %v5301_v45 = vmul.f32 %v5224_v49, %v5189_v24  ;;  %v5239_v25 = vpop.permute.xlu1 %5238 }
 0x30f   : > { %v4685_v37 = vadd.f32 %v4629_v16, %v12820_v34  ;;  %v4632_v8 = vadd.f32 %v9478_v56, %v12816_v14  ;;  %v5302_v63 = vmul.f32 %v5229_v42, %v5190_v50  ;;  %v5417_v34 = vshrl.u32 %v5390_v39, 16 }
 0x311   : > { %v4686_v23 = vadd.f32 %v4632_v8, %v12828_v38  ;;  %v5317_v58 = vpack.c.bf16 %v5302_v63, %v5301_v45  ;;  %v5175_v54 = vadd.f32 %v13049_v60, %v4685_v37  ;;  %v9479_v35 = vpop.f32.mrb[8].mxu1  ;;  %v5420_v38 = vshll.u32 %v5390_v39, 16 }
 0x312   : > { %v9480_v30 = vpop.f32.mrb[9].mxu1  ;;  %v5419_v45 = vrot.slane %v5417_v34, 3 }
 0x313   : > { %v5334_v61 = vrot.slane %v5317_v58, 4  ;;  %v5191_v52 = vmax.f32 %v5175_v54, 0.0  ;;  %v9481_v43 = vadd.f32 %v9480_v30, %v9479_v35  ;;  %v5176_v13 = vadd.f32 %v13049_v60, %v4686_v23  ;;  %v9482_v49 = vpop.f32.mrb[10].mxu1 }
 0x314   : > { %v9483_v24 = vpop.f32.mrb[11].mxu1  ;;  %v5422_v58 = vrot.slane %v5420_v38, 4 }
 0x315   : > { %5358 = vst [vmem:[#allocation2 + $0x8] sm:$0xf0] %v5334_v61  ;;  %v4637_v14 = vadd.f32 %v9481_v43, %v12830_v9  ;;  %v5192_v18 = vmax.f32 %v5176_v13, 0.0  ;;  %v9484_v62 = vadd.f32 %v9483_v24, %v9482_v49  ;;  %v5303_v42 = vmul.f32 %v5234_v36, %v5191_v52  ;;  %v5249_v49 = vpop.permute.xlu1 %5248  ;;  %v5244_v24 = vpop.permute.xlu0 %5243 }
 0x316   : > { %v5423_v13 = vor.u32 %v5422_v58, %v5419_v45 }
 0x317   : > { %v4687_v16 = vadd.f32 %v4637_v14, %v12840_v51  ;;  %v5304_v56 = vmul.f32 %v5239_v25, %v5192_v18  ;;  %v4640_v50 = vadd.f32 %v9484_v62, %v12832_v48 }
 0x319   : > { %v5318_v37 = vpack.c.bf16 %v5304_v56, %v5303_v42  ;;  %v4688_v8 = vadd.f32 %v4640_v50, %v12848_v59  ;;  %v5177_v63 = vadd.f32 %v13049_v60, %v4687_v16  ;;  %v9485_v23 = vpop.f32.mrb[12].mxu1 }
 0x31a   : > { %v9486_v9 = vpop.f32.mrb[13].mxu1 }
 0x31b   : > { %v5335_v54 = vrot.slane %v5318_v37, 4  ;;  %v5178_v35 = vadd.f32 %v13049_v60, %v4688_v8  ;;  %v5193_v39 = vmax.f32 %v5177_v63, 0.0  ;;  %v9487_v52 = vadd.f32 %v9486_v9, %v9485_v23  ;;  %v9488_v36 = vpop.f32.mrb[14].mxu1 }
 0x31c   : > { %v9489_v51 = vpop.f32.mrb[15].mxu1  ;;  %v13068_v30 = vld [vmem:[#allocation2 + $0x8] sm:$0xff] }
 0x31d   : > { %v13071_v48 = vsel %vm5333_vm1, %v5334_v61, %v5335_v54  ;;  %v5194_v43 = vmax.f32 %v5178_v35, 0.0  ;;  %v4645_v59 = vadd.f32 %v9487_v52, %v12850_v44  ;;  %v9490_v34 = vadd.f32 %v9489_v51, %v9488_v36  ;;  %v5254_v51 = vpop.permute.xlu0 %5253 }
 0x31e   : > { %5359 = vst [vmem:[#allocation2 + $0x10] sm:$0xff] %v13071_v48  ;;  %v5425_v14 = vshrl.u32 %v13068_v30, 16  ;;  %v5428_v18 = vshll.u32 %v13068_v30, 16  ;;  %v5434_v62 = vshrl.u32 %v13071_v48, 16  ;;  %v5305_v25 = vmul.f32 %v5244_v24, %v5193_v39 }
 0x31f   : > { %v5306_v38 = vmul.f32 %v5249_v49, %v5194_v43  ;;  %v4689_v61 = vadd.f32 %v4645_v59, %v12860_v4  ;;  %v5437_v42 = vshll.u32 %v13071_v48, 16  ;;  %v4648_v44 = vadd.f32 %v9490_v34, %v12852_v10 }
 0x320   : > { %v5427_v16 = vrot.slane %v5425_v14, 3  ;;  %v5430_v56 = vrot.slane %v5428_v18, 4  ;;  %v5436_v50 = vrot.slane %v5434_v62, 3  ;;  %v5905_v35 = vrot.slane %v5425_v14, 4 }
 0x321   : > { %v5319_v45 = vpack.c.bf16 %v5306_v38, %v5305_v25  ;;  %v5179_v37 = vadd.f32 %v13049_v60, %v4689_v61  ;;  %v9491_v8 = vpop.f32.mrb[16].mxu1  ;;  %v5439_v63 = vrot.slane %v5437_v42, 4  ;;  %v4690_v23 = vadd.f32 %v4648_v44, %v12868_v3  ;;  %v10667_v61 = vld [vmem:[%s13897_s6 + $0x48] sm:$0xff]  }
 0x322   : > { %v9492_v58 = vpop.f32.mrb[17].mxu1  ;;  %v5431_v9 = vor.u32 %v5430_v56, %v5427_v16  ;;  %v13900_v24 = vrot.slane %v13071_v48, 4  ;;  %v5906_v34 = vrot.slane %v5428_v18, 5  ;;  %v5693_v46 = vrot.slane %v13068_v30, 4 }
 0x323   : > { %v13083_v39 = vrot.slane %v5319_v45, 4  ;;  %v5195_v4 = vmax.f32 %v5179_v37, 0.0  ;;  %v9493_v52 = vadd.f32 %v9492_v58, %v9491_v8  ;;  %v9494_v36 = vpop.f32.mrb[18].mxu1  ;;  %v5440_v10 = vor.u32 %v5439_v63, %v5436_v50 }
 0x324   : > { %v5180_v43 = vadd.f32 %v13049_v60, %v4690_v23  ;;  %v9495_v59 = vpop.f32.mrb[19].mxu1  ;;  %v5432_v49 = vsel %vm5415_vm2, %v5423_v13, %v5431_v9  ;;  %v13103_v45 = vor.u32 %v5906_v34, %v5905_v35  ;;  %v5909_v23 = vrot.slane %v5434_v62, 4 }
 0x325   : > { %v13090_v3 = vsel %vm5333_vm1, %v5335_v54, %v13083_v39  ;;  %v5307_v14 = vmul.f32 %v5254_v51, %v5195_v4  ;;  %v4653_v38 = vadd.f32 %v9493_v52, %v12870_v7  ;;  %v9496_v25 = vadd.f32 %v9495_v59, %v9494_v36  ;;  %9803 = vmatprep.mubr.bf16.mxu0 %v5432_v49  ;;  %v5259_v54 = vpop.permute.xlu1 %5258 }
 0x326   : > { %5360 = vst [vmem:[#allocation2 + $0x18] sm:$0xff] %v13090_v3  ;;  %v5196_v44 = vmax.f32 %v5180_v43, 0.0  ;;  %v5441_v13 = vsel %vm5415_vm2, %v5431_v9, %v5440_v10  ;;  %v5443_v18 = vshrl.u32 %v13090_v3, 16  ;;  %v5446_v16 = vshll.u32 %v13090_v3, 16 }
 0x327   : > { %v4691_v56 = vadd.f32 %v4653_v38, %v12877_v17  ;;  %v4656_v7 = vadd.f32 %v9496_v25, %v12873_v21  ;;  %9804 = vmatmul.mubr.bf16.vlgmr.msra.gmra.mrb[192].mxu0 %v5441_v13  ;;  %v5697_v50 = vrot.slane %v13090_v3, 4  ;;  %v10669_v21 = vld [vmem:[%s13897_s6 + $0x50] sm:$0xff]   ;;  %v5910_v62 = vrot.slane %v5437_v42, 5  ;;  %v14045_v13 = vld [vmem:[#allocation23_spill] sm:$0xff]  ;;  %v10671_v42 = vld [vmem:[%s13897_s6 + $0x58] sm:$0xff]  }
 0x328   : > { %v5308_v37 = vmul.f32 %v5259_v54, %v5196_v44  ;;  %v5445_v8 = vrot.slane %v5443_v18, 3  ;;  %v5448_v63 = vrot.slane %v5446_v16, 4  ;;  %9820 = vmatpush3.bf16.msra.mxu0 %v12937_v20  ;;  %v5913_v36 = vrot.slane %v5443_v18, 4  ;;  %v5264_v44 = vpop.permute.xlu0 %5263 }
 0x329   : > { %v5181_v58 = vadd.f32 %v13049_v60, %v4691_v56  ;;  %v4692_v9 = vadd.f32 %v4656_v7, %v12881_v22  ;;  %v9497_v4 = vpop.f32.mrb[20].mxu1  ;;  %9821 = vmatprep.subr.bf16.mxu0 %v10667_v61  ;;  %v13114_v17 = vsel %vm5333_vm1, %v13900_v24, %v5697_v50  ;;  %v5914_v49 = vrot.slane %v5446_v16, 5  ;;  %v5269_v16 = vpop.permute.xlu1 %5268 }
 0x32a   : > { %v5320_v35 = vpack.c.bf16 %v5308_v37, %v5307_v14  ;;  %v9498_v52 = vpop.f32.mrb[21].mxu1  ;;  %v13116_v20 = vor.u32 %v5448_v63, %v5445_v8  ;;  %v5911_v25 = vor.u32 %v5910_v62, %v5909_v23 }
 0x32b   : > { %v5197_v51 = vmax.f32 %v5181_v58, 0.0  ;;  %v5182_v22 = vadd.f32 %v13049_v60, %v4692_v9  ;;  %v9499_v43 = vadd.f32 %v9498_v52, %v9497_v4  ;;  %v9500_v59 = vpop.f32.mrb[22].mxu1  ;;  %v14048_v52 = vld [vmem:[#allocation25_spill] sm:$0xff] }
 0x32c   : > { %v5339_v34 = vrot.slane %v5320_v35, 4  ;;  %v9501_v3 = vpop.f32.mrb[23].mxu1  ;;  %v5450_v38 = vsel %vm5415_vm2, %v5440_v10, %v13116_v20  ;;  %9822 = vmatpush3.bf16.msra.mxu0 %v10667_v61  ;;  %v13131_v10 = vsel %vm5896_vm3, %v13103_v45, %v5911_v25  ;;  %v5915_v61 = vor.u32 %v5914_v49, %v5913_v36 }
 0x32d   : > { %v5198_v14 = vmax.f32 %v5182_v22, 0.0  ;;  %v4661_v54 = vadd.f32 %v9499_v43, %v14045_v13  ;;  %v9502_v56 = vadd.f32 %v9501_v3, %v9500_v59  ;;  %9807 = vmatprep.mubr.bf16.mxu0 %v5450_v38  ;;  %9823 = vmatprep.subr.bf16.mxu0 %v10669_v21  ;;  %v5309_v7 = vmul.f32 %v5264_v44, %v5197_v51 }
 0x32e   : > { %v13127_v18 = vsel %vm5333_vm1, %v13083_v39, %v5339_v34  ;;  %14046 = vst [vmem:[#allocation38_spill] sm:$0xff] %v13131_v10  ;;  %v13140_v9 = vsel %vm5896_vm3, %v5911_v25, %v5915_v61 }
 0x32f   : > { %5361 = vst [vmem:[#allocation2 + $0x20] sm:$0xff] %v13127_v18  ;;  %v5310_v37 = vmul.f32 %v5269_v16, %v5198_v14  ;;  %v4693_v8 = vadd.f32 %v4661_v54, %v12889_v5  ;;  %v4664_v63 = vadd.f32 %v9502_v56, %v12886_v19  ;;  %v5452_v23 = vshrl.u32 %v13127_v18, 16  ;;  %14047 = vst [vmem:[#allocation16_spill] sm:$0xff] %v13140_v9  ;;  %v10673_v19 = vld [vmem:[%s13897_s6 + $0x60] sm:$0xff]   ;;  %v5274_v14 = vpop.permute.xlu0 %5273 }
 0x330   : > { %v5455_v58 = vshll.u32 %v13127_v18, 16  ;;  %9824 = vmatpush3.bf16.msra.mxu0 %v10669_v21  ;;  %v5699_v39 = vrot.slane %v13127_v18, 4 }
 0x331   : > { %v5321_v4 = vpack.c.bf16 %v5310_v37, %v5309_v7  ;;  %v5183_v35 = vadd.f32 %v13049_v60, %v4693_v8  ;;  %v4694_v62 = vadd.f32 %v4664_v63, %v14048_v52  ;;  %v9503_v36 = vpop.f32.mrb[24].mxu1  ;;  %v5454_v51 = vrot.slane %v5452_v23, 3  ;;  %9825 = vmatprep.subr.bf16.mxu0 %v10671_v42  ;;  %v10675_v8 = vld [vmem:[%s13897_s6 + $0x68] sm:$0xff]   ;;  %v5279_v63 = vpop.permute.xlu1 %5278 }
 0x332   : > { %v9504_v5 = vpop.f32.mrb[25].mxu1  ;;  %v5457_v22 = vrot.slane %v5455_v58, 4  ;;  %v13148_v21 = vsel %vm5333_vm1, %v5697_v50, %v5699_v39  ;;  %v5917_v43 = vrot.slane %v5452_v23, 4  ;;  %v5918_v59 = vrot.slane %v5455_v58, 5  ;;  %v14049_v50 = vld [vmem:[#allocation11_spill] sm:$0xff] }
 0x333   : > { %v5341_v49 = vrot.slane %v5321_v4, 4  ;;  %v5199_v3 = vmax.f32 %v5183_v35, 0.0  ;;  %v5184_v38 = vadd.f32 %v13049_v60, %v4694_v62  ;;  %v9505_v25 = vadd.f32 %v9504_v5, %v9503_v36  ;;  %v9506_v44 = vpop.f32.mrb[26].mxu1  ;;  %v14050_v35 = vld [vmem:[#allocation27_spill] sm:$0xff] }
 0x334   : > { %v9507_v13 = vpop.f32.mrb[27].mxu1  ;;  %v5458_v54 = vor.u32 %v5457_v22, %v5454_v51  ;;  %9826 = vmatpush3.bf16.msra.mxu0 %v10671_v42  ;;  %v5919_v56 = vor.u32 %v5918_v59, %v5917_v43  ;;  %v14052_v51 = vld [vmem:[#allocation12_spill] sm:$0xff] }
 0x335   : > { %v13152_v18 = vsel %vm5333_vm1, %v5339_v34, %v5341_v49  ;;  %v5311_v16 = vmul.f32 %v5274_v14, %v5199_v3  ;;  %v5200_v7 = vmax.f32 %v5184_v38, 0.0  ;;  %v4669_v37 = vadd.f32 %v9505_v25, %v14049_v50  ;;  %9827 = vmatprep.subr.bf16.mxu0 %v10673_v19  ;;  %v14053_v14 = vld [vmem:[#allocation29_spill] sm:$0xff] }
 0x336   : > { %5362 = vst [vmem:[#allocation2 + $0x28] sm:$0xff] %v13152_v18  ;;  %v9508_v23 = vadd.f32 %v9507_v13, %v9506_v44  ;;  %v5459_v42 = vsel %vm5415_vm2, %v13116_v20, %v5458_v54  ;;  %v5461_v58 = vshrl.u32 %v13152_v18, 16  ;;  %v5464_v34 = vshll.u32 %v13152_v18, 16 }
 0x337   : > { %v5312_v4 = vmul.f32 %v5279_v63, %v5200_v7  ;;  %v4695_v52 = vadd.f32 %v4669_v37, %v14050_v35  ;;  %9808 = vmatmul.mubr.bf16.gmra.mrb[196].mxu0 %v5459_v42  ;;  %v5701_v62 = vrot.slane %v13152_v18, 4  ;;  %v13166_v36 = vsel %vm5896_vm3, %v5915_v61, %v5919_v56  ;;  %v10677_v7 = vld [vmem:[%s13897_s6 + $0x70] sm:$0xff]  }
 0x338   : > { %14051 = vst [vmem:[#allocation39_spill] sm:$0xff] %v13166_v36  ;;  %v4672_v5 = vadd.f32 %v9508_v23, %v14052_v51  ;;  %v5463_v22 = vrot.slane %v5461_v58, 3  ;;  %v5466_v43 = vrot.slane %v5464_v34, 4  ;;  %9828 = vmatpush3.bf16.msra.mxu0 %v10673_v19  ;;  %v5921_v59 = vrot.slane %v5461_v58, 4 }
 0x339   : > { %v5322_v20 = vpack.c.bf16 %v5312_v4, %v5311_v16  ;;  %v5185_v3 = vadd.f32 %v13049_v60, %v4695_v52  ;;  %v9509_v38 = vpop.f32.mrb[28].mxu1  ;;  %9829 = vmatprep.subr.bf16.mxu0 %v10675_v8  ;;  %v13171_v25 = vsel %vm5333_vm1, %v5699_v39, %v5701_v62  ;;  %v5922_v44 = vrot.slane %v5464_v34, 5  ;;  %v14054_v34 = vld [vmem:[#allocation13_spill] sm:$0xff]  ;;  %v10678_v52 = vld [vmem:[%s13897_s6 + $0x78] sm:$0xff]  }
 0x33a   : > { %v4696_v13 = vadd.f32 %v4672_v5, %v14053_v14  ;;  %v9510_v18 = vpop.f32.mrb[29].mxu1  ;;  %v5467_v61 = vor.u32 %v5466_v43, %v5463_v22 }
 0x33b   : > { %v5343_v50 = vrot.slane %v5322_v20, 4  ;;  %v9511_v19 = vadd.f32 %v9510_v18, %v9509_v38  ;;  %v9512_v37 = vpop.f32.mrb[30].mxu1  ;;  %v5923_v16 = vor.u32 %v5922_v44, %v5921_v59  ;;  %v5201_v63 = vmax.f32 %v5185_v3, 0.0  ;;  %v5289_v59 = vpop.permute.xlu1 %5288 }
 0x33c   : > { %v5186_v23 = vadd.f32 %v13049_v60, %v4696_v13  ;;  %v9513_v42 = vpop.f32.mrb[31].mxu1  ;;  %v5468_v39 = vsel %vm5415_vm2, %v5458_v54, %v5467_v61  ;;  %9830 = vmatpush3.bf16.msra.mxu0 %v10675_v8  ;;  %v5284_v54 = vpop.permute.xlu0 %5283  ;;  %v14055_v8 = vld [vmem:[#allocation31_spill] sm:$0xff] }
 0x33d   : > { %v5344_v58 = vsel %vm5333_vm1, %v5341_v49, %v5343_v50  ;;  %v4677_v4 = vadd.f32 %v9511_v19, %v14054_v34  ;;  %v9514_v35 = vadd.f32 %v9513_v42, %v9512_v37  ;;  %9811 = vmatprep.mubr.bf16.mxu0 %v5468_v39  ;;  %9831 = vmatprep.subr.bf16.mxu0 %v10677_v7  ;;  %v14056_v49 = vld [vmem:[#allocation14_spill] sm:$0xff]  ;;  %v14058_v37 = vld [vmem:[#allocation33_spill] sm:$0xff]  ;;  %v13196_v39 = vld [vmem:[%s13897_s6 + $0x80] sm:$0xff]  }
 0x33e   : > { %5363 = vst [vmem:[#allocation2 + $0x30] sm:$0xff] %v5344_v58  ;;  %v5202_v51 = vmax.f32 %v5186_v23, 0.0  ;;  %v5470_v5 = vshrl.u32 %v5344_v58, 16  ;;  %v5473_v22 = vshll.u32 %v5344_v58, 16  ;;  %v13184_v43 = vrot.slane %v5344_v58, 4 }
 0x33f   : > { %v4697_v20 = vadd.f32 %v4677_v4, %v14055_v8  ;;  %v4680_v3 = vadd.f32 %v9514_v35, %v14056_v49  ;;  %v13189_v38 = vsel %vm5896_vm3, %v5919_v56, %v5923_v16  ;;  %v5313_v44 = vmul.f32 %v5284_v54, %v5201_v63 }
 0x340   : > { %14057 = vst [vmem:[#allocation17_spill] sm:$0xff] %v13189_v38  ;;  %v5314_v14 = vmul.f32 %v5289_v59, %v5202_v51  ;;  %v5472_v13 = vrot.slane %v5470_v5, 3  ;;  %v5475_v18 = vrot.slane %v5473_v22, 4  ;;  %9832 = vmatpush3.bf16.msra.mxu0 %v10677_v7  ;;  %v13200_v56 = vsel %vm5333_vm1, %v5701_v62, %v13184_v43  ;;  %v5294_v62 = vpop.permute.xlu0 %5293 }
 0x341   : > { %v5187_v19 = vadd.f32 %v13049_v60, %v4697_v20  ;;  %v4698_v23 = vadd.f32 %v4680_v3, %v14058_v37  ;;  %v9595_v42 = vpop.f32.mrb[32].mxu1  ;;  %9833 = vmatprep.subr.bf16.mxu0 %v10678_v52  ;;  %v5925_v7 = vrot.slane %v5470_v5, 4  ;;  %v5926_v4 = vrot.slane %v5473_v22, 5 }
 0x342   : > { %v5323_v63 = vpack.c.bf16 %v5314_v14, %v5313_v44  ;;  %v9596_v58 = vpop.f32.mrb[33].mxu1  ;;  %v13202_v34 = vor.u32 %v5475_v18, %v5472_v13  ;;  %v14059_v14 = vld [vmem:[#allocation22_spill] sm:$0xff] }
 0x343   : > { %v5203_v35 = vmax.f32 %v5187_v19, 0.0  ;;  %v5188_v51 = vadd.f32 %v13049_v60, %v4698_v23  ;;  %v9597_v59 = vadd.f32 %v9596_v58, %v9595_v42  ;;  %v9598_v54 = vpop.f32.mrb[34].mxu1  ;;  %v13207_v3 = vor.u32 %v5926_v4, %v5925_v7  ;;  %v5299_v60 = vpop.permute.xlu1 %5298 }
 0x344   : > { %v5345_v8 = vrot.slane %v5323_v63, 4  ;;  %v9599_v20 = vpop.f32.mrb[35].mxu1  ;;  %v5477_v49 = vsel %vm5415_vm2, %v5467_v61, %v13202_v34  ;;  %9834 = vmatpush3.bf16.msra.mxu0 %v10678_v52  ;;  %v14061_v52 = vld [vmem:[#allocation26_spill] sm:$0xff] }
 0x345   : > { %v5204_v44 = vmax.f32 %v5188_v51, 0.0  ;;  %v13210_v13 = vadd.f32 %v9597_v59, %v14059_v14  ;;  %v9600_v5 = vadd.f32 %v9599_v20, %v9598_v54  ;;  %9812 = vmatmul.mubr.bf16.gmra.mrb[200].mxu0 %v5477_v49  ;;  %9851 = vmatprep.subr.bf16.mxu0 %v13196_v39  ;;  %v5315_v18 = vmul.f32 %v5294_v62, %v5203_v35 }
 0x346   : > { %v5346_v22 = vsel %vm5333_vm1, %v5343_v50, %v5345_v8  ;;  %v13216_v19 = vsel %vm5896_vm3, %v5923_v16, %v13207_v3 }
 0x347   : > { %14060 = vst [vmem:[#allocation40_spill] sm:$0xff] %v13216_v19  ;;  %5364 = vst [vmem:[#allocation2 + $0x38] sm:$0xff] %v5346_v22  ;;  %v5316_v61 = vmul.f32 %v5299_v60, %v5204_v44  ;;  %v13219_v37 = vadd.f32 %v9600_v5, %v14061_v52  ;;  %v5479_v23 = vshrl.u32 %v5346_v22, 16  ;;  %v5482_v42 = vshll.u32 %v5346_v22, 16  ;;  %v7319_v5 = vld [vmem:[#allocation2 + $0x50] sm:$0x1f] }
 0x348   : > { %v13221_v63 = vrot.slane %v5346_v22, 4  ;;  %v14063_v22 = vld [vmem:[#allocation30_spill] sm:$0xff] }
 0x349   : > { %v5324_v58 = vpack.c.bf16 %v5316_v61, %v5315_v18  ;;  %v9601_v7 = vpop.f32.mrb[36].mxu1  ;;  %v5481_v4 = vrot.slane %v5479_v23, 3  ;;  %v5484_v51 = vrot.slane %v5482_v42, 4  ;;  %v7361_v59 = vrot.slane %v5479_v23, 4 }
 0x34a   : > { %v9602_v50 = vpop.f32.mrb[37].mxu1  ;;  %v7362_v35 = vrot.slane %v5482_v42, 5  ;;  %v13226_v16 = vsel %vm5333_vm1, %v13184_v43, %v13221_v63 }
 0x34b   : > { %v5347_v54 = vrot.slane %v5324_v58, 4  ;;  %v9603_v20 = vadd.f32 %v9602_v50, %v9601_v7  ;;  %v9604_v49 = vpop.f32.mrb[38].mxu1  ;;  %v13228_v62 = vor.u32 %v5484_v51, %v5481_v4  ;;  %v14066_v58 = vld [vmem:[#allocation34_spill] sm:$0xff]  ;;  %v7374_v4 = vshrl.u32 %v7319_v5, 16 }
 0x34c   : > { %v9605_v44 = vpop.f32.mrb[39].mxu1  ;;  %v13230_v14 = vor.u32 %v7362_v35, %v7361_v59  ;;  %v7377_v51 = vshll.u32 %v7319_v5, 16 }
 0x34d   : > { %v13233_v60 = vsel %vm5333_vm1, %v5345_v8, %v5347_v54  ;;  %5366 = vst [vmem:[#allocation2 + $0x48] sm:$0xf] %v5347_v54  ;;  %v13236_v18 = vadd.f32 %v9603_v20, %v14063_v22  ;;  %v9606_v61 = vadd.f32 %v9605_v44, %v9604_v49  ;;  %v13241_v52 = vsel %vm5415_vm2, %v13202_v34, %v13228_v62 }
 0x34e   : > { %14062 = vst [vmem:[#allocation5_spill] sm:$0xff] %v13230_v14  ;;  %14064 = vst [vmem:[#allocation18_spill] sm:$0xff] %v13241_v52  ;;  %9815 = vmatprep.mubr.bf16.mxu0 %v13241_v52  ;;  %v6911_v23 = vshrl.u32 %v13233_v60, 16  ;;  %v6914_v42 = vshll.u32 %v13233_v60, 16  ;;  %v13250_v8 = vsel %vm5896_vm3, %v13207_v3, %v13230_v14  ;;  %v7376_v22 = vrot.slane %v7374_v4, 4 }
 0x34f   : > { %5365 = vst [vmem:[#allocation2 + $0x40] sm:$0xff] %v13233_v60  ;;  %14065 = vst [vmem:[#allocation6_spill] sm:$0xff] %v13250_v8  ;;  %v13253_v7 = vadd.f32 %v9606_v61, %v14066_v58  ;;  %10067 = vmatprep.mubr.bf16.mxu1 %v13250_v8  ;;  %v7379_v24 = vrot.slane %v7377_v51, 5  ;;  %v14067_v8 = vld [vmem:[#allocation15_spill] sm:$0xff] }
 0x350   : > { %v7365_v59 = vrot.slane %v6911_v23, 4  ;;  %v7366_v50 = vrot.slane %v6914_v42, 5 }
 0x351   : > { %v9607_v35 = vpop.f32.mrb[40].mxu1 }
 0x352   : > { %v9608_v54 = vpop.f32.mrb[41].mxu1  ;;  %v13256_v20 = vor.u32 %v7366_v50, %v7365_v59 }
 0x353   : > { %v9609_v49 = vadd.f32 %v9608_v54, %v9607_v35  ;;  %v9610_v44 = vpop.f32.mrb[42].mxu1  ;;  %v13272_v35 = vld [vmem:[#allocation2] sm:$0xf0]  ;;  %v6202_v54 = vrot.slane %v6911_v23, 3 }
 0x354   : > { %v9611_v52 = vpop.f32.mrb[43].mxu1  ;;  %v7368_v61 = vsel %vm5896_vm3, %v13230_v14, %v13256_v20  ;;  %v13261_v58 = vld [vmem:[#allocation2 + $0x48] sm:$0xff]  ;;  %v6205_v14 = vrot.slane %v6914_v42, 4  ;;  %v5692_v10 = vrot.slane %v13272_v35, 4 }
 0x355   : > { %v13264_v19 = vadd.f32 %v9609_v49, %v14067_v8  ;;  %v9612_v5 = vadd.f32 %v9611_v52, %v9610_v44  ;;  %10068 = vmatmul.mubr.bf16.vlgmr.msra.gmra.mrb[64].mxu1 %v7368_v61  ;;  %v13904_v59 = vshrl.u32 %v13261_v58, 16  ;;  %v13905_v50 = vshll.u32 %v13261_v58, 16 }
 0x356   : > { %v13266_v38 = vld [vmem:[#allocation2 + $0x40] sm:$0xf]  ;;  %v7380_v49 = vor.u32 %v7379_v24, %v7376_v22  ;;  %v13283_v55 = vor.u32 %v6205_v14, %v6202_v54  ;;  %v5694_v14 = vsel %vm5333_vm1, %v5692_v10, %v5693_v46 }
 0x357   : > { %14068 = vst [vmem:[#allocation19_spill] sm:$0xff] %v13264_v19  ;;  %v5488_v4 = vshrl.u32 %v13266_v38, 16  ;;  %v5491_v51 = vshll.u32 %v13266_v38, 16  ;;  %v13275_v36 = vadd.f32 %v9612_v5, %v12980_v15  ;;  %v7369_v52 = vrot.slane %v13904_v59, 4  ;;  %v13301_v54 = vld [vmem:[#allocation2 + $0x20] sm:$0xff] }
 0x358   : > { %v7370_v8 = vrot.slane %v13905_v50, 5  ;;  %14073 = vst [vmem:[#allocation10_spill] sm:$0xff] %v13301_v54 }
 0x359   : > { %14069 = vst [vmem:[#allocation7_spill] sm:$0xff] %v13275_v36  ;;  %v5490_v44 = vrot.slane %v5488_v4, 3  ;;  %v5493_v61 = vrot.slane %v5491_v51, 4  ;;  %v9613_v9 = vpop.f32.mrb[44].mxu1  ;;  %v13296_v51 = vld [vmem:[#allocation2 + $0x18] sm:$0xff] }
 0x35a   : > { %v7371_v19 = vor.u32 %v7370_v8, %v7369_v52  ;;  %v9614_v23 = vpop.f32.mrb[45].mxu1  ;;  %14071 = vst [vmem:[#allocation8_spill] sm:$0xff] %v13296_v51  ;;  %v13305_v52 = vld [vmem:[#allocation2 + $0x28] sm:$0xff]  ;;  %v13307_v8 = vld [vmem:[#allocation2 + $0x30] sm:$0xff] }
 0x35b   : > { %v5494_v42 = vor.u32 %v5493_v61, %v5490_v44  ;;  %v9615_v15 = vadd.f32 %v9614_v23, %v9613_v9  ;;  %v9616_v5 = vpop.f32.mrb[46].mxu1  ;;  %v13294_v9 = vld [vmem:[#allocation2 + $0x10] sm:$0xff]  ;;  %14074 = vst [vmem:[#allocation9_spill] sm:$0xff] %v13307_v8  ;;  %v14075_v61 = vrot.slane %v13071_v48, 4  ;;  %v14076_v48 = vshrl.u32 %v13296_v51, 16 }
 0x35c   : > { %v7372_v59 = vsel %vm5896_vm3, %v13256_v20, %v7371_v19  ;;  %v7381_v50 = vsel %vm5896_vm3, %v7371_v19, %v7380_v49  ;;  %v9617_v24 = vpop.f32.mrb[47].mxu1  ;;  %14070 = vst [vmem:[#allocation20_spill] sm:$0xff] %v13294_v9  ;;  %v13310_v49 = vld [vmem:[#allocation2 + $0x38] sm:$0xff] }
 0x35d   : > { %v5495_v22 = vsel %vm5415_vm2, %v13228_v62, %v5494_v42  ;;  %10071 = vmatprep.mubr.bf16.mxu1 %v7372_v59  ;;  %v13291_v4 = vadd.f32 %v9615_v15, %v12985_v53  ;;  %v9618_v30 = vadd.f32 %v9617_v24, %v9616_v5  ;;  %v13906_v59 = vshrl.u32 %v13294_v9, 16 }
 0x35e   : > { %9816 = vmatmul.mubr.bf16.gmra.mrb[204].mxu0 %v5495_v22  ;;  %10072 = vmatmul.mubr.bf16.gmra.mrb[68].mxu1 %v7381_v50  ;;  %v13907_v53 = vshll.u32 %v13294_v9, 16  ;;  %v10680_v22 = vld [vmem:[%s13897_s6 + $0x88] sm:$0xff]   ;;  %v6629_v36 = vrot.slane %v14076_v48, 4 }
 0x35f   : > { %9835 = vmatprep.mubr.bf16.mxu0 %v5694_v14  ;;  %v13299_v19 = vadd.f32 %v9618_v30, %v12992_v31  ;;  %v5696_v31 = vsel %vm5333_vm1, %v5693_v46, %v14075_v61  ;;  %v6173_v30 = vshrl.u32 %v13305_v52, 16  ;;  %v6176_v14 = vshll.u32 %v13305_v52, 16 }
 0x360   : > { %v6625_v15 = vrot.slane %v13906_v59, 4  ;;  %v14077_v59 = vshll.u32 %v13296_v51, 16  ;;  %v14082_v51 = vshrl.u32 %v13310_v49, 16 }
 0x361   : > { %14072 = vst [vmem:[#allocation21_spill] sm:$0xff] %v13299_v19  ;;  %v9619_v10 = vpop.f32.mrb[48].mxu1 }
 0x362   : > { %v9620_v44 = vpop.f32.mrb[49].mxu1  ;;  %v6630_v46 = vrot.slane %v14077_v59, 5  ;;  %v14080_v59 = vshrl.u32 %v13307_v8, 16  ;;  %v6645_v9 = vrot.slane %v14082_v51, 4  ;;  %v10682_v51 = vld [vmem:[%s13897_s6 + $0x98] sm:$0xff]  }
 0x363   : > { %v9621_v5 = vadd.f32 %v9620_v44, %v9619_v10  ;;  %v9622_v24 = vpop.f32.mrb[50].mxu1  ;;  %v6626_v10 = vrot.slane %v13907_v53, 5  ;;  %v14078_v53 = vshrl.u32 %v13301_v54, 16 }
 0x364   : > { %v9623_v50 = vpop.f32.mrb[51].mxu1  ;;  %v6641_v48 = vrot.slane %v14080_v59, 4 }
 0x365   : > { %v13331_v44 = vadd.f32 %v9621_v5, %v12997_v26  ;;  %v9624_v42 = vadd.f32 %v9623_v50, %v9622_v24  ;;  %v13338_v61 = vor.u32 %v6626_v10, %v6625_v15  ;;  %v6633_v26 = vrot.slane %v14078_v53, 4 }
 0x366   : > { %9836 = vmatmul.mubr.bf16.vlgmr.msra.gmra.mrb[192].mxu0 %v5696_v31  ;;  %v10681_v31 = vld [vmem:[%s13897_s6 + $0x90] sm:$0xff]   ;;  %v6638_v15 = vrot.slane %v6176_v14, 5  ;;  %v13352_v24 = vor.u32 %v6630_v46, %v6629_v36  ;;  %v14081_v53 = vshll.u32 %v13307_v8, 16  ;;  %v6175_v36 = vrot.slane %v6173_v30, 3 }
 0x367   : > { %9839 = vmatprep.mubr.bf16.mxu0 %v13114_v17  ;;  %9852 = vmatpush3.bf16.msra.mxu0 %v13196_v39  ;;  %v13345_v50 = vadd.f32 %v9624_v42, %v13004_v41  ;;  %v14079_v17 = vshll.u32 %v13301_v54, 16  ;;  %v6637_v39 = vrot.slane %v6173_v30, 4  ;;  %v14083_v54 = vshll.u32 %v13310_v49, 16 }
 0x368   : > { %9853 = vmatprep.subr.bf16.mxu0 %v10680_v22  ;;  %v6642_v10 = vrot.slane %v14081_v53, 5  ;;  %v6178_v46 = vrot.slane %v6176_v14, 4  ;;  %v13367_v59 = vsel %vm5896_vm3, %v13338_v61, %v13352_v24 }
 0x369   : > { %v6634_v5 = vrot.slane %v14079_v17, 5  ;;  %v9625_v41 = vpop.f32.mrb[52].mxu1  ;;  %v13358_v23 = vor.u32 %v6638_v15, %v6637_v39  ;;  %v6646_v17 = vrot.slane %v14083_v54, 5 }
 0x36a   : > { %v9626_v19 = vpop.f32.mrb[53].mxu1  ;;  %v6643_v53 = vor.u32 %v6642_v10, %v6641_v48 }
 0x36b   : > { %v6635_v42 = vor.u32 %v6634_v5, %v6633_v26  ;;  %9854 = vmatpush3.bf16.msra.mxu0 %v10680_v22  ;;  %v9627_v8 = vadd.f32 %v9626_v19, %v9625_v41  ;;  %v9628_v26 = vpop.f32.mrb[54].mxu1  ;;  %v6647_v30 = vor.u32 %v6646_v17, %v6645_v9  ;;  %v13394_v9 = vor.u32 %v6178_v46, %v6175_v36 }
 0x36c   : > { %9855 = vmatprep.subr.bf16.mxu0 %v10681_v31  ;;  %v9629_v14 = vpop.f32.mrb[55].mxu1  ;;  %v13382_v5 = vsel %vm5896_vm3, %v13358_v23, %v6643_v53  ;;  %v13410_v46 = vrot.slane %v13233_v60, 4  ;;  %v13425_v60 = vsel %vm5415_vm2, %v13228_v62, %v13283_v55 }
 0x36d   : > { %v13374_v54 = vsel %vm5896_vm3, %v13352_v24, %v6635_v42  ;;  %v13378_v22 = vsel %vm5896_vm3, %v6635_v42, %v13358_v23  ;;  %v5128_v19 = vadd.f32 %v9627_v8, %v13009_v0  ;;  %v9630_v39 = vadd.f32 %v9629_v14, %v9628_v26  ;;  %v10683_v0 = vld [vmem:[%s13897_s6 + $0xa0] sm:$0xff]  }
 0x36e   : > { %9840 = vmatmul.mubr.bf16.gmra.mrb[196].mxu0 %v13148_v21  ;;  %v13387_v15 = vsel %vm5896_vm3, %v6643_v53, %v6647_v30  ;;  %v13391_v48 = vsel %vm5896_vm3, %v6647_v30, %v13256_v20  ;;  %v5898_v21 = vshrl.u32 %v13272_v35, 16  ;;  %v5901_v8 = vshll.u32 %v13272_v35, 16  ;;  %v10684_v35 = vld [vmem:[%s13897_s6 + $0xa8] sm:$0xff]  }
 0x36f   : > { %9843 = vmatprep.mubr.bf16.mxu0 %v13171_v25  ;;  %9856 = vmatpush3.bf16.msra.mxu0 %v10681_v31  ;;  %v5131_v10 = vadd.f32 %v9630_v39, %v13016_v11  ;;  %v14084_v42 = vshrl.u32 %v13261_v58, 16  ;;  %v14085_v25 = vshll.u32 %v13261_v58, 16  ;;  %v13407_v11 = vrot.slane %v13305_v52, 4 }
 0x370   : > { %9857 = vmatprep.subr.bf16.mxu0 %v10682_v51  ;;  %v13418_v30 = vsel %vm5415_vm2, %v13394_v9, %v13202_v34  ;;  %v5900_v52 = vrot.slane %v5898_v21, 4 }
 0x371   : > { %v9631_v41 = vpop.f32.mrb[56].mxu1  ;;  %v6922_v17 = vrot.slane %v14084_v42, 3  ;;  %v6925_v31 = vrot.slane %v14085_v25, 4  ;;  %v5903_v42 = vrot.slane %v5901_v8, 5  ;;  %v13438_v21 = vsel %vm5333_vm1, %v13407_v11, %v13184_v43  ;;  %v10685_v8 = vld [vmem:[%s13897_s6 + $0xb0] sm:$0xff]  }
 0x372   : > { %v9632_v36 = vpop.f32.mrb[57].mxu1 }
 0x373   : > { %9858 = vmatpush3.bf16.msra.mxu0 %v10682_v51  ;;  %v9633_v53 = vadd.f32 %v9632_v36, %v9631_v41  ;;  %v9634_v26 = vpop.f32.mrb[58].mxu1  ;;  %v13420_v14 = vor.u32 %v6925_v31, %v6922_v17  ;;  %v13460_v17 = vsel %vm5896_vm3, %v13358_v23, %v13207_v3  ;;  %v13463_v31 = vadd.f32 %v5128_v19, %v13013_v27  ;;  %v10686_v27 = vld [vmem:[%s13897_s6 + $0xb8] sm:$0xff]  }
 0x374   : > { %9859 = vmatprep.subr.bf16.mxu0 %v10683_v0  ;;  %v9635_v51 = vpop.f32.mrb[59].mxu1  ;;  %v13467_v36 = vadd.f32 %v13331_v44, %v13001_v28 }
 0x375   : > { %v5136_v39 = vadd.f32 %v9633_v53, %v13021_v6  ;;  %v9636_v41 = vadd.f32 %v9635_v51, %v9634_v26  ;;  %v13432_v34 = vsel %vm5415_vm2, %v13283_v55, %v13420_v14  ;;  %v13443_v6 = vsel %vm5333_vm1, %v13221_v63, %v13410_v46 }
 0x376   : > { %9844 = vmatmul.mubr.bf16.gmra.mrb[200].mxu0 %v13200_v56  ;;  %v7146_v56 = vrot.slane %v13261_v58, 4  ;;  %v13470_v53 = vadd.f32 %v5131_v10, %v13019_v29  ;;  %v13474_v26 = vadd.f32 %v13345_v50, %v13007_v2  ;;  %v13807_v58 = vld [vmem:[%s13896_s5] ss:$0 sm:$0xff] }
 0x377   : > { %9847 = vmatprep.mubr.bf16.mxu0 %v13226_v16  ;;  %9860 = vmatpush3.bf16.msra.mxu0 %v10683_v0  ;;  %v5139_v62 = vadd.f32 %v9636_v41, %v13028_v33  ;;  %v5707_v0 = vrot.slane %v13266_v38, 4  ;;  %v5904_v33 = vor.u32 %v5903_v42, %v5900_v52  ;;  %v13480_v19 = vadd.f32 %v5136_v39, %v13025_v40  ;;  %v14087_v40 = vld [vmem:[#allocation24_spill] sm:$0xff]  ;;  %v14091_v42 = vld [vmem:[#allocation19_spill] sm:$0xff] }
 0x378   : > { %9861 = vmatprep.subr.bf16.mxu0 %v10684_v35  ;;  %v13455_v43 = vsel %vm5333_vm1, %v13410_v46, %v7146_v56  ;;  %v13496_v52 = vadd.f32 %v13210_v13, %v14087_v40  ;;  %v14089_v39 = vld [vmem:[#allocation28_spill] sm:$0xff]  ;;  %v13515_v13 = vadd.f32 %v13291_v4, %v12989_v12  ;;  %v14097_v4 = vld [vmem:[#allocation38_spill] sm:$0xff] }
 0x379   : > { %v9637_v25 = vpop.f32.mrb[60].mxu1  ;;  %v5708_v44 = vsel %vm5333_vm1, %v13221_v63, %v5707_v0  ;;  %v13485_v29 = vadd.f32 %v5139_v62, %v13031_v57  ;;  %v5908_v10 = vsel %vm5896_vm3, %v5904_v33, %v13103_v45  ;;  %v14088_v45 = vld [vmem:[#allocation35_spill] sm:$0xff]  ;;  %v13511_v41 = vadd.f32 %v13219_v37, %v14089_v39  ;;  %v10688_v12 = vld [vmem:[%s13897_s6 + $0xc8] sm:$0xff]  }
 0x37a   : > { %v9638_v38 = vpop.f32.mrb[61].mxu1  ;;  %v6111_v40 = vld [vmem:[#allocation2 + $0x8] sm:$0xf8] }
 0x37b   : > { %9862 = vmatpush3.bf16.msra.mxu0 %v10684_v35  ;;  %v9639_v3 = vadd.f32 %v9638_v38, %v9637_v25  ;;  %v9640_v23 = vpop.f32.mrb[62].mxu1  ;;  %v14086_v35 = vld [vmem:[#allocation32_spill] sm:$0xff]  ;;  %v14094_v25 = vld [vmem:[#allocation21_spill] sm:$0xff]  ;;  %v14096_v38 = vld [vmem:[#allocation7_spill] sm:$0xff] }
 0x37c   : > { %9863 = vmatprep.subr.bf16.mxu0 %v10685_v8  ;;  %v9641_v28 = vpop.f32.mrb[63].mxu1  ;;  %v13492_v51 = vadd.f32 %v13236_v18, %v14086_v35  ;;  %v13507_v18 = vadd.f32 %v13253_v7, %v14088_v45  ;;  %v14095_v7 = vld [vmem:[#allocation3_spill] sm:$0xff]  ;;  %v6141_v45 = vshll.u32 %v6111_v40, 16 }
 0x37d   : > { %v5144_v2 = vadd.f32 %v9639_v3, %v13033_v1  ;;  %v9642_v50 = vadd.f32 %v9641_v28, %v9640_v23  ;;  %v10687_v1 = vld [vmem:[%s13897_s6 + $0xc0] sm:$0xff]   ;;  %v13530_v37 = vadd.f32 %v14096_v38, %v14095_v7  ;;  %v14098_v3 = vld [vmem:[#allocation16_spill] sm:$0xff]  ;;  %v10689_v23 = vld [vmem:[%s13897_s6 + $0xd0] sm:$0xff]  }
 0x37e   : > { %9848 = vmatmul.mubr.bf16.gmra.mrb[204].mxu0 %v5708_v44  ;;  %v14099_v28 = vld [vmem:[#allocation39_spill] sm:$0xff] }
 0x37f   : > { %9864 = vmatpush3.bf16.msra.mxu0 %v10685_v8  ;;  %9867 = vmatprep.mubr.bf16.mxu0 %v5908_v10  ;;  %v5147_v57 = vadd.f32 %v9642_v50, %v13040_v32  ;;  %v13503_v63 = vadd.f32 %v5144_v2, %v13037_v47  ;;  %v14090_v32 = vld [vmem:[#allocation36_spill] sm:$0xff]  ;;  %v14093_v47 = vld [vmem:[#allocation37_spill] sm:$0xff]  ;;  %v5878_v44 = vld [vmem:[#allocation2 + $0x40] sm:$0x1f] }
 0x380   : > { %9865 = vmatprep.subr.bf16.mxu0 %v10686_v27  ;;  %v13519_v62 = vadd.f32 %v14091_v42, %v14090_v32  ;;  %v14092_v8 = vld [vmem:[#allocation4_spill] sm:$0xff]  ;;  %v13526_v33 = vadd.f32 %v14094_v25, %v14093_v47  ;;  %v14100_v2 = vld [vmem:[#allocation17_spill] sm:$0xff]  ;;  %v10691_v50 = vld [vmem:[%s13897_s6 + $0xe0] sm:$0xff]   ;;  %v5934_v10 = vshrl.u32 %v5878_v44, 16  ;;  %v5937_v35 = vshll.u32 %v5878_v44, 16 }
 0x381   : > { %v13522_v0 = vadd.f32 %v5147_v57, %v14092_v8  ;;  %v10692_v57 = vld [vmem:[%s13897_s6 + $0xe8] sm:$0xff]  }
 0x382   : > { %v5936_v39 = vrot.slane %v5934_v10, 4  ;;  %v5939_v32 = vrot.slane %v5937_v35, 5  ;;  %v14101_v42 = vld [vmem:[#allocation40_spill] sm:$0xff]  ;;  %v14106_v10 = vld [vmem:[#allocation5_spill] sm:$0xff] }
 0x383   : > { %9866 = vmatpush3.bf16.msra.mxu0 %v10686_v27  ;;  %v10690_v27 = vld [vmem:[%s13897_s6 + $0xd8] sm:$0xff]   ;;  %v14102_v8 = vld [vmem:[#allocation20_spill] sm:$0xff] }
 0x384   : > { %9883 = vmatprep.subr.bf16.mxu0 %v10687_v1  ;;  %v14103_v47 = vshrl.u32 %v14102_v8, 16  ;;  %v14104_v7 = vshll.u32 %v14102_v8, 16 }
 0x386   : > { %9868 = vmatmul.mubr.bf16.vlgmr.msra.gmra.mrb[192].mxu0 %v14097_v4  ;;  %v6148_v25 = vrot.slane %v14103_v47, 3  ;;  %v6151_v38 = vrot.slane %v14104_v7, 4  ;;  %v10693_v4 = vld [vmem:[%s13897_s6 + $0xf0] sm:$0xff]  }
 0x387   : > { %9871 = vmatprep.mubr.bf16.mxu0 %v14098_v3  ;;  %9884 = vmatpush3.bf16.msra.mxu0 %v10687_v1  ;;  %v6138_v1 = vshrl.u32 %v6111_v40, 16 }
 0x388   : > { %9885 = vmatprep.subr.bf16.mxu0 %v10688_v12 }
 0x389   : > { %v6140_v3 = vrot.slane %v6138_v1, 3 }
 0x38b   : > { %9886 = vmatpush3.bf16.msra.mxu0 %v10688_v12  ;;  %v14105_v12 = vld [vmem:[#allocation6_spill] sm:$0xff] }
 0x38c   : > { %9887 = vmatprep.subr.bf16.mxu0 %v10689_v23 }
 0x38e   : > { %9872 = vmatmul.mubr.bf16.gmra.mrb[196].mxu0 %v14099_v28  ;;  %v6152_v28 = vor.u32 %v6151_v38, %v6148_v25  ;;  %v10695_v38 = vld [vmem:[%s13897_s6 + $0x100] sm:$0xff]  }
 0x38f   : > { %9875 = vmatprep.mubr.bf16.mxu0 %v14100_v2  ;;  %9888 = vmatpush3.bf16.msra.mxu0 %v10689_v23  ;;  %v6143_v23 = vrot.slane %v6141_v45, 4  ;;  %v10694_v2 = vld [vmem:[%s13897_s6 + $0xf8] sm:$0xff]  }
 0x390   : > { %9889 = vmatprep.subr.bf16.mxu0 %v10690_v27  ;;  %v14110_v45 = vld [vmem:[#allocation10_spill] sm:$0xff] }
 0x391   : > { %v6144_v44 = vor.u32 %v6143_v23, %v6140_v3  ;;  %v10696_v23 = vld [vmem:[%s13897_s6 + $0x108] sm:$0xff]  }
 0x393   : > { %9890 = vmatpush3.bf16.msra.mxu0 %v10690_v27  ;;  %v5940_v27 = vor.u32 %v5939_v32, %v5936_v39  ;;  %v6153_v1 = vsel %vm5415_vm2, %v6144_v44, %v6152_v28  ;;  %v14112_v32 = vshll.u32 %v14110_v45, 16  ;;  %v14113_v44 = vld [vmem:[#allocation9_spill] sm:$0xff] }
 0x394   : > { %9891 = vmatprep.subr.bf16.mxu0 %v10691_v50 }
 0x395   : > { %v5941_v35 = vsel %vm5896_vm3, %v14106_v10, %v5940_v27  ;;  %v6169_v25 = vrot.slane %v14112_v32, 4  ;;  %v14114_v10 = vshrl.u32 %v14113_v44, 16 }
 0x396   : > { %9876 = vmatmul.mubr.bf16.gmra.mrb[200].mxu0 %v14101_v42 }
 0x397   : > { %9879 = vmatprep.mubr.bf16.mxu0 %v14105_v12  ;;  %9892 = vmatpush3.bf16.msra.mxu0 %v10691_v50  ;;  %v14107_v50 = vld [vmem:[#allocation8_spill] sm:$0xff] }
 0x398   : > { %9893 = vmatprep.subr.bf16.mxu0 %v10692_v57  ;;  %v14108_v40 = vshrl.u32 %v14107_v50, 16  ;;  %v14109_v47 = vshll.u32 %v14107_v50, 16 }
 0x39a   : > { %v6157_v42 = vrot.slane %v14108_v40, 3  ;;  %v6160_v7 = vrot.slane %v14109_v47, 4  ;;  %v14115_v40 = vshll.u32 %v14113_v44, 16  ;;  %v10698_v47 = vld [vmem:[%s13897_s6 + $0x118] sm:$0xff]  }
 0x39b   : > { %9894 = vmatpush3.bf16.msra.mxu0 %v10692_v57  ;;  %v14111_v57 = vshrl.u32 %v14110_v45, 16 }
 0x39c   : > { %9895 = vmatprep.subr.bf16.mxu0 %v10693_v4  ;;  %v13577_v12 = vor.u32 %v6160_v7, %v6157_v42  ;;  %v6187_v42 = vrot.slane %v14115_v40, 4 }
 0x39d   : > { %v6166_v39 = vrot.slane %v14111_v57, 3 }
 0x39e   : > { %9880 = vmatmul.mubr.bf16.gmra.mrb[204].mxu0 %v5941_v35  ;;  %v6162_v27 = vsel %vm5415_vm2, %v6152_v28, %v13577_v12  ;;  %v6184_v35 = vrot.slane %v14114_v10, 3 }
 0x39f   : > { %9896 = vmatpush3.bf16.msra.mxu0 %v10693_v4  ;;  %9899 = vmatprep.mubr.bf16.mxu0 %v6153_v1  ;;  %v6170_v3 = vor.u32 %v6169_v25, %v6166_v39  ;;  %v14116_v1 = vshrl.u32 %v13310_v49, 16  ;;  %v14117_v39 = vshll.u32 %v13310_v49, 16 }
 0x3a0   : > { %9897 = vmatprep.subr.bf16.mxu0 %v10694_v2  ;;  %v6188_v28 = vor.u32 %v6187_v42, %v6184_v35 }
 0x3a1   : > { %v13586_v4 = vsel %vm5415_vm2, %v13577_v12, %v6170_v3  ;;  %v13601_v7 = vsel %vm5415_vm2, %v6170_v3, %v13394_v9  ;;  %v6193_v57 = vrot.slane %v14116_v1, 3  ;;  %v6196_v32 = vrot.slane %v14117_v39, 4  ;;  %v10699_v3 = vld [vmem:[%s13897_s6 + $0x120] sm:$0xff]  }
 0x3a2   : > { %v6189_v25 = vsel %vm5415_vm2, %v13394_v9, %v6188_v28  ;;  %v10700_v9 = vld [vmem:[%s13897_s6 + $0x128] sm:$0xff]   ;;  %v6414_v39 = vrot.slane %v14102_v8, 4  ;;  %v10703_v8 = vld [vmem:[%s13897_s6 + $0x140] sm:$0xff]  }
 0x3a3   : > { %9898 = vmatpush3.bf16.msra.mxu0 %v10694_v2  ;;  %v10697_v2 = vld [vmem:[%s13897_s6 + $0x110] sm:$0xff]  }
 0x3a4   : > { %9915 = vmatprep.subr.bf16.mxu0 %v10695_v38 }
 0x3a6   : > { %9900 = vmatmul.mubr.bf16.vlgmr.msra.gmra.mrb[192].mxu0 %v6162_v27 }
 0x3a7   : > { %9903 = vmatprep.mubr.bf16.mxu0 %v13586_v4  ;;  %9916 = vmatpush3.bf16.msra.mxu0 %v10695_v38  ;;  %v13610_v38 = vld [vmem:[#allocation2 + $0x48] sm:$0xf] }
 0x3a8   : > { %9917 = vmatprep.subr.bf16.mxu0 %v10696_v23  ;;  %v6209_v27 = vshrl.u32 %v13610_v38, 16  ;;  %v6212_v10 = vshll.u32 %v13610_v38, 16 }
 0x3aa   : > { %v6211_v40 = vrot.slane %v6209_v27, 3  ;;  %v6214_v42 = vrot.slane %v6212_v10, 4  ;;  %v6418_v27 = vrot.slane %v14110_v45, 4  ;;  %v6422_v45 = vrot.slane %v14113_v44, 4  ;;  %v10707_v44 = vld [vmem:[%s13897_s6 + $0x160] sm:$0xff]  }
 0x3ab   : > { %9918 = vmatpush3.bf16.msra.mxu0 %v10696_v23  ;;  %v6197_v23 = vor.u32 %v6196_v32, %v6193_v57  ;;  %v6386_v57 = vld [vmem:[#allocation2 + $0x8] sm:$0xf0]  ;;  %v10702_v32 = vld [vmem:[%s13897_s6 + $0x138] sm:$0xff]  }
 0x3ac   : > { %9919 = vmatprep.subr.bf16.mxu0 %v10697_v2  ;;  %v6215_v1 = vor.u32 %v6214_v42, %v6211_v40  ;;  %v13659_v40 = vsel %vm5333_vm1, %v6418_v27, %v13407_v11  ;;  %v6423_v42 = vsel %vm5333_vm1, %v13407_v11, %v6422_v45 }
 0x3ad   : > { %v6198_v35 = vsel %vm5415_vm2, %v6188_v28, %v6197_v23  ;;  %v6413_v28 = vrot.slane %v6386_v57, 4 }
 0x3ae   : > { %9904 = vmatmul.mubr.bf16.gmra.mrb[196].mxu0 %v13601_v7 }
 0x3af   : > { %9907 = vmatprep.mubr.bf16.mxu0 %v6189_v25  ;;  %9920 = vmatpush3.bf16.msra.mxu0 %v10697_v2  ;;  %v6207_v2 = vsel %vm5415_vm2, %v6197_v23, %v13283_v55  ;;  %v6216_v25 = vsel %vm5415_vm2, %v13283_v55, %v6215_v1  ;;  %v13637_v23 = vrot.slane %v14107_v50, 4  ;;  %v10704_v55 = vld [vmem:[%s13897_s6 + $0x148] sm:$0xff]   ;;  %v10705_v50 = vld [vmem:[%s13897_s6 + $0x150] sm:$0xff]   ;;  %v6618_v1 = vshrl.u32 %v6386_v57, 16 }
 0x3b0   : > { %9921 = vmatprep.subr.bf16.mxu0 %v10698_v47 }
 0x3b1   : > { %v6417_v10 = vsel %vm5333_vm1, %v6414_v39, %v13637_v23 }
 0x3b3   : > { %9922 = vmatpush3.bf16.msra.mxu0 %v10698_v47  ;;  %v10701_v47 = vld [vmem:[%s13897_s6 + $0x130] sm:$0xff]  }
 0x3b4   : > { %9923 = vmatprep.subr.bf16.mxu0 %v10699_v3 }
 0x3b6   : > { %9908 = vmatmul.mubr.bf16.gmra.mrb[200].mxu0 %v6198_v35  ;;  %v10706_v35 = vld [vmem:[%s13897_s6 + $0x158] sm:$0xff]  }
 0x3b7   : > { %9911 = vmatprep.mubr.bf16.mxu0 %v6207_v2  ;;  %9924 = vmatpush3.bf16.msra.mxu0 %v10699_v3  ;;  %v6415_v3 = vsel %vm5333_vm1, %v6413_v28, %v6414_v39  ;;  %v6424_v2 = vrot.slane %v13310_v49, 4  ;;  %v6621_v39 = vshll.u32 %v6386_v57, 16  ;;  %v10709_v49 = vld [vmem:[%s13897_s6 + $0x170] sm:$0xff]  }
 0x3b8   : > { %9925 = vmatprep.subr.bf16.mxu0 %v10700_v9 }
 0x3b9   : > { %v6425_v28 = vsel %vm5333_vm1, %v6422_v45, %v6424_v2  ;;  %v6427_v11 = vsel %vm5333_vm1, %v6424_v2, %v13410_v46 }
 0x3bb   : > { %9926 = vmatpush3.bf16.msra.mxu0 %v10700_v9  ;;  %v13647_v9 = vsel %vm5333_vm1, %v13637_v23, %v6418_v27 }
 0x3bc   : > { %9927 = vmatprep.subr.bf16.mxu0 %v10701_v47 }
 0x3be   : > { %9912 = vmatmul.mubr.bf16.gmra.mrb[204].mxu0 %v6216_v25  ;;  %v6623_v25 = vrot.slane %v6621_v39, 5 }
 0x3bf   : > { %9928 = vmatpush3.bf16.msra.mxu0 %v10701_v47  ;;  %9931 = vmatprep.mubr.bf16.mxu0 %v6415_v3  ;;  %v10708_v47 = vld [vmem:[%s13897_s6 + $0x168] sm:$0xff]   ;;  %v6428_v3 = vrot.slane %v13610_v38, 4  ;;  %v10711_v38 = vld [vmem:[%s13897_s6 + $0x180] sm:$0xff]  }
 0x3c0   : > { %9929 = vmatprep.subr.bf16.mxu0 %v10702_v32 }
 0x3c1   : > { %v6429_v27 = vsel %vm5333_vm1, %v13410_v46, %v6428_v3  ;;  %v10714_v46 = vld [vmem:[%s13897_s6 + $0x198] sm:$0xff]   ;;  %v10719_v3 = vld [vmem:[%s13897_s6 + $0x1c0] sm:$0xff]  }
 0x3c3   : > { %9930 = vmatpush3.bf16.msra.mxu0 %v10702_v32  ;;  %v6620_v32 = vrot.slane %v6618_v1, 4 }
 0x3c4   : > { %9947 = vmatprep.subr.bf16.mxu0 %v10703_v8 }
 0x3c5   : > { %v6624_v57 = vor.u32 %v6623_v25, %v6620_v32  ;;  %v10718_v25 = vld [vmem:[%s13897_s6 + $0x1b8] sm:$0xff]  }
 0x3c6   : > { %9932 = vmatmul.mubr.bf16.vlgmr.msra.gmra.mrb[192].mxu0 %v6417_v10  ;;  %v10712_v10 = vld [vmem:[%s13897_s6 + $0x188] sm:$0xff]  }
 0x3c7   : > { %9935 = vmatprep.mubr.bf16.mxu0 %v13647_v9  ;;  %9948 = vmatpush3.bf16.msra.mxu0 %v10703_v8  ;;  %v10710_v8 = vld [vmem:[%s13897_s6 + $0x178] sm:$0xff]  }
 0x3c8   : > { %9949 = vmatprep.subr.bf16.mxu0 %v10704_v55 }
 0x3cb   : > { %9950 = vmatpush3.bf16.msra.mxu0 %v10704_v55  ;;  %v6628_v55 = vsel %vm5896_vm3, %v6624_v57, %v13338_v61  ;;  %v10713_v61 = vld [vmem:[%s13897_s6 + $0x190] sm:$0xff]   ;;  %v10720_v57 = vld [vmem:[%s13897_s6 + $0x1c8] sm:$0xff]  }
 0x3cc   : > { %9951 = vmatprep.subr.bf16.mxu0 %v10705_v50 }
 0x3ce   : > { %9936 = vmatmul.mubr.bf16.gmra.mrb[196].mxu0 %v13659_v40 }
 0x3cf   : > { %9939 = vmatprep.mubr.bf16.mxu0 %v6423_v42  ;;  %9952 = vmatpush3.bf16.msra.mxu0 %v10705_v50  ;;  %v6599_v50 = vld [vmem:[#allocation2 + $0x48] sm:$0x1f]  ;;  %v6831_v42 = vld [vmem:[#allocation2 + $0x10] sm:$0xf8] }
 0x3d0   : > { %9953 = vmatprep.subr.bf16.mxu0 %v10706_v35  ;;  %v6654_v45 = vshrl.u32 %v6599_v50, 16  ;;  %v6858_v2 = vshrl.u32 %v6831_v42, 16 }
 0x3d2   : > { %v6656_v1 = vrot.slane %v6654_v45, 4  ;;  %v10726_v45 = vld [vmem:[%s13897_s6 + $0x1f8] sm:$0xff]  }
 0x3d3   : > { %9954 = vmatpush3.bf16.msra.mxu0 %v10706_v35  ;;  %v6657_v35 = vshll.u32 %v6599_v50, 16  ;;  %v7106_v50 = vld [vmem:[#allocation2 + $0x10] sm:$0xf0] }
 0x3d4   : > { %9955 = vmatprep.subr.bf16.mxu0 %v10707_v44 }
 0x3d5   : > { %v6659_v39 = vrot.slane %v6657_v35, 5  ;;  %v10775_v35 = vld [vmem:[%s13897_s6 + $0x200] sm:$0xff]  }
 0x3d6   : > { %9940 = vmatmul.mubr.bf16.gmra.mrb[200].mxu0 %v6425_v28  ;;  %v6860_v28 = vrot.slane %v6858_v2, 3  ;;  %v10777_v2 = vld [vmem:[%s13897_s6 + $0x210] sm:$0xff]  }
 0x3d7   : > { %9943 = vmatprep.mubr.bf16.mxu0 %v6427_v11  ;;  %9956 = vmatpush3.bf16.msra.mxu0 %v10707_v44  ;;  %v10716_v44 = vld [vmem:[%s13897_s6 + $0x1a8] sm:$0xff]  }
 0x3d8   : > { %9957 = vmatprep.subr.bf16.mxu0 %v10708_v47 }
 0x3db   : > { %9958 = vmatpush3.bf16.msra.mxu0 %v10708_v47  ;;  %v6861_v47 = vshll.u32 %v6831_v42, 16 }
 0x3dc   : > { %9959 = vmatprep.subr.bf16.mxu0 %v10709_v49 }
 0x3dd   : > { %v6863_v11 = vrot.slane %v6861_v47, 4 }
 0x3de   : > { %9944 = vmatmul.mubr.bf16.gmra.mrb[204].mxu0 %v6429_v27  ;;  %v14118_v27 = vld [vmem:[#allocation18_spill] sm:$0xff] }
 0x3df   : > { %9960 = vmatpush3.bf16.msra.mxu0 %v10709_v49  ;;  %9963 = vmatprep.mubr.bf16.mxu0 %v6628_v55  ;;  %v6660_v49 = vor.u32 %v6659_v39, %v6656_v1  ;;  %v6864_v32 = vor.u32 %v6863_v11, %v6860_v28  ;;  %v7341_v28 = vshll.u32 %v7106_v50, 16  ;;  %v10780_v11 = vld [vmem:[%s13897_s6 + $0x228] sm:$0xff]  }
 0x3e0   : > { %9961 = vmatprep.subr.bf16.mxu0 %v10710_v8 }
 0x3e3   : > { %9962 = vmatpush3.bf16.msra.mxu0 %v10710_v8  ;;  %v13734_v8 = vld [vmem:[#allocation2 + $0x50] sm:$0xf] }
 0x3e4   : > { %9979 = vmatprep.subr.bf16.mxu0 %v10711_v38  ;;  %v6932_v55 = vshll.u32 %v13734_v8, 16 }
 0x3e6   : > { %9964 = vmatmul.mubr.bf16.vlgmr.msra.gmra.mrb[192].mxu0 %v13367_v59  ;;  %v10715_v59 = vld [vmem:[%s13897_s6 + $0x1a0] sm:$0xff]  }
 0x3e7   : > { %9967 = vmatprep.mubr.bf16.mxu0 %v13374_v54  ;;  %9980 = vmatpush3.bf16.msra.mxu0 %v10711_v38 }
 0x3e8   : > { %9981 = vmatprep.subr.bf16.mxu0 %v10712_v10 }
 0x3eb   : > { %9982 = vmatpush3.bf16.msra.mxu0 %v10712_v10  ;;  %v6934_v10 = vrot.slane %v6932_v55, 4 }
 0x3ec   : > { %9983 = vmatprep.subr.bf16.mxu0 %v10713_v61 }
 0x3ee   : > { %9968 = vmatmul.mubr.bf16.gmra.mrb[196].mxu0 %v13378_v22 }
 0x3ef   : > { %9971 = vmatprep.mubr.bf16.mxu0 %v13382_v5  ;;  %9984 = vmatpush3.bf16.msra.mxu0 %v10713_v61  ;;  %v10717_v5 = vld [vmem:[%s13897_s6 + $0x1b0] sm:$0xff]  }
 0x3f0   : > { %9985 = vmatprep.subr.bf16.mxu0 %v10714_v46  ;;  %v10725_v61 = vld [vmem:[%s13897_s6 + $0x1f0] sm:$0xff]  }
 0x3f3   : > { %9986 = vmatpush3.bf16.msra.mxu0 %v10714_v46 }
 0x3f4   : > { %9987 = vmatprep.subr.bf16.mxu0 %v10715_v59 }
 0x3f6   : > { %9972 = vmatmul.mubr.bf16.gmra.mrb[200].mxu0 %v13387_v15  ;;  %v6661_v15 = vsel %vm5896_vm3, %v13256_v20, %v6660_v49  ;;  %v10721_v20 = vld [vmem:[%s13897_s6 + $0x1d0] sm:$0xff]  }
 0x3f7   : > { %9975 = vmatprep.mubr.bf16.mxu0 %v13391_v48  ;;  %9988 = vmatpush3.bf16.msra.mxu0 %v10715_v59  ;;  %v6873_v48 = vsel %vm5415_vm2, %v6864_v32, %v13577_v12  ;;  %v10722_v12 = vld [vmem:[%s13897_s6 + $0x1d8] sm:$0xff]   ;;  %v7133_v59 = vrot.slane %v7106_v50, 4  ;;  %v7343_v32 = vrot.slane %v7341_v28, 5 }
 0x3f8   : > { %9989 = vmatprep.subr.bf16.mxu0 %v10716_v44 }
 0x3fb   : > { %9990 = vmatpush3.bf16.msra.mxu0 %v10716_v44 }
 0x3fc   : > { %9991 = vmatprep.subr.bf16.mxu0 %v10717_v5 }
 0x3fe   : > { %9976 = vmatmul.mubr.bf16.gmra.mrb[204].mxu0 %v6661_v15  ;;  %v10781_v15 = vld [vmem:[%s13897_s6 + $0x230] sm:$0xff]  }
 0x3ff   : > { %9992 = vmatpush3.bf16.msra.mxu0 %v10717_v5  ;;  %9995 = vmatprep.mubr.bf16.mxu0 %v6873_v48  ;;  %v10779_v5 = vld [vmem:[%s13897_s6 + $0x220] sm:$0xff]  }
 0x400   : > { %9993 = vmatprep.subr.bf16.mxu0 %v10718_v25 }
 0x403   : > { %9994 = vmatpush3.bf16.msra.mxu0 %v10718_v25  ;;  %v7148_v25 = vrot.slane %v13734_v8, 4 }
 0x404   : > { %10011 = vmatprep.subr.bf16.mxu0 %v10719_v3 }
 0x406   : > { %9996 = vmatmul.mubr.bf16.vlgmr.msra.gmra.mrb[192].mxu0 %v13586_v4  ;;  %v10723_v4 = vld [vmem:[%s13897_s6 + $0x1e0] sm:$0xff]  }
 0x407   : > { %9999 = vmatprep.mubr.bf16.mxu0 %v13601_v7  ;;  %10012 = vmatpush3.bf16.msra.mxu0 %v10719_v3  ;;  %v6929_v7 = vshrl.u32 %v13734_v8, 16  ;;  %v10782_v3 = vld [vmem:[%s13897_s6 + $0x238] sm:$0xff]  }
 0x408   : > { %10013 = vmatprep.subr.bf16.mxu0 %v10720_v57 }
 0x409   : > { %v6931_v38 = vrot.slane %v6929_v7, 3 }
 0x40b   : > { %10014 = vmatpush3.bf16.msra.mxu0 %v10720_v57  ;;  %v6935_v46 = vor.u32 %v6934_v10, %v6931_v38  ;;  %v5382_v57 = vadd.f32 %v13807_v58, %v13467_v36 }
 0x40c   : > { %10015 = vmatprep.subr.bf16.mxu0 %v10721_v20 }
 0x40e   : > { %10000 = vmatmul.mubr.bf16.gmra.mrb[196].mxu0 %v13418_v30  ;;  %v10724_v30 = vld [vmem:[%s13897_s6 + $0x1e8] sm:$0xff]  }
 0x40f   : > { %10003 = vmatprep.mubr.bf16.mxu0 %v14118_v27  ;;  %10016 = vmatpush3.bf16.msra.mxu0 %v10721_v20  ;;  %v5383_v27 = vadd.f32 %v13807_v58, %v13474_v26 }
 0x410   : > { %10017 = vmatprep.subr.bf16.mxu0 %v10722_v12 }
 0x413   : > { %10018 = vmatpush3.bf16.msra.mxu0 %v10722_v12 }
 0x414   : > { %10019 = vmatprep.subr.bf16.mxu0 %v10723_v4 }
 0x416   : > { %10004 = vmatmul.mubr.bf16.gmra.mrb[200].mxu0 %v13425_v60  ;;  %v6936_v60 = vsel %vm5415_vm2, %v13420_v14, %v6935_v46  ;;  %v10776_v14 = vld [vmem:[%s13897_s6 + $0x208] sm:$0xff]   ;;  %v5388_v46 = vadd.f32 %v13807_v58, %v13503_v63  ;;  %v5387_v63 = vadd.f32 %v13807_v58, %v13485_v29 }
 0x417   : > { %10007 = vmatprep.mubr.bf16.mxu0 %v13432_v34  ;;  %10020 = vmatpush3.bf16.msra.mxu0 %v10723_v4  ;;  %v7135_v34 = vsel %vm5333_vm1, %v7133_v59, %v13637_v23 }
 0x418   : > { %10021 = vmatprep.subr.bf16.mxu0 %v10724_v30 }
 0x41b   : > { %10022 = vmatpush3.bf16.msra.mxu0 %v10724_v30 }
 0x41c   : > { %10023 = vmatprep.subr.bf16.mxu0 %v10725_v61 }
 0x41e   : > { %10008 = vmatmul.mubr.bf16.gmra.mrb[204].mxu0 %v6936_v60  ;;  %v5386_v60 = vadd.f32 %v13807_v58, %v13480_v19 }
 0x41f   : > { %10024 = vmatpush3.bf16.msra.mxu0 %v10725_v61  ;;  %10027 = vmatprep.mubr.bf16.mxu0 %v7135_v34 }
 0x420   : > { %10025 = vmatprep.subr.bf16.mxu0 %v10726_v45 }
 0x423   : > { %10026 = vmatpush3.bf16.msra.mxu0 %v10726_v45 }
 0x424   : > { %10043 = vmatprep.subr.bf16.mxu0 %v10775_v35 }
 0x426   : > { %10028 = vmatmul.mubr.bf16.vlgmr.msra.gmra.mrb[192].mxu0 %v13647_v9  ;;  %v10778_v9 = vld [vmem:[%s13897_s6 + $0x218] sm:$0xff]  }
 0x427   : > { %10031 = vmatprep.mubr.bf16.mxu0 %v13659_v40  ;;  %10044 = vmatpush3.bf16.msra.mxu0 %v10775_v35 }
 0x428   : > { %10045 = vmatprep.subr.bf16.mxu0 %v10776_v14  ;;  %v10069_v23 = vpop.f32.mrb[64].mxu1 }
 0x429   : > { %v7504_v42 = vpop.f32.mrb[65].mxu1 }
 0x42a   : > { %v10070_v44 = vpop.f32.mrb[66].mxu1 }
 0x42b   : > { %10046 = vmatpush3.bf16.msra.mxu0 %v10776_v14  ;;  %v7507_v47 = vpop.f32.mrb[67].mxu1 }
 0x42c   : > { %10047 = vmatprep.subr.bf16.mxu0 %v10777_v2 }
 0x42e   : > { %10032 = vmatmul.mubr.bf16.gmra.mrb[196].mxu0 %v13438_v21 }
 0x42f   : > { %10035 = vmatprep.mubr.bf16.mxu0 %v13226_v16  ;;  %10048 = vmatpush3.bf16.msra.mxu0 %v10777_v2  ;;  %v7338_v16 = vshrl.u32 %v7106_v50, 16 }
 0x430   : > { %10049 = vmatprep.subr.bf16.mxu0 %v10778_v9 }
 0x431   : > { %v13773_v40 = vpop.f32.mrb[68].mxu1  ;;  %v7340_v49 = vrot.slane %v7338_v16, 4 }
 0x432   : > { %v13775_v1 = vpop.f32.mrb[69].mxu1 }
 0x433   : > { %10050 = vmatpush3.bf16.msra.mxu0 %v10778_v9  ;;  %v13777_v39 = vpop.f32.mrb[70].mxu1  ;;  %v7344_v48 = vor.u32 %v7343_v32, %v7340_v49 }
 0x434   : > { %10051 = vmatprep.subr.bf16.mxu0 %v10779_v5  ;;  %v13782_v21 = vpop.f32.mrb[71].mxu1 }
 0x436   : > { %10036 = vmatmul.mubr.bf16.gmra.mrb[200].mxu0 %v13443_v6  ;;  %v7149_v6 = vsel %vm5333_vm1, %v7146_v56, %v7148_v25 }
 0x437   : > { %10039 = vmatprep.mubr.bf16.mxu0 %v13455_v43  ;;  %10052 = vmatpush3.bf16.msra.mxu0 %v10779_v5  ;;  %v7348_v43 = vsel %vm5896_vm3, %v7344_v48, %v13352_v24  ;;  %v5384_v24 = vadd.f32 %v13807_v58, %v13463_v31  ;;  %v5374_v48 = vadd.f32 %v13807_v58, %v13496_v52 }
 0x438   : > { %10053 = vmatprep.subr.bf16.mxu0 %v10780_v11 }
 0x43b   : > { %10054 = vmatpush3.bf16.msra.mxu0 %v10780_v11 }
 0x43c   : > { %10055 = vmatprep.subr.bf16.mxu0 %v10781_v15 }
 0x43e   : > { %10040 = vmatmul.mubr.bf16.gmra.mrb[204].mxu0 %v7149_v6 }
 0x43f   : > { %10056 = vmatpush3.bf16.msra.mxu0 %v10781_v15  ;;  %10059 = vmatprep.mubr.bf16.mxu0 %v7348_v43 }
 0x440   : > { %10057 = vmatprep.subr.bf16.mxu0 %v10782_v3 }
 0x443   : > { %10058 = vmatpush3.bf16.msra.mxu0 %v10782_v3 }
 0x446   : > { %10060 = vmatmul.mubr.bf16.vlgmr.msra.gmra.mrb[192].mxu0 %v13374_v54  ;;  %v5385_v54 = vadd.f32 %v13807_v58, %v13470_v53 }
 0x447   : > { %10063 = vmatprep.mubr.bf16.mxu0 %v13378_v22  ;;  %v13818_v22 = vld [vmem:[%s13898_s7] ss:$0 sm:$0xff] }
 0x44e   : > { %10064 = vmatmul.mubr.bf16.gmra.mrb[196].mxu0 %v13460_v17 }
 0x509   : > { %v10037_v56 = vpop.f32.mrb[200].mxu0 }
 0x50a   : > { %v10099_v20 = vadd.f32 %v10037_v56, %v5384_v24  ;;  %v7272_v12 = vpop.f32.mrb[201].mxu0  ;;  %v5375_v56 = vadd.f32 %v13807_v58, %v13511_v41  ;;  %v5380_v41 = vadd.f32 %v13807_v58, %v13515_v13  ;;  %v5379_v13 = vadd.f32 %v13807_v58, %v13530_v37 }
 0x50b   : > { %v10101_v17 = vadd.f32 %v7272_v12, %v5382_v57  ;;  %v10038_v8 = vpop.f32.mrb[202].mxu0 }
 0x50c   : > { %v10100_v31 = vadd.f32 %v10099_v20, %v10069_v23  ;;  %v10103_v4 = vadd.f32 %v10038_v8, %v5385_v54  ;;  %v7275_v7 = vpop.f32.mrb[203].mxu0  ;;  %v5389_v23 = vadd.f32 %v13807_v58, %v13522_v0 }
 0x50d   : > { %v10102_v36 = vadd.f32 %v10101_v17, %v7504_v42  ;;  %v10105_v55 = vadd.f32 %v7275_v7, %v5383_v27 }
 0x50e   : > { %v7568_v30 = vadd.f32 %v10100_v31, %v13818_v22  ;;  %v10104_v38 = vadd.f32 %v10103_v4, %v10070_v44 }
 0x50f   : > { %v7566_v53 = vadd.f32 %v10102_v36, %v13818_v22  ;;  %v10106_v10 = vadd.f32 %v10105_v55, %v7507_v47  ;;  %v5378_v36 = vadd.f32 %v13807_v58, %v13519_v62 }
 0x510   : > { %v7584_v26 = vmax.f32 %v7568_v30, 0.0  ;;  %v7569_v61 = vadd.f32 %v10104_v38, %v13818_v22  ;;  %v5381_v38 = vadd.f32 %v13807_v58, %v13526_v33 }
 0x511   : > { %v7582_v50 = vmax.f32 %v7566_v53, 0.0  ;;  %v7567_v59 = vadd.f32 %v10106_v10, %v13818_v22  ;;  %v10041_v45 = vpop.f32.mrb[204].mxu0 }
 0x512   : > { %7600 = vst [vmem:[%s13827_s11 + $0x50] sm:$0xff] %v7584_v26  ;;  %v7585_v34 = vmax.f32 %v7569_v61, 0.0  ;;  %v10107_v35 = vadd.f32 %v10041_v45, %v5388_v46  ;;  %v7288_v14 = vpop.f32.mrb[205].mxu0 }
 0x513   : > { %7598 = vst [vmem:[%s13827_s11 + $0x40] sm:$0xff] %v7582_v50  ;;  %v7583_v42 = vmax.f32 %v7567_v59, 0.0  ;;  %v10109_v44 = vadd.f32 %v7288_v14, %v5386_v60  ;;  %v10042_v2 = vpop.f32.mrb[206].mxu0 }
 0x514   : > { %7601 = vst [vmem:[%s13827_s11 + $0x58] sm:$0xff] %v7585_v34  ;;  %v10108_v47 = vadd.f32 %v10107_v35, %v13773_v40  ;;  %v10111_v9 = vadd.f32 %v10042_v2, %v5389_v23  ;;  %v7291_v19 = vpop.f32.mrb[207].mxu0  ;;  %v5376_v40 = vadd.f32 %v13807_v58, %v13492_v51 }
 0x515   : > { %7599 = vst [vmem:[%s13827_s11 + $0x48] sm:$0xff] %v7583_v42  ;;  %v10110_v5 = vadd.f32 %v10109_v44, %v13775_v1  ;;  %v10113_v16 = vadd.f32 %v7291_v19, %v5387_v63 }
 0x516   : > { %v7572_v28 = vadd.f32 %v10108_v47, %v13818_v22  ;;  %v10112_v0 = vadd.f32 %v10111_v9, %v13777_v39 }
 0x517   : > { %v7570_v11 = vadd.f32 %v10110_v5, %v13818_v22  ;;  %v10114_v49 = vadd.f32 %v10113_v16, %v13782_v21  ;;  %v5377_v21 = vadd.f32 %v13807_v58, %v13507_v18 }
 0x518   : > { %v7588_v29 = vmax.f32 %v7572_v28, 0.0  ;;  %v7573_v32 = vadd.f32 %v10112_v0, %v13818_v22 }
 0x519   : > { %v7586_v25 = vmax.f32 %v7570_v11, 0.0  ;;  %v7571_v1 = vadd.f32 %v10114_v49, %v13818_v22  ;;  %v10061_v15 = vpop.f32.mrb[192].mxu0 }
 0x51a   : > { %7604 = vst [vmem:[%s13827_s11 + $0x70] sm:$0xff] %v7588_v29  ;;  %v7589_v39 = vmax.f32 %v7573_v32, 0.0  ;;  %v10091_v6 = vadd.f32 %v10061_v15, %v5376_v40  ;;  %v7472_v43 = vpop.f32.mrb[193].mxu0 }
 0x51b   : > { %7602 = vst [vmem:[%s13827_s11 + $0x60] sm:$0xff] %v7586_v25  ;;  %v7587_v3 = vmax.f32 %v7571_v1, 0.0  ;;  %v10092_v24 = vadd.f32 %v7472_v43, %v5374_v48  ;;  %v10062_v51 = vpop.f32.mrb[194].mxu0 }
 0x51c   : > { %7605 = vst [vmem:[%s13827_s11 + $0x78] sm:$0xff] %v7589_v39  ;;  %v7560_v57 = vadd.f32 %v10091_v6, %v13818_v22  ;;  %v10093_v52 = vadd.f32 %v10062_v51, %v5377_v21  ;;  %v7475_v20 = vpop.f32.mrb[195].mxu0 }
 0x51d   : > { %7603 = vst [vmem:[%s13827_s11 + $0x68] sm:$0xff] %v7587_v3  ;;  %v7558_v12 = vadd.f32 %v10092_v24, %v13818_v22  ;;  %v10094_v54 = vadd.f32 %v7475_v20, %v5375_v56 }
 0x51e   : > { %v7576_v18 = vmax.f32 %v7560_v57, 0.0  ;;  %v7561_v17 = vadd.f32 %v10093_v52, %v13818_v22 }
 0x51f   : > { %v7574_v8 = vmax.f32 %v7558_v12, 0.0  ;;  %v7559_v27 = vadd.f32 %v10094_v54, %v13818_v22 }
 0x520   : > { %7592 = vst [vmem:[%s13827_s11 + $0x10] sm:$0xff] %v7576_v18  ;;  %v7577_v31 = vmax.f32 %v7561_v17, 0.0 }
 0x521   : > { %7590 = vst [vmem:[%s13827_s11] sm:$0xff] %v7574_v8  ;;  %v7575_v4 = vmax.f32 %v7559_v27, 0.0  ;;  %v10065_v7 = vpop.f32.mrb[196].mxu0 }
 0x522   : > { %7593 = vst [vmem:[%s13827_s11 + $0x18] sm:$0xff] %v7577_v31  ;;  %v10095_v55 = vadd.f32 %v10065_v7, %v5380_v41  ;;  %v7488_v30 = vpop.f32.mrb[197].mxu0 }
 0x523   : > { %7591 = vst [vmem:[%s13827_s11 + $0x8] sm:$0xff] %v7575_v4  ;;  %v10096_v53 = vadd.f32 %v7488_v30, %v5378_v36  ;;  %v10066_v10 = vpop.f32.mrb[198].mxu0 }
 0x524   : > { %v7564_v26 = vadd.f32 %v10095_v55, %v13818_v22  ;;  %v10097_v61 = vadd.f32 %v10066_v10, %v5381_v38  ;;  %v7491_v62 = vpop.f32.mrb[199].mxu0 }
 0x525   : > { %v7562_v46 = vadd.f32 %v10096_v53, %v13818_v22  ;;  %v10098_v50 = vadd.f32 %v7491_v62, %v5379_v13 }
 0x526   : > { %v7580_v59 = vmax.f32 %v7564_v26, 0.0  ;;  %v7565_v45 = vadd.f32 %v10097_v61, %v13818_v22 }
 0x527   : > { %v7578_v33 = vmax.f32 %v7562_v46, 0.0  ;;  %v7563_v60 = vadd.f32 %v10098_v50, %v13818_v22 }
 0x528   : > { %7596 = vst [vmem:[%s13827_s11 + $0x30] sm:$0xff] %v7580_v59  ;;  %v7581_v34 = vmax.f32 %v7565_v45, 0.0 }
 0x529   : > { %7594 = vst [vmem:[%s13827_s11 + $0x20] sm:$0xff] %v7578_v33  ;;  %v7579_v35 = vmax.f32 %v7563_v60, 0.0 }
 0x52a   : > { %7597 = vst [vmem:[%s13827_s11 + $0x38] sm:$0xff] %v7581_v34 }
 0x52b   : > { %7595 = vst [vmem:[%s13827_s11 + $0x28] sm:$0xff] %v7579_v35 }
 0x52c PF: > { %s18_s27 = sadd.s32 1, %s10789_s27  }
 0x52d   : > { %p15_p4 = scmp.ge.s32.totalorder %s18_s27, 4  }
 0x52f   :  { %17 = sbr.rel (!%p15_p4) target bundleno = 1 (0x1), region = 96 }

</bundles_post_ra>
